<compile_context>
chip_gen: v7x
topology: tpu7x:2x2x1
jax: 0.10.0
libtpu: 0.0.40
codegen_flags: <defaults>
</compile_context>

<pallas_src>
import functools

import jax
import jax.numpy as jnp
from jax import lax
from jax.experimental import pallas as pl
from jax.experimental.pallas import tpu as pltpu

_LANES = 128


# --------------------------------------------------------------------------- hw queries
def _round_up(n, m):
    return ((n + m - 1) // m) * m


def _tpu_generation():
    """Best-effort TPU generation (7 for v7x, 6 for v6e, ...); 0 if unknown."""
    try:
        kind = jax.devices()[0].device_kind.lower()
    except Exception:  # pragma: no cover - non-TPU / query failure
        return 0
    for gen in (7, 6, 5, 4, 3):
        if f"v{gen}" in kind or f"tpu{gen}" in kind:
            return gen
    return 0


def _vmem_limit_bytes():
    """Generation-aware scoped-VMEM budget with headroom (perf review item)."""
    cap = 128 * 1024 * 1024
    try:
        cap = int(getattr(pltpu.get_tpu_info(), "vmem_capacity_bytes", cap))
    except Exception:  # pragma: no cover
        pass
    # ~96 MiB on 128 MiB parts (v5e/v6e), ~48 MiB on 64 MiB parts (v7x).
    return max(32 * 1024 * 1024, min(cap * 3 // 4, 100 * 1024 * 1024))


def _choose_tiles(b, t, hp, n_cores, vmem_limit):
    """Pick (batch_chunk, padded_batch, time_chunk, padded_time)."""
    # Batch chunk: sublane-aligned; split across TensorCores only on multi-core (v7x).
    if n_cores >= 2 and b > 8:
        bc = _round_up((b + 1) // 2, 8)
    else:
        bc = _round_up(b, 8)
    bc = min(bc, 256)                       # cap per-chunk state (h carry, gi scratch)
    bp = _round_up(b, bc)
    # Time chunk: amortize the ~0.35us grid-step overhead + per-chunk DMA while keeping
    # the f32 gi scratch (tc*bc*3Hp*4 B) well inside the VMEM budget.
    tc = 32
    while tc > 1 and tc * bc * 3 * hp * 4 > vmem_limit // 4:
        tc //= 2
    if t < tc:
        tc = t
    tp = _round_up(t, tc)
    return bc, bp, tc, tp


# -------------------------------------------------------------------------------- kernel
def _gru_fused_kernel(x_ref, w_ih_ref, b_comb_ref, w_hh_ref, b_hhn_ref,
                      w_fc_ref, b_fc_ref, out_ref, gi_ref, h_ref, *,
                      hidden_pad, seq_chunk, seq_len, mask_tail,
                      mxu_dtype, gate_dtype):
    """Fused input projection + serial GRU recurrence + Linear head.

    Grid = (batch-chunks ["parallel"], time-chunks ["arbitrary"]).
    x_ref is time-major: (tc, bc, I).  h carry (f32) and gi scratch live in VMEM.
    """
    hp = hidden_pad
    tc = seq_chunk
    bc = h_ref.shape[0]
    c = pl.program_id(1)

    @pl.when(c == 0)
    def _():
        h_ref[...] = jnp.zeros_like(h_ref)          # h0 = zeros (per batch chunk)

    # ---- chunk-level input projection, hoisted off the serial path -------------------
    # One (tc*bc, I) x (I, 3Hp) MXU matmul; gi stays in VMEM (no HBM round trip).
    x2d = x_ref[...].reshape(tc * bc, x_ref.shape[-1])        # time-major rows
    gi_ref[...] = (jnp.dot(x2d.astype(mxu_dtype), w_ih_ref[...],
                           preferred_element_type=jnp.float32)
                   + b_comb_ref[...])                         # (tc*bc, 3Hp) f32

    # ---- loop-invariant hoists --------------------------------------------------------
    w_hh = w_hh_ref[...]                                      # (Hp, 3Hp) bf16
    b_hhn = jnp.broadcast_to(b_hhn_ref[...], (bc, hp))        # hoisted broadcast
    chunk_start = c * tc

    def step(t, h):
        # Time-major gi: contiguous, sublane-aligned whole-row slice per timestep.
        row = pl.multiple_of(t * bc, bc)
        gi_t = gi_ref[pl.ds(row, bc), :]                      # (bc, 3Hp) f32
        gh = jnp.dot(h.astype(mxu_dtype), w_hh,
                     preferred_element_type=jnp.float32)      # (bc, 3Hp) f32 accum
        r = jax.nn.sigmoid((gi_t[:, :hp] + gh[:, :hp]).astype(gate_dtype))
        z = jax.nn.sigmoid((gi_t[:, hp:2 * hp] + gh[:, hp:2 * hp]).astype(gate_dtype))
        n = jnp.tanh((gi_t[:, 2 * hp:]
                      + r.astype(jnp.float32) * (gh[:, 2 * hp:] + b_hhn)
                      ).astype(gate_dtype)).astype(jnp.float32)
        h_new = n + z.astype(jnp.float32) * (h - n)           # == (1-z)*n + z*h
        if mask_tail:                                         # zero-padded tail steps
            h_new = jnp.where(chunk_start + t < seq_len, h_new, h)
        return h_new

    # Moderate unroll: keeps LLO scheduling visibility without unbounded live ranges.
    h = lax.fori_loop(0, tc, step, h_ref[...], unroll=min(tc, 8))
    h_ref[...] = h

    @pl.when(c == pl.num_programs(1) - 1)
    def _():
        # Fused Linear head on the final hidden state; lane-dense (bc, Op) store.
        out_ref[...] = (jnp.dot(h.astype(mxu_dtype), w_fc_ref[...],
                                preferred_element_type=jnp.float32)
                        + b_fc_ref[...])


# ----------------------------------------------------------------------- param plumbing
def init_params(key, input_size, hidden_size, output_size):
    """Deterministic synthetic params in native PyTorch layout."""
    k = jax.random.split(key, 6)
    s = 1.0 / jnp.sqrt(hidden_size)
    return dict(
        weight_ih_l0=jax.random.uniform(k[0], (3 * hidden_size, input_size), jnp.float32, -s, s),
        weight_hh_l0=jax.random.uniform(k[1], (3 * hidden_size, hidden_size), jnp.float32, -s, s),
        bias_ih_l0=jax.random.uniform(k[2], (3 * hidden_size,), jnp.float32, -s, s),
        bias_hh_l0=jax.random.uniform(k[3], (3 * hidden_size,), jnp.float32, -s, s),
        fc_weight=jax.random.uniform(k[4], (output_size, hidden_size), jnp.float32, -s, s),
        fc_bias=jax.random.uniform(k[5], (output_size,), jnp.float32, -s, s))


def prepare_params(params, mxu_dtype=jnp.bfloat16):
    """PyTorch-layout params -> padded, gate-major (r|z|n), MXU-friendly layout."""
    w_ih = params["weight_ih_l0"]     # (3H, I)
    w_hh = params["weight_hh_l0"]     # (3H, H)
    b_ih = params["bias_ih_l0"]       # (3H,)
    b_hh = params["bias_hh_l0"]       # (3H,)
    w_fc = params["fc_weight"]        # (O, H)
    b_fc = params["fc_bias"]          # (O,)

    hs = w_hh.shape[1]
    isz = w_ih.shape[1]
    osz = w_fc.shape[0]
    hp = _round_up(hs, _LANES)        # lane-aligned gate width
    op = _round_up(osz, _LANES)       # lane-dense output slab

    def pad_gate_out(w):              # (3H, X) -> (3, Hp, X), zero padded per gate
        w = w.reshape(3, hs, -1)
        return jnp.pad(w, ((0, 0), (0, hp - hs), (0, 0)))

    # (I, 3Hp): x @ W_ih layout, gate-major with each gate lane-padded.
    w_ih_k = jnp.transpose(pad_gate_out(w_ih), (2, 0, 1)).reshape(isz, 3 * hp)
    # (Hp, 3Hp): rows for padded hidden units are zero, so padded h stays exactly 0.
    w_hh_p = jnp.pad(pad_gate_out(w_hh), ((0, 0), (0, 0), (0, hp - hs)))
    w_hh_k = jnp.transpose(w_hh_p, (2, 0, 1)).reshape(hp, 3 * hp)

    def pad_bias(b):                  # (3H,) -> (1, 3Hp) gate-major
        return jnp.pad(b.reshape(3, hs), ((0, 0), (0, hp - hs))).reshape(1, 3 * hp)

    bi = pad_bias(b_ih)
    bh = pad_bias(b_hh)
    # r/z biases pre-summed into the chunk input projection; the n-gate hidden bias must
    # stay inside r * (...) (torch.nn.GRU semantics).
    b_comb = jnp.concatenate([bi[:, :2 * hp] + bh[:, :2 * hp], bi[:, 2 * hp:]], axis=1)
    b_hhn = bh[:, 2 * hp:]

    w_fc_k = jnp.pad(w_fc.T, ((0, hp - hs), (0, op - osz)))      # (Hp, Op)
    b_fc_k = jnp.pad(b_fc.reshape(1, osz), ((0, 0), (0, op - osz)))

    return dict(
        w_ih=w_ih_k.astype(mxu_dtype), w_hh=w_hh_k.astype(mxu_dtype),
        w_fc=w_fc_k.astype(mxu_dtype),
        b_comb=b_comb.astype(jnp.float32), b_hhn=b_hhn.astype(jnp.float32),
        b_fc=b_fc_k.astype(jnp.float32),
        hidden_size=hs, hidden_pad=hp, output_size=osz, output_pad=op)


# ------------------------------------------------------------------------------ wrapper
def _make_gru_call(*, bp, tp, isz, hp, op, bc, tc, seq_len, mxu_dtype, gate_dtype,
                   vmem_limit, single_buffer_weights):
    kernel = functools.partial(
        _gru_fused_kernel, hidden_pad=hp, seq_chunk=tc, seq_len=seq_len,
        mask_tail=(tp != seq_len), mxu_dtype=mxu_dtype, gate_dtype=gate_dtype)

    const_kwargs = {}
    if single_buffer_weights:
        # Constant-index operands: single-buffer to free VMEM (perf review item).
        const_kwargs = dict(pipeline_mode=pl.Buffered(1))

    def const_spec(shape):
        return pl.BlockSpec(shape, lambda b, c: (0,) * len(shape), **const_kwargs)

    grid_spec = pltpu.PrefetchScalarGridSpec(
        num_scalar_prefetch=0,
        grid=(bp // bc, tp // tc),
        in_specs=[
            pl.BlockSpec((tc, bc, isz), lambda b, c: (c, b, 0)),   # time-major x chunk
            const_spec((isz, 3 * hp)),                             # W_ih
            const_spec((1, 3 * hp)),                               # combined r/z/n bias
            const_spec((hp, 3 * hp)),                              # W_hh
            const_spec((1, hp)),                                   # b_hh (n gate)
            const_spec((hp, op)),                                  # W_fc
            const_spec((1, op)),                                   # b_fc
        ],
        out_specs=pl.BlockSpec((bc, op), lambda b, c: (b, 0)),
        scratch_shapes=[
            pltpu.VMEM((tc * bc, 3 * hp), jnp.float32),            # gi chunk scratch
            pltpu.VMEM((bc, hp), jnp.float32),                     # hidden-state carry
        ],
    )
    return pl.pallas_call(
        kernel,
        out_shape=jax.ShapeDtypeStruct((bp, op), jnp.float32),
        grid_spec=grid_spec,
        compiler_params=pltpu.CompilerParams(
            dimension_semantics=("parallel", "arbitrary"),
            vmem_limit_bytes=vmem_limit),
    )


def gru_model_forward(x, params, *, mxu_dtype=jnp.bfloat16):
    """x: (B, T, I) float32.  Returns (out, None) with out: (B, output_size)."""
    bsz, tsz, isz = x.shape
    if tsz == 0:
        raise ValueError("GRUModel forward requires at least one timestep (T > 0).")

    p = prepare_params(params, mxu_dtype)
    hp, op, osz = p["hidden_pad"], p["output_pad"], p["output_size"]

    gen = _tpu_generation()
    n_cores = 2 if gen >= 7 else 1                    # batch split only on 2-TC parts
    gate_dtype = jnp.bfloat16 if gen >= 6 else jnp.float32   # bf16 VPU/EUP on v6e/v7x
    vmem_limit = _vmem_limit_bytes()
    bc, bp, tc, tp = _choose_tiles(bsz, tsz, hp, n_cores, vmem_limit)

    # Time-major x, zero-padded to (Tp, Bp, I).  The transpose is tiny (I << 3Hp) and
    # buys contiguous per-step gi slices inside the kernel.
    xt = jnp.transpose(x, (1, 0, 2))
    xt = jnp.pad(xt, ((0, tp - tsz), (0, bp - bsz), (0, 0)))

    def run(single_buffer_weights):
        call = _make_gru_call(
            bp=bp, tp=tp, isz=isz, hp=hp, op=op, bc=bc, tc=tc, seq_len=tsz,
            mxu_dtype=mxu_dtype, gate_dtype=gate_dtype, vmem_limit=vmem_limit,
            single_buffer_weights=single_buffer_weights)
        return jax.block_until_ready(
            call(xt, p["w_ih"], p["b_comb"], p["w_hh"], p["b_hhn"],
                 p["w_fc"], p["b_fc"]))

    try:
        out_padded = run(True)
    except Exception:  # noqa: BLE001  (pipeline_mode / pl.Buffered unsupported -> default buffering)
        out_padded = run(False)

    return out_padded[:bsz, :osz], None


# ---------------------------------------------------------------------------- reference
def reference_forward(x, params, mxu_dtype=jnp.float32):
    """Pure-JAX lax.scan reference matching torch.nn.GRU + Linear semantics."""
    bsz, _, _ = x.shape
    hs = params["weight_hh_l0"].shape[1]
    w_ih = params["weight_ih_l0"].T.astype(mxu_dtype)     # (I, 3H)
    w_hh = params["weight_hh_l0"].T.astype(mxu_dtype)     # (H, 3H)
    b_ih = params["bias_ih_l0"]
    b_hh = params["bias_hh_l0"]

    def step(h, x_t):
        gi = jnp.dot(x_t.astype(mxu_dtype), w_ih, preferred_element_type=jnp.float32) + b_ih
        gh = jnp.dot(h.astype(mxu_dtype), w_hh, preferred_element_type=jnp.float32) + b_hh
        r = jax.nn.sigmoid(gi[:, :hs] + gh[:, :hs])
        z = jax.nn.sigmoid(gi[:, hs:2 * hs] + gh[:, hs:2 * hs])
        n = jnp.tanh(gi[:, 2 * hs:] + r * gh[:, 2 * hs:])
        return (1.0 - z) * n + z * h, None

    h0 = jnp.zeros((bsz, hs), jnp.float32)
    h_last, _ = jax.lax.scan(step, h0, jnp.transpose(x, (1, 0, 2)))
    w_fc = params["fc_weight"].T.astype(mxu_dtype)
    return (jnp.dot(h_last.astype(mxu_dtype), w_fc, preferred_element_type=jnp.float32)
            + params["fc_bias"])


if __name__ == "__main__":
    key = jax.random.PRNGKey(0)
    k1, k2, k3, k4 = jax.random.split(key, 4)

    def check(kx, kp, B, T, I, H, O):
        x = jax.random.normal(kx, (B, T, I), jnp.float32)
        params = init_params(kp, I, H, O)
        out, h_n = gru_model_forward(x, params)
        out = jax.block_until_ready(out)
        assert out.shape == (B, O), out.shape
        assert h_n is None
        # Tight-ish check vs a reference mirroring the kernel's bf16 MXU inputs; loose
        # check vs full-f32 torch.nn.GRU math (bf16 matmuls/gates cannot hit 1e-5).
        ref_bf16 = reference_forward(x, params, mxu_dtype=jnp.bfloat16)
        ref_f32 = reference_forward(x, params, mxu_dtype=jnp.float32)
        assert jnp.allclose(out, ref_bf16, atol=5e-2, rtol=5e-2), (out, ref_bf16)
        assert jnp.allclose(out, ref_f32, atol=1.5e-1, rtol=1.5e-1), (out, ref_f32)

    # Small shapes implied by the module: batch=2, seq=8, input=4, hidden=32, output=1.
    check(k1, k2, B=2, T=8, I=4, H=32, O=1)
    # Odd batch / long odd sequence: exercises batch padding and the masked time tail.
    check(k3, k4, B=3, T=37, I=4, H=32, O=1)

    print("KERNEL_OK")
</pallas_src>

<mosaic_0001>
module attributes {stable_mosaic.version = 11 : i64} {
  func.func @_gru_fused_kernel(%arg0: i32, %arg1: i32, %arg2: memref<8x8x4xf32, #tpu.memory_space<vmem>>, %arg3: memref<4x384xbf16, #tpu.memory_space<vmem>>, %arg4: memref<1x384xf32, #tpu.memory_space<vmem>>, %arg5: memref<128x384xbf16, #tpu.memory_space<vmem>>, %arg6: memref<1x128xf32, #tpu.memory_space<vmem>>, %arg7: memref<128x128xbf16, #tpu.memory_space<vmem>>, %arg8: memref<1x128xf32, #tpu.memory_space<vmem>>, %arg9: memref<8x128xf32, #tpu.memory_space<vmem>>, %arg10: memref<64x384xf32, #tpu.memory_space<vmem>>, %arg11: memref<8x128xf32, #tpu.memory_space<vmem>>) attributes {dimension_semantics = [#tpu.dimension_semantics<parallel>, #tpu.dimension_semantics<arbitrary>], iteration_bounds = array<i64: 1, 1>, scalar_prefetch = 0 : i64, scratch_operands = 2 : i64, tpu.core_type = #tpu.core_type<tc>, window_params = [{transform_indices = @transform_0, window_bounds = array<i64: 8, 8, 4>}, {pipeline_mode = #tpu.pipeline_mode<synchronous>, transform_indices = @transform_1, window_bounds = array<i64: 4, 384>}, {pipeline_mode = #tpu.pipeline_mode<synchronous>, transform_indices = @transform_2, window_bounds = array<i64: 1, 384>}, {pipeline_mode = #tpu.pipeline_mode<synchronous>, transform_indices = @transform_3, window_bounds = array<i64: 128, 384>}, {pipeline_mode = #tpu.pipeline_mode<synchronous>, transform_indices = @transform_4, window_bounds = array<i64: 1, 128>}, {pipeline_mode = #tpu.pipeline_mode<synchronous>, transform_indices = @transform_5, window_bounds = array<i64: 128, 128>}, {pipeline_mode = #tpu.pipeline_mode<synchronous>, transform_indices = @transform_6, window_bounds = array<i64: 1, 128>}, {transform_indices = @transform_7, window_bounds = array<i64: 8, 128>}]} {
    %c0_i32 = arith.constant 0 : i32
    %0 = arith.cmpi eq, %arg1, %c0_i32 : i32
    %1 = arith.extui %0 : i1 to i32
    %c0_i32_0 = arith.constant 0 : i32
    %2 = arith.cmpi ne, %1, %c0_i32_0 : i32
    scf.if %2 {
      %cst_60 = arith.constant 0.000000e+00 : f32
      %269 = vector.broadcast %cst_60 : f32 to vector<8x128xf32>
      %c0_61 = arith.constant 0 : index
      %c0_62 = arith.constant 0 : index
      %270 = vector.load %arg11[%c0_61, %c0_62] : memref<8x128xf32, #tpu.memory_space<vmem>>, vector<8x128xf32>
      tpu.vector_store %arg11[%c0_61, %c0_62], %269 {strides = array<i32>} : memref<8x128xf32, #tpu.memory_space<vmem>>, vector<8x128xf32>,
    } else {
    }
    %c0 = arith.constant 0 : index
    %c0_1 = arith.constant 0 : index
    %c0_2 = arith.constant 0 : index
    %3 = vector.load %arg2[%c0, %c0_1, %c0_2] : memref<8x8x4xf32, #tpu.memory_space<vmem>>, vector<8x8x4xf32>
    %4 = vector.shape_cast %3 : vector<8x8x4xf32> to vector<64x4xf32>
    %5 = arith.truncf %4 : vector<64x4xf32> to vector<64x4xbf16>
    %c0_3 = arith.constant 0 : index
    %c0_4 = arith.constant 0 : index
    %6 = vector.load %arg3[%c0_3, %c0_4] : memref<4x384xbf16, #tpu.memory_space<vmem>>, vector<4x384xbf16>
    %cst = arith.constant dense<0.000000e+00> : vector<64x384xf32>
    %7 = tpu.matmul %5, %6, %cst {dimension_numbers = #tpu.dot_dimension_numbers<[1], [0], [0], [1], [0, 0, 1, 1], [], []>} : vector<64x4xbf16>, vector<4x384xbf16>, vector<64x384xf32> -> vector<64x384xf32>
    %c0_5 = arith.constant 0 : index
    %c0_6 = arith.constant 0 : index
    %8 = vector.load %arg4[%c0_5, %c0_6] : memref<1x384xf32, #tpu.memory_space<vmem>>, vector<1x384xf32>
    %9 = vector.broadcast %8 : vector<1x384xf32> to vector<64x384xf32>
    %10 = arith.addf %7, %9 : vector<64x384xf32>
    %c0_7 = arith.constant 0 : index
    %c0_8 = arith.constant 0 : index
    %11 = vector.load %arg10[%c0_7, %c0_8] : memref<64x384xf32, #tpu.memory_space<vmem>>, vector<64x384xf32>
    tpu.vector_store %arg10[%c0_7, %c0_8], %10 {strides = array<i32>} : memref<64x384xf32, #tpu.memory_space<vmem>>, vector<64x384xf32>,
    %c0_9 = arith.constant 0 : index
    %c0_10 = arith.constant 0 : index
    %12 = vector.load %arg5[%c0_9, %c0_10] : memref<128x384xbf16, #tpu.memory_space<vmem>>, vector<128x384xbf16>
    %c0_11 = arith.constant 0 : index
    %c0_12 = arith.constant 0 : index
    %13 = vector.load %arg6[%c0_11, %c0_12] : memref<1x128xf32, #tpu.memory_space<vmem>>, vector<1x128xf32>
    %14 = vector.shape_cast %13 : vector<1x128xf32> to vector<1x128xf32>
    %15 = vector.broadcast %14 : vector<1x128xf32> to vector<8x128xf32>
    %c0_13 = arith.constant 0 : index
    %c0_14 = arith.constant 0 : index
    %16 = vector.load %arg11[%c0_13, %c0_14] : memref<8x128xf32, #tpu.memory_space<vmem>>, vector<8x128xf32>
    %c0_i32_15 = arith.constant 0 : i32
    %c8_i32 = arith.constant 8 : i32
    %17 = arith.muli %c0_i32_15, %c8_i32 : i32
    %18 = tpu.assume_multiple %17, 8 : i32
    %19 = arith.index_cast %18 : i32 to index
    %c0_16 = arith.constant 0 : index
    %20 = vector.load %arg10[%19, %c0_16] : memref<64x384xf32, #tpu.memory_space<vmem>>, vector<8x384xf32>
    %21 = arith.truncf %16 : vector<8x128xf32> to vector<8x128xbf16>
    %cst_17 = arith.constant dense<0.000000e+00> : vector<8x384xf32>
    %22 = tpu.matmul %21, %12, %cst_17 {dimension_numbers = #tpu.dot_dimension_numbers<[1], [0], [0], [1], [0, 0, 1, 1], [], []>} : vector<8x128xbf16>, vector<128x384xbf16>, vector<8x384xf32> -> vector<8x384xf32>
    %23 = vector.extract_strided_slice %20 {offsets = [0, 0], sizes = [8, 128], strides = [1, 1]} : vector<8x384xf32> to vector<8x128xf32>
    %24 = vector.extract_strided_slice %22 {offsets = [0, 0], sizes = [8, 128], strides = [1, 1]} : vector<8x384xf32> to vector<8x128xf32>
    %25 = arith.addf %23, %24 : vector<8x128xf32>
    %26 = arith.negf %25 : vector<8x128xf32>
    %27 = math.exp %26 : vector<8x128xf32>
    %cst_18 = arith.constant 1.000000e+00 : f32
    %28 = vector.broadcast %cst_18 : f32 to vector<8x128xf32>
    %29 = arith.addf %28, %27 : vector<8x128xf32>
    %30 = arith.divf %28, %29 : vector<8x128xf32>
    %31 = vector.extract_strided_slice %20 {offsets = [0, 128], sizes = [8, 128], strides = [1, 1]} : vector<8x384xf32> to vector<8x128xf32>
    %32 = vector.extract_strided_slice %22 {offsets = [0, 128], sizes = [8, 128], strides = [1, 1]} : vector<8x384xf32> to vector<8x128xf32>
    %33 = arith.addf %31, %32 : vector<8x128xf32>
    %34 = arith.negf %33 : vector<8x128xf32>
    %35 = math.exp %34 : vector<8x128xf32>
    %cst_19 = arith.constant 1.000000e+00 : f32
    %36 = vector.broadcast %cst_19 : f32 to vector<8x128xf32>
    %37 = arith.addf %36, %35 : vector<8x128xf32>
    %38 = arith.divf %36, %37 : vector<8x128xf32>
    %39 = vector.extract_strided_slice %20 {offsets = [0, 256], sizes = [8, 128], strides = [1, 1]} : vector<8x384xf32> to vector<8x128xf32>
    %40 = vector.extract_strided_slice %22 {offsets = [0, 256], sizes = [8, 128], strides = [1, 1]} : vector<8x384xf32> to vector<8x128xf32>
    %41 = arith.addf %40, %15 : vector<8x128xf32>
    %42 = arith.mulf %30, %41 : vector<8x128xf32>
    %43 = arith.addf %39, %42 : vector<8x128xf32>
    %44 = math.tanh %43 : vector<8x128xf32>
    %45 = arith.subf %16, %44 : vector<8x128xf32>
    %46 = arith.mulf %38, %45 : vector<8x128xf32>
    %47 = arith.addf %44, %46 : vector<8x128xf32>
    %c1_i32 = arith.constant 1 : i32
    %c8_i32_20 = arith.constant 8 : i32
    %48 = arith.muli %c1_i32, %c8_i32_20 : i32
    %49 = tpu.assume_multiple %48, 8 : i32
    %50 = arith.index_cast %49 : i32 to index
    %c0_21 = arith.constant 0 : index
    %51 = vector.load %arg10[%50, %c0_21] : memref<64x384xf32, #tpu.memory_space<vmem>>, vector<8x384xf32>
    %52 = arith.truncf %47 : vector<8x128xf32> to vector<8x128xbf16>
    %cst_22 = arith.constant dense<0.000000e+00> : vector<8x384xf32>
    %53 = tpu.matmul %52, %12, %cst_22 {dimension_numbers = #tpu.dot_dimension_numbers<[1], [0], [0], [1], [0, 0, 1, 1], [], []>} : vector<8x128xbf16>, vector<128x384xbf16>, vector<8x384xf32> -> vector<8x384xf32>
    %54 = vector.extract_strided_slice %51 {offsets = [0, 0], sizes = [8, 128], strides = [1, 1]} : vector<8x384xf32> to vector<8x128xf32>
    %55 = vector.extract_strided_slice %53 {offsets = [0, 0], sizes = [8, 128], strides = [1, 1]} : vector<8x384xf32> to vector<8x128xf32>
    %56 = arith.addf %54, %55 : vector<8x128xf32>
    %57 = arith.negf %56 : vector<8x128xf32>
    %58 = math.exp %57 : vector<8x128xf32>
    %cst_23 = arith.constant 1.000000e+00 : f32
    %59 = vector.broadcast %cst_23 : f32 to vector<8x128xf32>
    %60 = arith.addf %59, %58 : vector<8x128xf32>
    %61 = arith.divf %59, %60 : vector<8x128xf32>
    %62 = vector.extract_strided_slice %51 {offsets = [0, 128], sizes = [8, 128], strides = [1, 1]} : vector<8x384xf32> to vector<8x128xf32>
    %63 = vector.extract_strided_slice %53 {offsets = [0, 128], sizes = [8, 128], strides = [1, 1]} : vector<8x384xf32> to vector<8x128xf32>
    %64 = arith.addf %62, %63 : vector<8x128xf32>
    %65 = arith.negf %64 : vector<8x128xf32>
    %66 = math.exp %65 : vector<8x128xf32>
    %cst_24 = arith.constant 1.000000e+00 : f32
    %67 = vector.broadcast %cst_24 : f32 to vector<8x128xf32>
    %68 = arith.addf %67, %66 : vector<8x128xf32>
    %69 = arith.divf %67, %68 : vector<8x128xf32>
    %70 = vector.extract_strided_slice %51 {offsets = [0, 256], sizes = [8, 128], strides = [1, 1]} : vector<8x384xf32> to vector<8x128xf32>
    %71 = vector.extract_strided_slice %53 {offsets = [0, 256], sizes = [8, 128], strides = [1, 1]} : vector<8x384xf32> to vector<8x128xf32>
    %72 = arith.addf %71, %15 : vector<8x128xf32>
    %73 = arith.mulf %61, %72 : vector<8x128xf32>
    %74 = arith.addf %70, %73 : vector<8x128xf32>
    %75 = math.tanh %74 : vector<8x128xf32>
    %76 = arith.subf %47, %75 : vector<8x128xf32>
    %77 = arith.mulf %69, %76 : vector<8x128xf32>
    %78 = arith.addf %75, %77 : vector<8x128xf32>
    %c2_i32 = arith.constant 2 : i32
    %c8_i32_25 = arith.constant 8 : i32
    %79 = arith.muli %c2_i32, %c8_i32_25 : i32
    %80 = tpu.assume_multiple %79, 8 : i32
    %81 = arith.index_cast %80 : i32 to index
    %c0_26 = arith.constant 0 : index
    %82 = vector.load %arg10[%81, %c0_26] : memref<64x384xf32, #tpu.memory_space<vmem>>, vector<8x384xf32>
    %83 = arith.truncf %78 : vector<8x128xf32> to vector<8x128xbf16>
    %cst_27 = arith.constant dense<0.000000e+00> : vector<8x384xf32>
    %84 = tpu.matmul %83, %12, %cst_27 {dimension_numbers = #tpu.dot_dimension_numbers<[1], [0], [0], [1], [0, 0, 1, 1], [], []>} : vector<8x128xbf16>, vector<128x384xbf16>, vector<8x384xf32> -> vector<8x384xf32>
    %85 = vector.extract_strided_slice %82 {offsets = [0, 0], sizes = [8, 128], strides = [1, 1]} : vector<8x384xf32> to vector<8x128xf32>
    %86 = vector.extract_strided_slice %84 {offsets = [0, 0], sizes = [8, 128], strides = [1, 1]} : vector<8x384xf32> to vector<8x128xf32>
    %87 = arith.addf %85, %86 : vector<8x128xf32>
    %88 = arith.negf %87 : vector<8x128xf32>
    %89 = math.exp %88 : vector<8x128xf32>
    %cst_28 = arith.constant 1.000000e+00 : f32
    %90 = vector.broadcast %cst_28 : f32 to vector<8x128xf32>
    %91 = arith.addf %90, %89 : vector<8x128xf32>
    %92 = arith.divf %90, %91 : vector<8x128xf32>
    %93 = vector.extract_strided_slice %82 {offsets = [0, 128], sizes = [8, 128], strides = [1, 1]} : vector<8x384xf32> to vector<8x128xf32>
    %94 = vector.extract_strided_slice %84 {offsets = [0, 128], sizes = [8, 128], strides = [1, 1]} : vector<8x384xf32> to vector<8x128xf32>
    %95 = arith.addf %93, %94 : vector<8x128xf32>
    %96 = arith.negf %95 : vector<8x128xf32>
    %97 = math.exp %96 : vector<8x128xf32>
    %cst_29 = arith.constant 1.000000e+00 : f32
    %98 = vector.broadcast %cst_29 : f32 to vector<8x128xf32>
    %99 = arith.addf %98, %97 : vector<8x128xf32>
    %100 = arith.divf %98, %99 : vector<8x128xf32>
    %101 = vector.extract_strided_slice %82 {offsets = [0, 256], sizes = [8, 128], strides = [1, 1]} : vector<8x384xf32> to vector<8x128xf32>
    %102 = vector.extract_strided_slice %84 {offsets = [0, 256], sizes = [8, 128], strides = [1, 1]} : vector<8x384xf32> to vector<8x128xf32>
    %103 = arith.addf %102, %15 : vector<8x128xf32>
    %104 = arith.mulf %92, %103 : vector<8x128xf32>
    %105 = arith.addf %101, %104 : vector<8x128xf32>
    %106 = math.tanh %105 : vector<8x128xf32>
    %107 = arith.subf %78, %106 : vector<8x128xf32>
    %108 = arith.mulf %100, %107 : vector<8x128xf32>
    %109 = arith.addf %106, %108 : vector<8x128xf32>
    %c3_i32 = arith.constant 3 : i32
    %c8_i32_30 = arith.constant 8 : i32
    %110 = arith.muli %c3_i32, %c8_i32_30 : i32
    %111 = tpu.assume_multiple %110, 8 : i32
    %112 = arith.index_cast %111 : i32 to index
    %c0_31 = arith.constant 0 : index
    %113 = vector.load %arg10[%112, %c0_31] : memref<64x384xf32, #tpu.memory_space<vmem>>, vector<8x384xf32>
    %114 = arith.truncf %109 : vector<8x128xf32> to vector<8x128xbf16>
    %cst_32 = arith.constant dense<0.000000e+00> : vector<8x384xf32>
    %115 = tpu.matmul %114, %12, %cst_32 {dimension_numbers = #tpu.dot_dimension_numbers<[1], [0], [0], [1], [0, 0, 1, 1], [], []>} : vector<8x128xbf16>, vector<128x384xbf16>, vector<8x384xf32> -> vector<8x384xf32>
    %116 = vector.extract_strided_slice %113 {offsets = [0, 0], sizes = [8, 128], strides = [1, 1]} : vector<8x384xf32> to vector<8x128xf32>
    %117 = vector.extract_strided_slice %115 {offsets = [0, 0], sizes = [8, 128], strides = [1, 1]} : vector<8x384xf32> to vector<8x128xf32>
    %118 = arith.addf %116, %117 : vector<8x128xf32>
    %119 = arith.negf %118 : vector<8x128xf32>
    %120 = math.exp %119 : vector<8x128xf32>
    %cst_33 = arith.constant 1.000000e+00 : f32
    %121 = vector.broadcast %cst_33 : f32 to vector<8x128xf32>
    %122 = arith.addf %121, %120 : vector<8x128xf32>
    %123 = arith.divf %121, %122 : vector<8x128xf32>
    %124 = vector.extract_strided_slice %113 {offsets = [0, 128], sizes = [8, 128], strides = [1, 1]} : vector<8x384xf32> to vector<8x128xf32>
    %125 = vector.extract_strided_slice %115 {offsets = [0, 128], sizes = [8, 128], strides = [1, 1]} : vector<8x384xf32> to vector<8x128xf32>
    %126 = arith.addf %124, %125 : vector<8x128xf32>
    %127 = arith.negf %126 : vector<8x128xf32>
    %128 = math.exp %127 : vector<8x128xf32>
    %cst_34 = arith.constant 1.000000e+00 : f32
    %129 = vector.broadcast %cst_34 : f32 to vector<8x128xf32>
    %130 = arith.addf %129, %128 : vector<8x128xf32>
    %131 = arith.divf %129, %130 : vector<8x128xf32>
    %132 = vector.extract_strided_slice %113 {offsets = [0, 256], sizes = [8, 128], strides = [1, 1]} : vector<8x384xf32> to vector<8x128xf32>
    %133 = vector.extract_strided_slice %115 {offsets = [0, 256], sizes = [8, 128], strides = [1, 1]} : vector<8x384xf32> to vector<8x128xf32>
    %134 = arith.addf %133, %15 : vector<8x128xf32>
    %135 = arith.mulf %123, %134 : vector<8x128xf32>
    %136 = arith.addf %132, %135 : vector<8x128xf32>
    %137 = math.tanh %136 : vector<8x128xf32>
    %138 = arith.subf %109, %137 : vector<8x128xf32>
    %139 = arith.mulf %131, %138 : vector<8x128xf32>
    %140 = arith.addf %137, %139 : vector<8x128xf32>
    %c4_i32 = arith.constant 4 : i32
    %c8_i32_35 = arith.constant 8 : i32
    %141 = arith.muli %c4_i32, %c8_i32_35 : i32
    %142 = tpu.assume_multiple %141, 8 : i32
    %143 = arith.index_cast %142 : i32 to index
    %c0_36 = arith.constant 0 : index
    %144 = vector.load %arg10[%143, %c0_36] : memref<64x384xf32, #tpu.memory_space<vmem>>, vector<8x384xf32>
    %145 = arith.truncf %140 : vector<8x128xf32> to vector<8x128xbf16>
    %cst_37 = arith.constant dense<0.000000e+00> : vector<8x384xf32>
    %146 = tpu.matmul %145, %12, %cst_37 {dimension_numbers = #tpu.dot_dimension_numbers<[1], [0], [0], [1], [0, 0, 1, 1], [], []>} : vector<8x128xbf16>, vector<128x384xbf16>, vector<8x384xf32> -> vector<8x384xf32>
    %147 = vector.extract_strided_slice %144 {offsets = [0, 0], sizes = [8, 128], strides = [1, 1]} : vector<8x384xf32> to vector<8x128xf32>
    %148 = vector.extract_strided_slice %146 {offsets = [0, 0], sizes = [8, 128], strides = [1, 1]} : vector<8x384xf32> to vector<8x128xf32>
    %149 = arith.addf %147, %148 : vector<8x128xf32>
    %150 = arith.negf %149 : vector<8x128xf32>
    %151 = math.exp %150 : vector<8x128xf32>
    %cst_38 = arith.constant 1.000000e+00 : f32
    %152 = vector.broadcast %cst_38 : f32 to vector<8x128xf32>
    %153 = arith.addf %152, %151 : vector<8x128xf32>
    %154 = arith.divf %152, %153 : vector<8x128xf32>
    %155 = vector.extract_strided_slice %144 {offsets = [0, 128], sizes = [8, 128], strides = [1, 1]} : vector<8x384xf32> to vector<8x128xf32>
    %156 = vector.extract_strided_slice %146 {offsets = [0, 128], sizes = [8, 128], strides = [1, 1]} : vector<8x384xf32> to vector<8x128xf32>
    %157 = arith.addf %155, %156 : vector<8x128xf32>
    %158 = arith.negf %157 : vector<8x128xf32>
    %159 = math.exp %158 : vector<8x128xf32>
    %cst_39 = arith.constant 1.000000e+00 : f32
    %160 = vector.broadcast %cst_39 : f32 to vector<8x128xf32>
    %161 = arith.addf %160, %159 : vector<8x128xf32>
    %162 = arith.divf %160, %161 : vector<8x128xf32>
    %163 = vector.extract_strided_slice %144 {offsets = [0, 256], sizes = [8, 128], strides = [1, 1]} : vector<8x384xf32> to vector<8x128xf32>
    %164 = vector.extract_strided_slice %146 {offsets = [0, 256], sizes = [8, 128], strides = [1, 1]} : vector<8x384xf32> to vector<8x128xf32>
    %165 = arith.addf %164, %15 : vector<8x128xf32>
    %166 = arith.mulf %154, %165 : vector<8x128xf32>
    %167 = arith.addf %163, %166 : vector<8x128xf32>
    %168 = math.tanh %167 : vector<8x128xf32>
    %169 = arith.subf %140, %168 : vector<8x128xf32>
    %170 = arith.mulf %162, %169 : vector<8x128xf32>
    %171 = arith.addf %168, %170 : vector<8x128xf32>
    %c5_i32 = arith.constant 5 : i32
    %c8_i32_40 = arith.constant 8 : i32
    %172 = arith.muli %c5_i32, %c8_i32_40 : i32
    %173 = tpu.assume_multiple %172, 8 : i32
    %174 = arith.index_cast %173 : i32 to index
    %c0_41 = arith.constant 0 : index
    %175 = vector.load %arg10[%174, %c0_41] : memref<64x384xf32, #tpu.memory_space<vmem>>, vector<8x384xf32>
    %176 = arith.truncf %171 : vector<8x128xf32> to vector<8x128xbf16>
    %cst_42 = arith.constant dense<0.000000e+00> : vector<8x384xf32>
    %177 = tpu.matmul %176, %12, %cst_42 {dimension_numbers = #tpu.dot_dimension_numbers<[1], [0], [0], [1], [0, 0, 1, 1], [], []>} : vector<8x128xbf16>, vector<128x384xbf16>, vector<8x384xf32> -> vector<8x384xf32>
    %178 = vector.extract_strided_slice %175 {offsets = [0, 0], sizes = [8, 128], strides = [1, 1]} : vector<8x384xf32> to vector<8x128xf32>
    %179 = vector.extract_strided_slice %177 {offsets = [0, 0], sizes = [8, 128], strides = [1, 1]} : vector<8x384xf32> to vector<8x128xf32>
    %180 = arith.addf %178, %179 : vector<8x128xf32>
    %181 = arith.negf %180 : vector<8x128xf32>
    %182 = math.exp %181 : vector<8x128xf32>
    %cst_43 = arith.constant 1.000000e+00 : f32
    %183 = vector.broadcast %cst_43 : f32 to vector<8x128xf32>
    %184 = arith.addf %183, %182 : vector<8x128xf32>
    %185 = arith.divf %183, %184 : vector<8x128xf32>
    %186 = vector.extract_strided_slice %175 {offsets = [0, 128], sizes = [8, 128], strides = [1, 1]} : vector<8x384xf32> to vector<8x128xf32>
    %187 = vector.extract_strided_slice %177 {offsets = [0, 128], sizes = [8, 128], strides = [1, 1]} : vector<8x384xf32> to vector<8x128xf32>
    %188 = arith.addf %186, %187 : vector<8x128xf32>
    %189 = arith.negf %188 : vector<8x128xf32>
    %190 = math.exp %189 : vector<8x128xf32>
    %cst_44 = arith.constant 1.000000e+00 : f32
    %191 = vector.broadcast %cst_44 : f32 to vector<8x128xf32>
    %192 = arith.addf %191, %190 : vector<8x128xf32>
    %193 = arith.divf %191, %192 : vector<8x128xf32>
    %194 = vector.extract_strided_slice %175 {offsets = [0, 256], sizes = [8, 128], strides = [1, 1]} : vector<8x384xf32> to vector<8x128xf32>
    %195 = vector.extract_strided_slice %177 {offsets = [0, 256], sizes = [8, 128], strides = [1, 1]} : vector<8x384xf32> to vector<8x128xf32>
    %196 = arith.addf %195, %15 : vector<8x128xf32>
    %197 = arith.mulf %185, %196 : vector<8x128xf32>
    %198 = arith.addf %194, %197 : vector<8x128xf32>
    %199 = math.tanh %198 : vector<8x128xf32>
    %200 = arith.subf %171, %199 : vector<8x128xf32>
    %201 = arith.mulf %193, %200 : vector<8x128xf32>
    %202 = arith.addf %199, %201 : vector<8x128xf32>
    %c6_i32 = arith.constant 6 : i32
    %c8_i32_45 = arith.constant 8 : i32
    %203 = arith.muli %c6_i32, %c8_i32_45 : i32
    %204 = tpu.assume_multiple %203, 8 : i32
    %205 = arith.index_cast %204 : i32 to index
    %c0_46 = arith.constant 0 : index
    %206 = vector.load %arg10[%205, %c0_46] : memref<64x384xf32, #tpu.memory_space<vmem>>, vector<8x384xf32>
    %207 = arith.truncf %202 : vector<8x128xf32> to vector<8x128xbf16>
    %cst_47 = arith.constant dense<0.000000e+00> : vector<8x384xf32>
    %208 = tpu.matmul %207, %12, %cst_47 {dimension_numbers = #tpu.dot_dimension_numbers<[1], [0], [0], [1], [0, 0, 1, 1], [], []>} : vector<8x128xbf16>, vector<128x384xbf16>, vector<8x384xf32> -> vector<8x384xf32>
    %209 = vector.extract_strided_slice %206 {offsets = [0, 0], sizes = [8, 128], strides = [1, 1]} : vector<8x384xf32> to vector<8x128xf32>
    %210 = vector.extract_strided_slice %208 {offsets = [0, 0], sizes = [8, 128], strides = [1, 1]} : vector<8x384xf32> to vector<8x128xf32>
    %211 = arith.addf %209, %210 : vector<8x128xf32>
    %212 = arith.negf %211 : vector<8x128xf32>
    %213 = math.exp %212 : vector<8x128xf32>
    %cst_48 = arith.constant 1.000000e+00 : f32
    %214 = vector.broadcast %cst_48 : f32 to vector<8x128xf32>
    %215 = arith.addf %214, %213 : vector<8x128xf32>
    %216 = arith.divf %214, %215 : vector<8x128xf32>
    %217 = vector.extract_strided_slice %206 {offsets = [0, 128], sizes = [8, 128], strides = [1, 1]} : vector<8x384xf32> to vector<8x128xf32>
    %218 = vector.extract_strided_slice %208 {offsets = [0, 128], sizes = [8, 128], strides = [1, 1]} : vector<8x384xf32> to vector<8x128xf32>
    %219 = arith.addf %217, %218 : vector<8x128xf32>
    %220 = arith.negf %219 : vector<8x128xf32>
    %221 = math.exp %220 : vector<8x128xf32>
    %cst_49 = arith.constant 1.000000e+00 : f32
    %222 = vector.broadcast %cst_49 : f32 to vector<8x128xf32>
    %223 = arith.addf %222, %221 : vector<8x128xf32>
    %224 = arith.divf %222, %223 : vector<8x128xf32>
    %225 = vector.extract_strided_slice %206 {offsets = [0, 256], sizes = [8, 128], strides = [1, 1]} : vector<8x384xf32> to vector<8x128xf32>
    %226 = vector.extract_strided_slice %208 {offsets = [0, 256], sizes = [8, 128], strides = [1, 1]} : vector<8x384xf32> to vector<8x128xf32>
    %227 = arith.addf %226, %15 : vector<8x128xf32>
    %228 = arith.mulf %216, %227 : vector<8x128xf32>
    %229 = arith.addf %225, %228 : vector<8x128xf32>
    %230 = math.tanh %229 : vector<8x128xf32>
    %231 = arith.subf %202, %230 : vector<8x128xf32>
    %232 = arith.mulf %224, %231 : vector<8x128xf32>
    %233 = arith.addf %230, %232 : vector<8x128xf32>
    %c7_i32 = arith.constant 7 : i32
    %c8_i32_50 = arith.constant 8 : i32
    %234 = arith.muli %c7_i32, %c8_i32_50 : i32
    %235 = tpu.assume_multiple %234, 8 : i32
    %236 = arith.index_cast %235 : i32 to index
    %c0_51 = arith.constant 0 : index
    %237 = vector.load %arg10[%236, %c0_51] : memref<64x384xf32, #tpu.memory_space<vmem>>, vector<8x384xf32>
    %238 = arith.truncf %233 : vector<8x128xf32> to vector<8x128xbf16>
    %cst_52 = arith.constant dense<0.000000e+00> : vector<8x384xf32>
    %239 = tpu.matmul %238, %12, %cst_52 {dimension_numbers = #tpu.dot_dimension_numbers<[1], [0], [0], [1], [0, 0, 1, 1], [], []>} : vector<8x128xbf16>, vector<128x384xbf16>, vector<8x384xf32> -> vector<8x384xf32>
    %240 = vector.extract_strided_slice %237 {offsets = [0, 0], sizes = [8, 128], strides = [1, 1]} : vector<8x384xf32> to vector<8x128xf32>
    %241 = vector.extract_strided_slice %239 {offsets = [0, 0], sizes = [8, 128], strides = [1, 1]} : vector<8x384xf32> to vector<8x128xf32>
    %242 = arith.addf %240, %241 : vector<8x128xf32>
    %243 = arith.negf %242 : vector<8x128xf32>
    %244 = math.exp %243 : vector<8x128xf32>
    %cst_53 = arith.constant 1.000000e+00 : f32
    %245 = vector.broadcast %cst_53 : f32 to vector<8x128xf32>
    %246 = arith.addf %245, %244 : vector<8x128xf32>
    %247 = arith.divf %245, %246 : vector<8x128xf32>
    %248 = vector.extract_strided_slice %237 {offsets = [0, 128], sizes = [8, 128], strides = [1, 1]} : vector<8x384xf32> to vector<8x128xf32>
    %249 = vector.extract_strided_slice %239 {offsets = [0, 128], sizes = [8, 128], strides = [1, 1]} : vector<8x384xf32> to vector<8x128xf32>
    %250 = arith.addf %248, %249 : vector<8x128xf32>
    %251 = arith.negf %250 : vector<8x128xf32>
    %252 = math.exp %251 : vector<8x128xf32>
    %cst_54 = arith.constant 1.000000e+00 : f32
    %253 = vector.broadcast %cst_54 : f32 to vector<8x128xf32>
    %254 = arith.addf %253, %252 : vector<8x128xf32>
    %255 = arith.divf %253, %254 : vector<8x128xf32>
    %256 = vector.extract_strided_slice %237 {offsets = [0, 256], sizes = [8, 128], strides = [1, 1]} : vector<8x384xf32> to vector<8x128xf32>
    %257 = vector.extract_strided_slice %239 {offsets = [0, 256], sizes = [8, 128], strides = [1, 1]} : vector<8x384xf32> to vector<8x128xf32>
    %258 = arith.addf %257, %15 : vector<8x128xf32>
    %259 = arith.mulf %247, %258 : vector<8x128xf32>
    %260 = arith.addf %256, %259 : vector<8x128xf32>
    %261 = math.tanh %260 : vector<8x128xf32>
    %262 = arith.subf %233, %261 : vector<8x128xf32>
    %263 = arith.mulf %255, %262 : vector<8x128xf32>
    %264 = arith.addf %261, %263 : vector<8x128xf32>
    %c8_i32_55 = arith.constant 8 : i32
    %c0_56 = arith.constant 0 : index
    %c0_57 = arith.constant 0 : index
    %265 = vector.load %arg11[%c0_56, %c0_57] : memref<8x128xf32, #tpu.memory_space<vmem>>, vector<8x128xf32>
    tpu.vector_store %arg11[%c0_56, %c0_57], %264 {strides = array<i32>} : memref<8x128xf32, #tpu.memory_space<vmem>>, vector<8x128xf32>,
    %c0_i32_58 = arith.constant 0 : i32
    %266 = arith.cmpi eq, %arg1, %c0_i32_58 : i32
    %267 = arith.extui %266 : i1 to i32
    %c0_i32_59 = arith.constant 0 : i32
    %268 = arith.cmpi ne, %267, %c0_i32_59 : i32
    scf.if %268 {
      %269 = arith.truncf %264 : vector<8x128xf32> to vector<8x128xbf16>
      %c0_60 = arith.constant 0 : index
      %c0_61 = arith.constant 0 : index
      %270 = vector.load %arg7[%c0_60, %c0_61] : memref<128x128xbf16, #tpu.memory_space<vmem>>, vector<128x128xbf16>
      %cst_62 = arith.constant dense<0.000000e+00> : vector<8x128xf32>
      %271 = tpu.matmul %269, %270, %cst_62 {dimension_numbers = #tpu.dot_dimension_numbers<[1], [0], [0], [1], [0, 0, 1, 1], [], []>} : vector<8x128xbf16>, vector<128x128xbf16>, vector<8x128xf32> -> vector<8x128xf32>
      %c0_63 = arith.constant 0 : index
      %c0_64 = arith.constant 0 : index
      %272 = vector.load %arg8[%c0_63, %c0_64] : memref<1x128xf32, #tpu.memory_space<vmem>>, vector<1x128xf32>
      %273 = vector.broadcast %272 : vector<1x128xf32> to vector<8x128xf32>
      %274 = arith.addf %271, %273 : vector<8x128xf32>
      %c0_65 = arith.constant 0 : index
      %c0_66 = arith.constant 0 : index
      %275 = vector.load %arg9[%c0_65, %c0_66] : memref<8x128xf32, #tpu.memory_space<vmem>>, vector<8x128xf32>
      tpu.vector_store %arg9[%c0_65, %c0_66], %274 {strides = array<i32>} : memref<8x128xf32, #tpu.memory_space<vmem>>, vector<8x128xf32>,
    } else {
    }
    return
  }
  func.func @transform_0(%arg0: i32, %arg1: i32) -> (i32, i32, i32) {
    %c0_i32 = arith.constant 0 : i32
    %c0_i32_0 = arith.constant 0 : i32
    return %arg1, %arg0, %c0_i32 : i32, i32, i32
  }
  func.func @transform_1(%arg0: i32, %arg1: i32) -> (i32, i32) {
    %c0_i32 = arith.constant 0 : i32
    %c0_i32_0 = arith.constant 0 : i32
    %c0_i32_1 = arith.constant 0 : i32
    return %c0_i32, %c0_i32_0 : i32, i32
  }
  func.func @transform_2(%arg0: i32, %arg1: i32) -> (i32, i32) {
    %c0_i32 = arith.constant 0 : i32
    %c0_i32_0 = arith.constant 0 : i32
    %c0_i32_1 = arith.constant 0 : i32
    return %c0_i32, %c0_i32_0 : i32, i32
  }
  func.func @transform_3(%arg0: i32, %arg1: i32) -> (i32, i32) {
    %c0_i32 = arith.constant 0 : i32
    %c0_i32_0 = arith.constant 0 : i32
    %c0_i32_1 = arith.constant 0 : i32
    return %c0_i32, %c0_i32_0 : i32, i32
  }
  func.func @transform_4(%arg0: i32, %arg1: i32) -> (i32, i32) {
    %c0_i32 = arith.constant 0 : i32
    %c0_i32_0 = arith.constant 0 : i32
    %c0_i32_1 = arith.constant 0 : i32
    return %c0_i32, %c0_i32_0 : i32, i32
  }
  func.func @transform_5(%arg0: i32, %arg1: i32) -> (i32, i32) {
    %c0_i32 = arith.constant 0 : i32
    %c0_i32_0 = arith.constant 0 : i32
    %c0_i32_1 = arith.constant 0 : i32
    return %c0_i32, %c0_i32_0 : i32, i32
  }
  func.func @transform_6(%arg0: i32, %arg1: i32) -> (i32, i32) {
    %c0_i32 = arith.constant 0 : i32
    %c0_i32_0 = arith.constant 0 : i32
    %c0_i32_1 = arith.constant 0 : i32
    return %c0_i32, %c0_i32_0 : i32, i32
  }
  func.func @transform_7(%arg0: i32, %arg1: i32) -> (i32, i32) {
    %c0_i32 = arith.constant 0 : i32
    %c0_i32_0 = arith.constant 0 : i32
    return %arg0, %c0_i32 : i32, i32
  }
}

module attributes {stable_mosaic.version = 11 : i64} {
  func.func @_gru_fused_kernel(%arg0: i32, %arg1: i32, %arg2: memref<8x8x4xf32, #tpu.memory_space<vmem>>, %arg3: memref<4x384xbf16, #tpu.memory_space<vmem>>, %arg4: memref<1x384xf32, #tpu.memory_space<vmem>>, %arg5: memref<128x384xbf16, #tpu.memory_space<vmem>>, %arg6: memref<1x128xf32, #tpu.memory_space<vmem>>, %arg7: memref<128x128xbf16, #tpu.memory_space<vmem>>, %arg8: memref<1x128xf32, #tpu.memory_space<vmem>>, %arg9: memref<8x128xf32, #tpu.memory_space<vmem>>, %arg10: memref<64x384xf32, #tpu.memory_space<vmem>>, %arg11: memref<8x128xf32, #tpu.memory_space<vmem>>) attributes {dimension_semantics = [#tpu.dimension_semantics<parallel>, #tpu.dimension_semantics<arbitrary>], iteration_bounds = array<i64: 1, 1>, scalar_prefetch = 0 : i64, scratch_operands = 2 : i64, tpu.core_type = #tpu.core_type<tc>, window_params = [{transform_indices = @transform_0, window_bounds = array<i64: 8, 8, 4>}, {pipeline_mode = #tpu.pipeline_mode<synchronous>, transform_indices = @transform_1, window_bounds = array<i64: 4, 384>}, {pipeline_mode = #tpu.pipeline_mode<synchronous>, transform_indices = @transform_2, window_bounds = array<i64: 1, 384>}, {pipeline_mode = #tpu.pipeline_mode<synchronous>, transform_indices = @transform_3, window_bounds = array<i64: 128, 384>}, {pipeline_mode = #tpu.pipeline_mode<synchronous>, transform_indices = @transform_4, window_bounds = array<i64: 1, 128>}, {pipeline_mode = #tpu.pipeline_mode<synchronous>, transform_indices = @transform_5, window_bounds = array<i64: 128, 128>}, {pipeline_mode = #tpu.pipeline_mode<synchronous>, transform_indices = @transform_6, window_bounds = array<i64: 1, 128>}, {transform_indices = @transform_7, window_bounds = array<i64: 8, 128>}]} {
    %c0_i32 = arith.constant 0 : i32
    %0 = arith.cmpi eq, %arg1, %c0_i32 : i32
    %1 = arith.extui %0 : i1 to i32
    %c0_i32_0 = arith.constant 0 : i32
    %2 = arith.cmpi ne, %1, %c0_i32_0 : i32
    scf.if %2 {
      %cst_60 = arith.constant 0.000000e+00 : f32
      %269 = vector.broadcast %cst_60 : f32 to vector<8x128xf32>
      %c0_61 = arith.constant 0 : index
      %c0_62 = arith.constant 0 : index
      %270 = vector.load %arg11[%c0_61, %c0_62] : memref<8x128xf32, #tpu.memory_space<vmem>>, vector<8x128xf32>
      tpu.vector_store %arg11[%c0_61, %c0_62], %269 {strides = array<i32>} : memref<8x128xf32, #tpu.memory_space<vmem>>, vector<8x128xf32>,
    } else {
    }
    %c0 = arith.constant 0 : index
    %c0_1 = arith.constant 0 : index
    %c0_2 = arith.constant 0 : index
    %3 = vector.load %arg2[%c0, %c0_1, %c0_2] : memref<8x8x4xf32, #tpu.memory_space<vmem>>, vector<8x8x4xf32>
    %4 = vector.shape_cast %3 : vector<8x8x4xf32> to vector<64x4xf32>
    %5 = arith.truncf %4 : vector<64x4xf32> to vector<64x4xbf16>
    %c0_3 = arith.constant 0 : index
    %c0_4 = arith.constant 0 : index
    %6 = vector.load %arg3[%c0_3, %c0_4] : memref<4x384xbf16, #tpu.memory_space<vmem>>, vector<4x384xbf16>
    %cst = arith.constant dense<0.000000e+00> : vector<64x384xf32>
    %7 = tpu.matmul %5, %6, %cst {dimension_numbers = #tpu.dot_dimension_numbers<[1], [0], [0], [1], [0, 0, 1, 1], [], []>} : vector<64x4xbf16>, vector<4x384xbf16>, vector<64x384xf32> -> vector<64x384xf32>
    %c0_5 = arith.constant 0 : index
    %c0_6 = arith.constant 0 : index
    %8 = vector.load %arg4[%c0_5, %c0_6] : memref<1x384xf32, #tpu.memory_space<vmem>>, vector<1x384xf32>
    %9 = vector.broadcast %8 : vector<1x384xf32> to vector<64x384xf32>
    %10 = arith.addf %7, %9 : vector<64x384xf32>
    %c0_7 = arith.constant 0 : index
    %c0_8 = arith.constant 0 : index
    %11 = vector.load %arg10[%c0_7, %c0_8] : memref<64x384xf32, #tpu.memory_space<vmem>>, vector<64x384xf32>
    tpu.vector_store %arg10[%c0_7, %c0_8], %10 {strides = array<i32>} : memref<64x384xf32, #tpu.memory_space<vmem>>, vector<64x384xf32>,
    %c0_9 = arith.constant 0 : index
    %c0_10 = arith.constant 0 : index
    %12 = vector.load %arg5[%c0_9, %c0_10] : memref<128x384xbf16, #tpu.memory_space<vmem>>, vector<128x384xbf16>
    %c0_11 = arith.constant 0 : index
    %c0_12 = arith.constant 0 : index
    %13 = vector.load %arg6[%c0_11, %c0_12] : memref<1x128xf32, #tpu.memory_space<vmem>>, vector<1x128xf32>
    %14 = vector.shape_cast %13 : vector<1x128xf32> to vector<1x128xf32>
    %15 = vector.broadcast %14 : vector<1x128xf32> to vector<8x128xf32>
    %c0_13 = arith.constant 0 : index
    %c0_14 = arith.constant 0 : index
    %16 = vector.load %arg11[%c0_13, %c0_14] : memref<8x128xf32, #tpu.memory_space<vmem>>, vector<8x128xf32>
    %c0_i32_15 = arith.constant 0 : i32
    %c8_i32 = arith.constant 8 : i32
    %17 = arith.muli %c0_i32_15, %c8_i32 : i32
    %18 = tpu.assume_multiple %17, 8 : i32
    %19 = arith.index_cast %18 : i32 to index
    %c0_16 = arith.constant 0 : index
    %20 = vector.load %arg10[%19, %c0_16] : memref<64x384xf32, #tpu.memory_space<vmem>>, vector<8x384xf32>
    %21 = arith.truncf %16 : vector<8x128xf32> to vector<8x128xbf16>
    %cst_17 = arith.constant dense<0.000000e+00> : vector<8x384xf32>
    %22 = tpu.matmul %21, %12, %cst_17 {dimension_numbers = #tpu.dot_dimension_numbers<[1], [0], [0], [1], [0, 0, 1, 1], [], []>} : vector<8x128xbf16>, vector<128x384xbf16>, vector<8x384xf32> -> vector<8x384xf32>
    %23 = vector.extract_strided_slice %20 {offsets = [0, 0], sizes = [8, 128], strides = [1, 1]} : vector<8x384xf32> to vector<8x128xf32>
    %24 = vector.extract_strided_slice %22 {offsets = [0, 0], sizes = [8, 128], strides = [1, 1]} : vector<8x384xf32> to vector<8x128xf32>
    %25 = arith.addf %23, %24 : vector<8x128xf32>
    %26 = arith.negf %25 : vector<8x128xf32>
    %27 = math.exp %26 : vector<8x128xf32>
    %cst_18 = arith.constant 1.000000e+00 : f32
    %28 = vector.broadcast %cst_18 : f32 to vector<8x128xf32>
    %29 = arith.addf %28, %27 : vector<8x128xf32>
    %30 = arith.divf %28, %29 : vector<8x128xf32>
    %31 = vector.extract_strided_slice %20 {offsets = [0, 128], sizes = [8, 128], strides = [1, 1]} : vector<8x384xf32> to vector<8x128xf32>
    %32 = vector.extract_strided_slice %22 {offsets = [0, 128], sizes = [8, 128], strides = [1, 1]} : vector<8x384xf32> to vector<8x128xf32>
    %33 = arith.addf %31, %32 : vector<8x128xf32>
    %34 = arith.negf %33 : vector<8x128xf32>
    %35 = math.exp %34 : vector<8x128xf32>
    %cst_19 = arith.constant 1.000000e+00 : f32
    %36 = vector.broadcast %cst_19 : f32 to vector<8x128xf32>
    %37 = arith.addf %36, %35 : vector<8x128xf32>
    %38 = arith.divf %36, %37 : vector<8x128xf32>
    %39 = vector.extract_strided_slice %20 {offsets = [0, 256], sizes = [8, 128], strides = [1, 1]} : vector<8x384xf32> to vector<8x128xf32>
    %40 = vector.extract_strided_slice %22 {offsets = [0, 256], sizes = [8, 128], strides = [1, 1]} : vector<8x384xf32> to vector<8x128xf32>
    %41 = arith.addf %40, %15 : vector<8x128xf32>
    %42 = arith.mulf %30, %41 : vector<8x128xf32>
    %43 = arith.addf %39, %42 : vector<8x128xf32>
    %44 = math.tanh %43 : vector<8x128xf32>
    %45 = arith.subf %16, %44 : vector<8x128xf32>
    %46 = arith.mulf %38, %45 : vector<8x128xf32>
    %47 = arith.addf %44, %46 : vector<8x128xf32>
    %c1_i32 = arith.constant 1 : i32
    %c8_i32_20 = arith.constant 8 : i32
    %48 = arith.muli %c1_i32, %c8_i32_20 : i32
    %49 = tpu.assume_multiple %48, 8 : i32
    %50 = arith.index_cast %49 : i32 to index
    %c0_21 = arith.constant 0 : index
    %51 = vector.load %arg10[%50, %c0_21] : memref<64x384xf32, #tpu.memory_space<vmem>>, vector<8x384xf32>
    %52 = arith.truncf %47 : vector<8x128xf32> to vector<8x128xbf16>
    %cst_22 = arith.constant dense<0.000000e+00> : vector<8x384xf32>
    %53 = tpu.matmul %52, %12, %cst_22 {dimension_numbers = #tpu.dot_dimension_numbers<[1], [0], [0], [1], [0, 0, 1, 1], [], []>} : vector<8x128xbf16>, vector<128x384xbf16>, vector<8x384xf32> -> vector<8x384xf32>
    %54 = vector.extract_strided_slice %51 {offsets = [0, 0], sizes = [8, 128], strides = [1, 1]} : vector<8x384xf32> to vector<8x128xf32>
    %55 = vector.extract_strided_slice %53 {offsets = [0, 0], sizes = [8, 128], strides = [1, 1]} : vector<8x384xf32> to vector<8x128xf32>
    %56 = arith.addf %54, %55 : vector<8x128xf32>
    %57 = arith.negf %56 : vector<8x128xf32>
    %58 = math.exp %57 : vector<8x128xf32>
    %cst_23 = arith.constant 1.000000e+00 : f32
    %59 = vector.broadcast %cst_23 : f32 to vector<8x128xf32>
    %60 = arith.addf %59, %58 : vector<8x128xf32>
    %61 = arith.divf %59, %60 : vector<8x128xf32>
    %62 = vector.extract_strided_slice %51 {offsets = [0, 128], sizes = [8, 128], strides = [1, 1]} : vector<8x384xf32> to vector<8x128xf32>
    %63 = vector.extract_strided_slice %53 {offsets = [0, 128], sizes = [8, 128], strides = [1, 1]} : vector<8x384xf32> to vector<8x128xf32>
    %64 = arith.addf %62, %63 : vector<8x128xf32>
    %65 = arith.negf %64 : vector<8x128xf32>
    %66 = math.exp %65 : vector<8x128xf32>
    %cst_24 = arith.constant 1.000000e+00 : f32
    %67 = vector.broadcast %cst_24 : f32 to vector<8x128xf32>
    %68 = arith.addf %67, %66 : vector<8x128xf32>
    %69 = arith.divf %67, %68 : vector<8x128xf32>
    %70 = vector.extract_strided_slice %51 {offsets = [0, 256], sizes = [8, 128], strides = [1, 1]} : vector<8x384xf32> to vector<8x128xf32>
    %71 = vector.extract_strided_slice %53 {offsets = [0, 256], sizes = [8, 128], strides = [1, 1]} : vector<8x384xf32> to vector<8x128xf32>
    %72 = arith.addf %71, %15 : vector<8x128xf32>
    %73 = arith.mulf %61, %72 : vector<8x128xf32>
    %74 = arith.addf %70, %73 : vector<8x128xf32>
    %75 = math.tanh %74 : vector<8x128xf32>
    %76 = arith.subf %47, %75 : vector<8x128xf32>
    %77 = arith.mulf %69, %76 : vector<8x128xf32>
    %78 = arith.addf %75, %77 : vector<8x128xf32>
    %c2_i32 = arith.constant 2 : i32
    %c8_i32_25 = arith.constant 8 : i32
    %79 = arith.muli %c2_i32, %c8_i32_25 : i32
    %80 = tpu.assume_multiple %79, 8 : i32
    %81 = arith.index_cast %80 : i32 to index
    %c0_26 = arith.constant 0 : index
    %82 = vector.load %arg10[%81, %c0_26] : memref<64x384xf32, #tpu.memory_space<vmem>>, vector<8x384xf32>
    %83 = arith.truncf %78 : vector<8x128xf32> to vector<8x128xbf16>
    %cst_27 = arith.constant dense<0.000000e+00> : vector<8x384xf32>
    %84 = tpu.matmul %83, %12, %cst_27 {dimension_numbers = #tpu.dot_dimension_numbers<[1], [0], [0], [1], [0, 0, 1, 1], [], []>} : vector<8x128xbf16>, vector<128x384xbf16>, vector<8x384xf32> -> vector<8x384xf32>
    %85 = vector.extract_strided_slice %82 {offsets = [0, 0], sizes = [8, 128], strides = [1, 1]} : vector<8x384xf32> to vector<8x128xf32>
    %86 = vector.extract_strided_slice %84 {offsets = [0, 0], sizes = [8, 128], strides = [1, 1]} : vector<8x384xf32> to vector<8x128xf32>
    %87 = arith.addf %85, %86 : vector<8x128xf32>
    %88 = arith.negf %87 : vector<8x128xf32>
    %89 = math.exp %88 : vector<8x128xf32>
    %cst_28 = arith.constant 1.000000e+00 : f32
    %90 = vector.broadcast %cst_28 : f32 to vector<8x128xf32>
    %91 = arith.addf %90, %89 : vector<8x128xf32>
    %92 = arith.divf %90, %91 : vector<8x128xf32>
    %93 = vector.extract_strided_slice %82 {offsets = [0, 128], sizes = [8, 128], strides = [1, 1]} : vector<8x384xf32> to vector<8x128xf32>
    %94 = vector.extract_strided_slice %84 {offsets = [0, 128], sizes = [8, 128], strides = [1, 1]} : vector<8x384xf32> to vector<8x128xf32>
    %95 = arith.addf %93, %94 : vector<8x128xf32>
    %96 = arith.negf %95 : vector<8x128xf32>
    %97 = math.exp %96 : vector<8x128xf32>
    %cst_29 = arith.constant 1.000000e+00 : f32
    %98 = vector.broadcast %cst_29 : f32 to vector<8x128xf32>
    %99 = arith.addf %98, %97 : vector<8x128xf32>
    %100 = arith.divf %98, %99 : vector<8x128xf32>
    %101 = vector.extract_strided_slice %82 {offsets = [0, 256], sizes = [8, 128], strides = [1, 1]} : vector<8x384xf32> to vector<8x128xf32>
    %102 = vector.extract_strided_slice %84 {offsets = [0, 256], sizes = [8, 128], strides = [1, 1]} : vector<8x384xf32> to vector<8x128xf32>
    %103 = arith.addf %102, %15 : vector<8x128xf32>
    %104 = arith.mulf %92, %103 : vector<8x128xf32>
    %105 = arith.addf %101, %104 : vector<8x128xf32>
    %106 = math.tanh %105 : vector<8x128xf32>
    %107 = arith.subf %78, %106 : vector<8x128xf32>
    %108 = arith.mulf %100, %107 : vector<8x128xf32>
    %109 = arith.addf %106, %108 : vector<8x128xf32>
    %c3_i32 = arith.constant 3 : i32
    %c8_i32_30 = arith.constant 8 : i32
    %110 = arith.muli %c3_i32, %c8_i32_30 : i32
    %111 = tpu.assume_multiple %110, 8 : i32
    %112 = arith.index_cast %111 : i32 to index
    %c0_31 = arith.constant 0 : index
    %113 = vector.load %arg10[%112, %c0_31] : memref<64x384xf32, #tpu.memory_space<vmem>>, vector<8x384xf32>
    %114 = arith.truncf %109 : vector<8x128xf32> to vector<8x128xbf16>
    %cst_32 = arith.constant dense<0.000000e+00> : vector<8x384xf32>
    %115 = tpu.matmul %114, %12, %cst_32 {dimension_numbers = #tpu.dot_dimension_numbers<[1], [0], [0], [1], [0, 0, 1, 1], [], []>} : vector<8x128xbf16>, vector<128x384xbf16>, vector<8x384xf32> -> vector<8x384xf32>
    %116 = vector.extract_strided_slice %113 {offsets = [0, 0], sizes = [8, 128], strides = [1, 1]} : vector<8x384xf32> to vector<8x128xf32>
    %117 = vector.extract_strided_slice %115 {offsets = [0, 0], sizes = [8, 128], strides = [1, 1]} : vector<8x384xf32> to vector<8x128xf32>
    %118 = arith.addf %116, %117 : vector<8x128xf32>
    %119 = arith.negf %118 : vector<8x128xf32>
    %120 = math.exp %119 : vector<8x128xf32>
    %cst_33 = arith.constant 1.000000e+00 : f32
    %121 = vector.broadcast %cst_33 : f32 to vector<8x128xf32>
    %122 = arith.addf %121, %120 : vector<8x128xf32>
    %123 = arith.divf %121, %122 : vector<8x128xf32>
    %124 = vector.extract_strided_slice %113 {offsets = [0, 128], sizes = [8, 128], strides = [1, 1]} : vector<8x384xf32> to vector<8x128xf32>
    %125 = vector.extract_strided_slice %115 {offsets = [0, 128], sizes = [8, 128], strides = [1, 1]} : vector<8x384xf32> to vector<8x128xf32>
    %126 = arith.addf %124, %125 : vector<8x128xf32>
    %127 = arith.negf %126 : vector<8x128xf32>
    %128 = math.exp %127 : vector<8x128xf32>
    %cst_34 = arith.constant 1.000000e+00 : f32
    %129 = vector.broadcast %cst_34 : f32 to vector<8x128xf32>
    %130 = arith.addf %129, %128 : vector<8x128xf32>
    %131 = arith.divf %129, %130 : vector<8x128xf32>
    %132 = vector.extract_strided_slice %113 {offsets = [0, 256], sizes = [8, 128], strides = [1, 1]} : vector<8x384xf32> to vector<8x128xf32>
    %133 = vector.extract_strided_slice %115 {offsets = [0, 256], sizes = [8, 128], strides = [1, 1]} : vector<8x384xf32> to vector<8x128xf32>
    %134 = arith.addf %133, %15 : vector<8x128xf32>
    %135 = arith.mulf %123, %134 : vector<8x128xf32>
    %136 = arith.addf %132, %135 : vector<8x128xf32>
    %137 = math.tanh %136 : vector<8x128xf32>
    %138 = arith.subf %109, %137 : vector<8x128xf32>
    %139 = arith.mulf %131, %138 : vector<8x128xf32>
    %140 = arith.addf %137, %139 : vector<8x128xf32>
    %c4_i32 = arith.constant 4 : i32
    %c8_i32_35 = arith.constant 8 : i32
    %141 = arith.muli %c4_i32, %c8_i32_35 : i32
    %142 = tpu.assume_multiple %141, 8 : i32
    %143 = arith.index_cast %142 : i32 to index
    %c0_36 = arith.constant 0 : index
    %144 = vector.load %arg10[%143, %c0_36] : memref<64x384xf32, #tpu.memory_space<vmem>>, vector<8x384xf32>
    %145 = arith.truncf %140 : vector<8x128xf32> to vector<8x128xbf16>
    %cst_37 = arith.constant dense<0.000000e+00> : vector<8x384xf32>
    %146 = tpu.matmul %145, %12, %cst_37 {dimension_numbers = #tpu.dot_dimension_numbers<[1], [0], [0], [1], [0, 0, 1, 1], [], []>} : vector<8x128xbf16>, vector<128x384xbf16>, vector<8x384xf32> -> vector<8x384xf32>
    %147 = vector.extract_strided_slice %144 {offsets = [0, 0], sizes = [8, 128], strides = [1, 1]} : vector<8x384xf32> to vector<8x128xf32>
    %148 = vector.extract_strided_slice %146 {offsets = [0, 0], sizes = [8, 128], strides = [1, 1]} : vector<8x384xf32> to vector<8x128xf32>
    %149 = arith.addf %147, %148 : vector<8x128xf32>
    %150 = arith.negf %149 : vector<8x128xf32>
    %151 = math.exp %150 : vector<8x128xf32>
    %cst_38 = arith.constant 1.000000e+00 : f32
    %152 = vector.broadcast %cst_38 : f32 to vector<8x128xf32>
    %153 = arith.addf %152, %151 : vector<8x128xf32>
    %154 = arith.divf %152, %153 : vector<8x128xf32>
    %155 = vector.extract_strided_slice %144 {offsets = [0, 128], sizes = [8, 128], strides = [1, 1]} : vector<8x384xf32> to vector<8x128xf32>
    %156 = vector.extract_strided_slice %146 {offsets = [0, 128], sizes = [8, 128], strides = [1, 1]} : vector<8x384xf32> to vector<8x128xf32>
    %157 = arith.addf %155, %156 : vector<8x128xf32>
    %158 = arith.negf %157 : vector<8x128xf32>
    %159 = math.exp %158 : vector<8x128xf32>
    %cst_39 = arith.constant 1.000000e+00 : f32
    %160 = vector.broadcast %cst_39 : f32 to vector<8x128xf32>
    %161 = arith.addf %160, %159 : vector<8x128xf32>
    %162 = arith.divf %160, %161 : vector<8x128xf32>
    %163 = vector.extract_strided_slice %144 {offsets = [0, 256], sizes = [8, 128], strides = [1, 1]} : vector<8x384xf32> to vector<8x128xf32>
    %164 = vector.extract_strided_slice %146 {offsets = [0, 256], sizes = [8, 128], strides = [1, 1]} : vector<8x384xf32> to vector<8x128xf32>
    %165 = arith.addf %164, %15 : vector<8x128xf32>
    %166 = arith.mulf %154, %165 : vector<8x128xf32>
    %167 = arith.addf %163, %166 : vector<8x128xf32>
    %168 = math.tanh %167 : vector<8x128xf32>
    %169 = arith.subf %140, %168 : vector<8x128xf32>
    %170 = arith.mulf %162, %169 : vector<8x128xf32>
    %171 = arith.addf %168, %170 : vector<8x128xf32>
    %c5_i32 = arith.constant 5 : i32
    %c8_i32_40 = arith.constant 8 : i32
    %172 = arith.muli %c5_i32, %c8_i32_40 : i32
    %173 = tpu.assume_multiple %172, 8 : i32
    %174 = arith.index_cast %173 : i32 to index
    %c0_41 = arith.constant 0 : index
    %175 = vector.load %arg10[%174, %c0_41] : memref<64x384xf32, #tpu.memory_space<vmem>>, vector<8x384xf32>
    %176 = arith.truncf %171 : vector<8x128xf32> to vector<8x128xbf16>
    %cst_42 = arith.constant dense<0.000000e+00> : vector<8x384xf32>
    %177 = tpu.matmul %176, %12, %cst_42 {dimension_numbers = #tpu.dot_dimension_numbers<[1], [0], [0], [1], [0, 0, 1, 1], [], []>} : vector<8x128xbf16>, vector<128x384xbf16>, vector<8x384xf32> -> vector<8x384xf32>
    %178 = vector.extract_strided_slice %175 {offsets = [0, 0], sizes = [8, 128], strides = [1, 1]} : vector<8x384xf32> to vector<8x128xf32>
    %179 = vector.extract_strided_slice %177 {offsets = [0, 0], sizes = [8, 128], strides = [1, 1]} : vector<8x384xf32> to vector<8x128xf32>
    %180 = arith.addf %178, %179 : vector<8x128xf32>
    %181 = arith.negf %180 : vector<8x128xf32>
    %182 = math.exp %181 : vector<8x128xf32>
    %cst_43 = arith.constant 1.000000e+00 : f32
    %183 = vector.broadcast %cst_43 : f32 to vector<8x128xf32>
    %184 = arith.addf %183, %182 : vector<8x128xf32>
    %185 = arith.divf %183, %184 : vector<8x128xf32>
    %186 = vector.extract_strided_slice %175 {offsets = [0, 128], sizes = [8, 128], strides = [1, 1]} : vector<8x384xf32> to vector<8x128xf32>
    %187 = vector.extract_strided_slice %177 {offsets = [0, 128], sizes = [8, 128], strides = [1, 1]} : vector<8x384xf32> to vector<8x128xf32>
    %188 = arith.addf %186, %187 : vector<8x128xf32>
    %189 = arith.negf %188 : vector<8x128xf32>
    %190 = math.exp %189 : vector<8x128xf32>
    %cst_44 = arith.constant 1.000000e+00 : f32
    %191 = vector.broadcast %cst_44 : f32 to vector<8x128xf32>
    %192 = arith.addf %191, %190 : vector<8x128xf32>
    %193 = arith.divf %191, %192 : vector<8x128xf32>
    %194 = vector.extract_strided_slice %175 {offsets = [0, 256], sizes = [8, 128], strides = [1, 1]} : vector<8x384xf32> to vector<8x128xf32>
    %195 = vector.extract_strided_slice %177 {offsets = [0, 256], sizes = [8, 128], strides = [1, 1]} : vector<8x384xf32> to vector<8x128xf32>
    %196 = arith.addf %195, %15 : vector<8x128xf32>
    %197 = arith.mulf %185, %196 : vector<8x128xf32>
    %198 = arith.addf %194, %197 : vector<8x128xf32>
    %199 = math.tanh %198 : vector<8x128xf32>
    %200 = arith.subf %171, %199 : vector<8x128xf32>
    %201 = arith.mulf %193, %200 : vector<8x128xf32>
    %202 = arith.addf %199, %201 : vector<8x128xf32>
    %c6_i32 = arith.constant 6 : i32
    %c8_i32_45 = arith.constant 8 : i32
    %203 = arith.muli %c6_i32, %c8_i32_45 : i32
    %204 = tpu.assume_multiple %203, 8 : i32
    %205 = arith.index_cast %204 : i32 to index
    %c0_46 = arith.constant 0 : index
    %206 = vector.load %arg10[%205, %c0_46] : memref<64x384xf32, #tpu.memory_space<vmem>>, vector<8x384xf32>
    %207 = arith.truncf %202 : vector<8x128xf32> to vector<8x128xbf16>
    %cst_47 = arith.constant dense<0.000000e+00> : vector<8x384xf32>
    %208 = tpu.matmul %207, %12, %cst_47 {dimension_numbers = #tpu.dot_dimension_numbers<[1], [0], [0], [1], [0, 0, 1, 1], [], []>} : vector<8x128xbf16>, vector<128x384xbf16>, vector<8x384xf32> -> vector<8x384xf32>
    %209 = vector.extract_strided_slice %206 {offsets = [0, 0], sizes = [8, 128], strides = [1, 1]} : vector<8x384xf32> to vector<8x128xf32>
    %210 = vector.extract_strided_slice %208 {offsets = [0, 0], sizes = [8, 128], strides = [1, 1]} : vector<8x384xf32> to vector<8x128xf32>
    %211 = arith.addf %209, %210 : vector<8x128xf32>
    %212 = arith.negf %211 : vector<8x128xf32>
    %213 = math.exp %212 : vector<8x128xf32>
    %cst_48 = arith.constant 1.000000e+00 : f32
    %214 = vector.broadcast %cst_48 : f32 to vector<8x128xf32>
    %215 = arith.addf %214, %213 : vector<8x128xf32>
    %216 = arith.divf %214, %215 : vector<8x128xf32>
    %217 = vector.extract_strided_slice %206 {offsets = [0, 128], sizes = [8, 128], strides = [1, 1]} : vector<8x384xf32> to vector<8x128xf32>
    %218 = vector.extract_strided_slice %208 {offsets = [0, 128], sizes = [8, 128], strides = [1, 1]} : vector<8x384xf32> to vector<8x128xf32>
    %219 = arith.addf %217, %218 : vector<8x128xf32>
    %220 = arith.negf %219 : vector<8x128xf32>
    %221 = math.exp %220 : vector<8x128xf32>
    %cst_49 = arith.constant 1.000000e+00 : f32
    %222 = vector.broadcast %cst_49 : f32 to vector<8x128xf32>
    %223 = arith.addf %222, %221 : vector<8x128xf32>
    %224 = arith.divf %222, %223 : vector<8x128xf32>
    %225 = vector.extract_strided_slice %206 {offsets = [0, 256], sizes = [8, 128], strides = [1, 1]} : vector<8x384xf32> to vector<8x128xf32>
    %226 = vector.extract_strided_slice %208 {offsets = [0, 256], sizes = [8, 128], strides = [1, 1]} : vector<8x384xf32> to vector<8x128xf32>
    %227 = arith.addf %226, %15 : vector<8x128xf32>
    %228 = arith.mulf %216, %227 : vector<8x128xf32>
    %229 = arith.addf %225, %228 : vector<8x128xf32>
    %230 = math.tanh %229 : vector<8x128xf32>
    %231 = arith.subf %202, %230 : vector<8x128xf32>
    %232 = arith.mulf %224, %231 : vector<8x128xf32>
    %233 = arith.addf %230, %232 : vector<8x128xf32>
    %c7_i32 = arith.constant 7 : i32
    %c8_i32_50 = arith.constant 8 : i32
    %234 = arith.muli %c7_i32, %c8_i32_50 : i32
    %235 = tpu.assume_multiple %234, 8 : i32
    %236 = arith.index_cast %235 : i32 to index
    %c0_51 = arith.constant 0 : index
    %237 = vector.load %arg10[%236, %c0_51] : memref<64x384xf32, #tpu.memory_space<vmem>>, vector<8x384xf32>
    %238 = arith.truncf %233 : vector<8x128xf32> to vector<8x128xbf16>
    %cst_52 = arith.constant dense<0.000000e+00> : vector<8x384xf32>
    %239 = tpu.matmul %238, %12, %cst_52 {dimension_numbers = #tpu.dot_dimension_numbers<[1], [0], [0], [1], [0, 0, 1, 1], [], []>} : vector<8x128xbf16>, vector<128x384xbf16>, vector<8x384xf32> -> vector<8x384xf32>
    %240 = vector.extract_strided_slice %237 {offsets = [0, 0], sizes = [8, 128], strides = [1, 1]} : vector<8x384xf32> to vector<8x128xf32>
    %241 = vector.extract_strided_slice %239 {offsets = [0, 0], sizes = [8, 128], strides = [1, 1]} : vector<8x384xf32> to vector<8x128xf32>
    %242 = arith.addf %240, %241 : vector<8x128xf32>
    %243 = arith.negf %242 : vector<8x128xf32>
    %244 = math.exp %243 : vector<8x128xf32>
    %cst_53 = arith.constant 1.000000e+00 : f32
    %245 = vector.broadcast %cst_53 : f32 to vector<8x128xf32>
    %246 = arith.addf %245, %244 : vector<8x128xf32>
    %247 = arith.divf %245, %246 : vector<8x128xf32>
    %248 = vector.extract_strided_slice %237 {offsets = [0, 128], sizes = [8, 128], strides = [1, 1]} : vector<8x384xf32> to vector<8x128xf32>
    %249 = vector.extract_strided_slice %239 {offsets = [0, 128], sizes = [8, 128], strides = [1, 1]} : vector<8x384xf32> to vector<8x128xf32>
    %250 = arith.addf %248, %249 : vector<8x128xf32>
    %251 = arith.negf %250 : vector<8x128xf32>
    %252 = math.exp %251 : vector<8x128xf32>
    %cst_54 = arith.constant 1.000000e+00 : f32
    %253 = vector.broadcast %cst_54 : f32 to vector<8x128xf32>
    %254 = arith.addf %253, %252 : vector<8x128xf32>
    %255 = arith.divf %253, %254 : vector<8x128xf32>
    %256 = vector.extract_strided_slice %237 {offsets = [0, 256], sizes = [8, 128], strides = [1, 1]} : vector<8x384xf32> to vector<8x128xf32>
    %257 = vector.extract_strided_slice %239 {offsets = [0, 256], sizes = [8, 128], strides = [1, 1]} : vector<8x384xf32> to vector<8x128xf32>
    %258 = arith.addf %257, %15 : vector<8x128xf32>
    %259 = arith.mulf %247, %258 : vector<8x128xf32>
    %260 = arith.addf %256, %259 : vector<8x128xf32>
    %261 = math.tanh %260 : vector<8x128xf32>
    %262 = arith.subf %233, %261 : vector<8x128xf32>
    %263 = arith.mulf %255, %262 : vector<8x128xf32>
    %264 = arith.addf %261, %263 : vector<8x128xf32>
    %c8_i32_55 = arith.constant 8 : i32
    %c0_56 = arith.constant 0 : index
    %c0_57 = arith.constant 0 : index
    %265 = vector.load %arg11[%c0_56, %c0_57] : memref<8x128xf32, #tpu.memory_space<vmem>>, vector<8x128xf32>
    tpu.vector_store %arg11[%c0_56, %c0_57], %264 {strides = array<i32>} : memref<8x128xf32, #tpu.memory_space<vmem>>, vector<8x128xf32>,
    %c0_i32_58 = arith.constant 0 : i32
    %266 = arith.cmpi eq, %arg1, %c0_i32_58 : i32
    %267 = arith.extui %266 : i1 to i32
    %c0_i32_59 = arith.constant 0 : i32
    %268 = arith.cmpi ne, %267, %c0_i32_59 : i32
    scf.if %268 {
      %269 = arith.truncf %264 : vector<8x128xf32> to vector<8x128xbf16>
      %c0_60 = arith.constant 0 : index
      %c0_61 = arith.constant 0 : index
      %270 = vector.load %arg7[%c0_60, %c0_61] : memref<128x128xbf16, #tpu.memory_space<vmem>>, vector<128x128xbf16>
      %cst_62 = arith.constant dense<0.000000e+00> : vector<8x128xf32>
      %271 = tpu.matmul %269, %270, %cst_62 {dimension_numbers = #tpu.dot_dimension_numbers<[1], [0], [0], [1], [0, 0, 1, 1], [], []>} : vector<8x128xbf16>, vector<128x128xbf16>, vector<8x128xf32> -> vector<8x128xf32>
      %c0_63 = arith.constant 0 : index
      %c0_64 = arith.constant 0 : index
      %272 = vector.load %arg8[%c0_63, %c0_64] : memref<1x128xf32, #tpu.memory_space<vmem>>, vector<1x128xf32>
      %273 = vector.broadcast %272 : vector<1x128xf32> to vector<8x128xf32>
      %274 = arith.addf %271, %273 : vector<8x128xf32>
      %c0_65 = arith.constant 0 : index
      %c0_66 = arith.constant 0 : index
      %275 = vector.load %arg9[%c0_65, %c0_66] : memref<8x128xf32, #tpu.memory_space<vmem>>, vector<8x128xf32>
      tpu.vector_store %arg9[%c0_65, %c0_66], %274 {strides = array<i32>} : memref<8x128xf32, #tpu.memory_space<vmem>>, vector<8x128xf32>,
    } else {
    }
    return
  }
  func.func @transform_0(%arg0: i32, %arg1: i32) -> (i32, i32, i32) {
    %c0_i32 = arith.constant 0 : i32
    %c0_i32_0 = arith.constant 0 : i32
    return %arg1, %arg0, %c0_i32 : i32, i32, i32
  }
  func.func @transform_1(%arg0: i32, %arg1: i32) -> (i32, i32) {
    %c0_i32 = arith.constant 0 : i32
    %c0_i32_0 = arith.constant 0 : i32
    %c0_i32_1 = arith.constant 0 : i32
    return %c0_i32, %c0_i32_0 : i32, i32
  }
  func.func @transform_2(%arg0: i32, %arg1: i32) -> (i32, i32) {
    %c0_i32 = arith.constant 0 : i32
    %c0_i32_0 = arith.constant 0 : i32
    %c0_i32_1 = arith.constant 0 : i32
    return %c0_i32, %c0_i32_0 : i32, i32
  }
  func.func @transform_3(%arg0: i32, %arg1: i32) -> (i32, i32) {
    %c0_i32 = arith.constant 0 : i32
    %c0_i32_0 = arith.constant 0 : i32
    %c0_i32_1 = arith.constant 0 : i32
    return %c0_i32, %c0_i32_0 : i32, i32
  }
  func.func @transform_4(%arg0: i32, %arg1: i32) -> (i32, i32) {
    %c0_i32 = arith.constant 0 : i32
    %c0_i32_0 = arith.constant 0 : i32
    %c0_i32_1 = arith.constant 0 : i32
    return %c0_i32, %c0_i32_0 : i32, i32
  }
  func.func @transform_5(%arg0: i32, %arg1: i32) -> (i32, i32) {
    %c0_i32 = arith.constant 0 : i32
    %c0_i32_0 = arith.constant 0 : i32
    %c0_i32_1 = arith.constant 0 : i32
    return %c0_i32, %c0_i32_0 : i32, i32
  }
  func.func @transform_6(%arg0: i32, %arg1: i32) -> (i32, i32) {
    %c0_i32 = arith.constant 0 : i32
    %c0_i32_0 = arith.constant 0 : i32
    %c0_i32_1 = arith.constant 0 : i32
    return %c0_i32, %c0_i32_0 : i32, i32
  }
  func.func @transform_7(%arg0: i32, %arg1: i32) -> (i32, i32) {
    %c0_i32 = arith.constant 0 : i32
    %c0_i32_0 = arith.constant 0 : i32
    return %arg0, %c0_i32 : i32, i32
  }
}

</mosaic_0001>

<bundles_post_ra>
// kernel: tpu_custom_call.1
= control target key start
LH: loop header
LB: loop body
LE: loop exit
PB: predicated region body
PF: predicated region fallthrough
CT: control target
= control target key end

     0   :  { %12 = vsyncpa [#allocation5], 0  ;;  %s2827_s0 = inlined_call_operand.hbm [shape: f32[8,8,4], index: 0, kind: input, shape index: {}]   ;;  %s2828_s1 = inlined_call_operand.hbm [shape: bf16[4,384], index: 1, kind: input, shape index: {}]   ;;  %s2829_s2 = inlined_call_operand.hbm [shape: f32[1,384], index: 2, kind: input, shape index: {}]   ;;  %s2830_s3 = inlined_call_operand.hbm [shape: bf16[128,384], index: 3, kind: input, shape index: {}]   ;;  %s2831_s4 = inlined_call_operand.hbm [shape: f32[1,128], index: 4, kind: input, shape index: {}]   ;;  %s2832_s5 = inlined_call_operand.hbm [shape: bf16[128,128], index: 5, kind: input, shape index: {}]   ;;  %s2833_s6 = inlined_call_operand.hbm [shape: f32[1,128], index: 6, kind: input, shape index: {}]   ;;  %s2834_s7 = inlined_call_operand.hbm [shape: f32[8,128], index: 7, kind: output, shape index: {}]  }
   0x1   :  { %13 = vsyncpa [#allocation8], 0 }
   0x2   :  { %14 = vsyncpa [#allocation11], 0 }
   0x3   :  { %15 = vsyncpa [#allocation14], 0 }
   0x4   :  { %16 = vsyncpa [#allocation6], 0  ;;  %s2213_s24 = smov [#allocation7]   ;;  %s2214_s26 = smov [#allocation10]  }
   0x5   :  { %s35_s25 = sshll.u32 %s2213_s24, 4  ;;  %s54_s27 = sshll.u32 %s2214_s26, 4  ;;  %s36_s25 = int_to_ptr.vmem [resolvable:$true] %s35_s25  ;;  %s2272_s27 = int_to_ptr.vmem [resolvable:$true] %s54_s27 }
   0x6   :  { %s2027_s30 = scalar_lea.hbm %s2828_s1, 96 }
   0x7   :  { %p2028_p0 = scmp.ne.s32.totalorder %s2828_s1, %s2027_s30  ;;  %p2031_p1 = scmp.lt.u32.totalorder %s2027_s30, %s2828_s1 }
   0x9   :  { %p2033_p2 = pnand %p2031_p1, %p2028_p0 }
   0xb   :  { %2036 = shalt.err (!%p2033_p2)
}
   0xc   :  { %s2037_s12 = scalar_lea.vmem %s36_s25, 96  ;;  %p2042_p4 = scmp.lt.s32.totalorder %s36_s25, %s36_s25 }
   0xd   :  { %p2038_p3 = scmp.ne.s32.totalorder %s36_s25, %s2037_s12  ;;  %p2043_p5 = scmp.lt.s32.totalorder %s2037_s12, %s2037_s12 }
   0xf   :  { %p2044_p6 = por %p2043_p5, %p2042_p4 }
  0x11   :  { %p2045_p7 = pnand %p2044_p6, %p2038_p3 }
  0x13   :  { %2048 = shalt.err (!%p2045_p7)
}
  0x14   :  { %38 = dma.hbm_to_vmem [thread:$0]  %s2828_s1, 96, %s36_s25, [#allocation8]  }
  0x15   :  { %s2049_s17 = scalar_lea.hbm %s2830_s3, 3072 }
  0x16   :  { %p2050_p8 = scmp.ne.s32.totalorder %s2830_s3, %s2049_s17  ;;  %p2053_p9 = scmp.lt.u32.totalorder %s2049_s17, %s2830_s3 }
  0x18   :  { %p2055_p10 = pnand %p2053_p9, %p2050_p8 }
  0x1a   :  { %2058 = shalt.err (!%p2055_p10)
}
  0x1b   :  { %s2059_s22 = scalar_lea.vmem %s2272_s27, 3072  ;;  %p2064_p12 = scmp.lt.s32.totalorder %s2272_s27, %s2272_s27 }
  0x1c   :  { %p2060_p11 = scmp.ne.s32.totalorder %s2272_s27, %s2059_s22  ;;  %p2065_p13 = scmp.lt.s32.totalorder %s2059_s22, %s2059_s22 }
  0x1e   :  { %p2066_p0 = por %p2065_p13, %p2064_p12 }
  0x20   :  { %p2067_p1 = pnand %p2066_p0, %p2060_p11 }
  0x22   :  { %2070 = shalt.err (!%p2067_p1)
}
  0x23   :  { %s2215_s1 = smov 192   ;;  %s2216_s23 = smov 12  }
  0x24   :  { %60 = dma.hbm_to_vmem [thread:$0]  %s2830_s3, 3072, %s2272_s27, [#allocation11], %s2215_s1, %s2215_s1, %s2216_s23  }
  0x25   :  { %s2217_s26 = smov [#allocation13]   ;;  %s2071_s8 = scalar_lea.hbm %s2832_s5, 1024 }
  0x26   :  { %s76_s28 = sshll.u32 %s2217_s26, 4  ;;  %p2072_p2 = scmp.ne.s32.totalorder %s2832_s5, %s2071_s8  ;;  %s77_s28 = int_to_ptr.vmem [resolvable:$true] %s76_s28 }
  0x27   :  { %p2075_p3 = scmp.lt.u32.totalorder %s2071_s8, %s2832_s5 }
  0x29   :  { %p2077_p4 = pnand %p2075_p3, %p2072_p2 }
  0x2b   :  { %2080 = shalt.err (!%p2077_p4)
}
  0x2c   :  { %s2081_s13 = scalar_lea.vmem %s77_s28, 1024  ;;  %p2086_p6 = scmp.lt.s32.totalorder %s77_s28, %s77_s28 }
  0x2d   :  { %p2082_p5 = scmp.ne.s32.totalorder %s77_s28, %s2081_s13  ;;  %p2087_p7 = scmp.lt.s32.totalorder %s2081_s13, %s2081_s13 }
  0x2f   :  { %p2088_p8 = por %p2087_p7, %p2086_p6 }
  0x31   :  { %p2089_p9 = pnand %p2088_p8, %p2082_p5 }
  0x33   :  { %2092 = shalt.err (!%p2089_p9)
}
  0x34   :  { %s2218_s3 = smov 64   ;;  %s2219_s27 = smov 4  }
  0x35   :  { %82 = dma.hbm_to_vmem [thread:$0]  %s2832_s5, 1024, %s77_s28, [#allocation14], %s2218_s3, %s2218_s3, %s2219_s27  }
  0x36   :  { %s2220_s16 = smov [#allocation4]   ;;  %s2093_s20 = scalar_lea.hbm %s2827_s0, 1024 }
  0x37   :  { %s22_s17 = sshll.u32 %s2220_s16, 4  ;;  %p2094_p10 = scmp.ne.s32.totalorder %s2827_s0, %s2093_s20  ;;  %s23_s17 = int_to_ptr.vmem [resolvable:$true] %s22_s17 }
  0x38   :  { %p2097_p11 = scmp.lt.u32.totalorder %s2093_s20, %s2827_s0 }
  0x3a   :  { %p2099_p12 = pnand %p2097_p11, %p2094_p10 }
  0x3c   :  { %2102 = shalt.err (!%p2099_p12)
}
  0x3d   :  { %s2103_s24 = scalar_lea.vmem %s23_s17, 1024  ;;  %p2108_p0 = scmp.lt.s32.totalorder %s23_s17, %s23_s17 }
  0x3e   :  { %p2104_p13 = scmp.ne.s32.totalorder %s23_s17, %s2103_s24  ;;  %p2109_p1 = scmp.lt.s32.totalorder %s2103_s24, %s2103_s24 }
  0x40   :  { %p2110_p2 = por %p2109_p1, %p2108_p0 }
  0x42   :  { %p2111_p3 = pnand %p2110_p2, %p2104_p13 }
  0x44   :  { %2114 = shalt.err (!%p2111_p3)
}
  0x45   :  { %s2221_s5 = smov 128   ;;  %s2222_s25 = smov 8  }
  0x46   :  { %28 = dma.hbm_to_vmem [thread:$0]  %s2827_s0, 1024, %s23_s17, [#allocation5], %s2221_s5, %s2221_s5, %s2222_s25  }
  0x47   :  { %s2223_s29 = smov [#allocation9]   ;;  %s2224_s8 = smov [#allocation12]  }
  0x48   :  { %s45_s30 = sshll.u32 %s2223_s29, 4  ;;  %s67_s9 = sshll.u32 %s2224_s8, 4  ;;  %s46_s30 = int_to_ptr.vmem [resolvable:$true] %s45_s30  ;;  %s68_s9 = int_to_ptr.vmem [resolvable:$true] %s67_s9 }
  0x49   :  { %s2115_s12 = scalar_lea.hbm %s2829_s2, 48 }
  0x4a   :  { %p2116_p4 = scmp.ne.s32.totalorder %s2829_s2, %s2115_s12  ;;  %p2119_p5 = scmp.lt.u32.totalorder %s2115_s12, %s2829_s2 }
  0x4c   :  { %p2121_p6 = pnand %p2119_p5, %p2116_p4 }
  0x4e   :  { %2124 = shalt.err (!%p2121_p6)
}
  0x4f   :  { %s2125_s0 = scalar_lea.vmem %s46_s30, 48  ;;  %s2129_s15 = scalar_lea.vmem %s46_s30, 64 }
  0x50   :  { %p2126_p7 = scmp.ne.s32.totalorder %s46_s30, %s2125_s0  ;;  %p2130_p8 = scmp.lt.s32.totalorder %s46_s30, %s46_s30 }
  0x51   :  { %p2131_p9 = scmp.lt.s32.totalorder %s2129_s15, %s2125_s0 }
  0x53   :  { %p2132_p10 = por %p2131_p9, %p2130_p8 }
  0x55   :  { %p2133_p11 = pnand %p2132_p10, %p2126_p7 }
  0x57   :  { %2136 = shalt.err (!%p2133_p11)
}
  0x58   :  { %48 = dma.hbm_to_vmem [thread:$0]  %s2829_s2, 48, %s46_s30, [#allocation8]  }
  0x59   :  { %s2137_s20 = scalar_lea.hbm %s2831_s4, 16 }
  0x5a   :  { %p2138_p12 = scmp.ne.s32.totalorder %s2831_s4, %s2137_s20  ;;  %p2141_p13 = scmp.lt.u32.totalorder %s2137_s20, %s2831_s4 }
  0x5c   :  { %p2143_p0 = pnand %p2141_p13, %p2138_p12 }
  0x5e   :  { %2146 = shalt.err (!%p2143_p0)
}
  0x5f   :  { %s2147_s24 = scalar_lea.vmem %s68_s9, 16  ;;  %s2151_s5 = scalar_lea.vmem %s68_s9, 32 }
  0x60   :  { %p2148_p1 = scmp.ne.s32.totalorder %s68_s9, %s2147_s24  ;;  %p2152_p2 = scmp.lt.s32.totalorder %s68_s9, %s68_s9 }
  0x61   :  { %p2153_p3 = scmp.lt.s32.totalorder %s2151_s5, %s2147_s24 }
  0x63   :  { %p2154_p4 = por %p2153_p3, %p2152_p2 }
  0x65   :  { %p2155_p5 = pnand %p2154_p4, %p2148_p1 }
  0x67   :  { %2158 = shalt.err (!%p2155_p5)
}
  0x68   :  { %70 = dma.hbm_to_vmem [thread:$0]  %s2831_s4, 16, %s68_s9, [#allocation11]  }
  0x69   :  { %s2225_s26 = smov [#allocation15]   ;;  %s2159_s8 = scalar_lea.hbm %s2833_s6, 16 }
  0x6a   :  { %s89_s28 = sshll.u32 %s2225_s26, 4  ;;  %p2160_p6 = scmp.ne.s32.totalorder %s2833_s6, %s2159_s8  ;;  %s90_s28 = int_to_ptr.vmem [resolvable:$true] %s89_s28 }
  0x6b   :  { %p2163_p7 = scmp.lt.u32.totalorder %s2159_s8, %s2833_s6 }
  0x6d   :  { %p2165_p8 = pnand %p2163_p7, %p2160_p6 }
  0x6f   :  { %2168 = shalt.err (!%p2165_p8)
}
  0x70   :  { %s2169_s3 = scalar_lea.vmem %s90_s28, 16  ;;  %s2173_s4 = scalar_lea.vmem %s90_s28, 32 }
  0x71   :  { %p2170_p9 = scmp.ne.s32.totalorder %s90_s28, %s2169_s3  ;;  %p2174_p10 = scmp.lt.s32.totalorder %s90_s28, %s90_s28 }
  0x72   :  { %p2175_p11 = scmp.lt.s32.totalorder %s2173_s4, %s2169_s3 }
  0x74   :  { %p2176_p12 = por %p2175_p11, %p2174_p10 }
  0x76   :  { %p2177_p13 = pnand %p2176_p12, %p2170_p9 }
  0x78   :  { %2180 = shalt.err (!%p2177_p13)
}
  0x79   :  { %92 = dma.hbm_to_vmem [thread:$0]  %s2833_s6, 16, %s90_s28, [#allocation14]  }
  0x7a   :  { %2203 = dma.done.wait [#allocation5], 1024  }
  0x7b   :  { %2204 = vsyncadd [#allocation5], 4294966272 }
  0x7c   :  { %2205 = dma.done.wait [#allocation8], 144  }
  0x7d   :  { %2206 = vsyncadd [#allocation8], 4294967152 }
  0x7e   :  { %2207 = dma.done.wait [#allocation11], 3088  }
  0x7f   :  { %2208 = vsyncadd [#allocation11], 4294964208 }
  0x80   :  { %2209 = dma.done.wait [#allocation14], 1040  }
  0x81   :  { %2210 = vsyncadd [#allocation14], 4294966256  ;;  %v135_v0 = vlaneseq  ;;  %v2226_v1 = vmov 1983009808   ;;  %v2835_v3 = vmov 0   ;;  %vm180_vm0 = vcmask 1041408  }
  0x82   :  { %v153_v2 = vunpack.c.l.s4 %v2226_v1  ;;  %222 = vmatprep.mubr.bf16.mxu0 %v2835_v3  ;;  %v132_v7 = vld [vmem:[#allocation7] sm:$0x3f]  ;;  %v121_v10 = vld [vmem:[#allocation4 + $0x8] sm:$0xff]  ;;  %vm167_vm1 = vcmask 31744   ;;  %v122_v18 = vld [vmem:[#allocation4 + $0x10] sm:$0xff]  ;;  %v2837_v24 = vmov 0.0  }
  0x83   :  { %v2364_v4 = vshrl.u32 %v135_v0, 7  ;;  %v120_v8 = vld [vmem:[#allocation4] sm:$0xff]  ;;  %v151_v12 = vcombine.high %v132_v7, %v132_v7  ;;  %v2368_v15 = vld [vmem:[#allocation10 + $0x4] ss:$12 sps:$4 sm:$0xff]   ;;  %v2372_v17 = vld [vmem:[#allocation10] ss:$12 sps:$4 sm:$0xff]  }
  0x84   :  { %v154_v5 = vunpack.c.0.s8 %v153_v2  ;;  %v128_v11 = vpack.c.bf16 %v121_v10, %v120_v8  ;;  %v123_v19 = vld [vmem:[#allocation4 + $0x18] sm:$0xff]  ;;  %v2377_v21 = vld [vmem:[#allocation10 + $0x1c] ss:$12 sps:$4 sm:$0xff]   ;;  %v2382_v26 = vld [vmem:[#allocation10 + $0x18] ss:$12 sps:$4 sm:$0xff]   ;;  %vm2229_vm2 = vmmov 0  }
  0x85   :  { %v124_v22 = vld [vmem:[#allocation4 + $0x20] sm:$0xff]  ;;  %v125_v23 = vld [vmem:[#allocation4 + $0x28] sm:$0xff]  ;;  %v129_v25 = vpack.c.bf16 %v123_v19, %v122_v18  ;;  %v126_v32 = vld [vmem:[#allocation4 + $0x30] sm:$0xff]  ;;  %v2230_v51 = vmov 0.0|0.0   ;;  %v137_v52 = vsub.s32 0, %v2364_v4  ;;  %v141_v54 = vsub.s32 1, %v2364_v4 }
  0x86   :  { %v157_v6 = vsub.s32 %v154_v5, %v2364_v4  ;;  %1681 = vmatprep.mubr.msk.bf16.mxu1 %vm167_vm1, %v128_v11  ;;  %v130_v27 = vpack.c.bf16 %v125_v23, %v124_v22  ;;  %v2386_v28 = vld [vmem:[#allocation10 + $0x34] ss:$12 sps:$4 sm:$0xff]   ;;  %v2389_v29 = vld [vmem:[#allocation10 + $0x30] ss:$12 sps:$4 sm:$0xff]   ;;  %v2392_v30 = vld [vmem:[#allocation10 + $0x4c] ss:$12 sps:$4 sm:$0xff]  }
  0x87   :  { %v2394_v31 = vld [vmem:[#allocation10 + $0x8] ss:$12 sps:$4 sm:$0xff]   ;;  %v2399_v34 = vld [vmem:[#allocation10 + $0x20] ss:$12 sps:$4 sm:$0xff]   ;;  %v2407_v36 = vld [vmem:[#allocation10 + $0x64] ss:$12 sps:$4 sm:$0xff]  }
  0x88   :  { %v158_v9 = vrot.slane %v132_v7, %v157_v6  ;;  %v165_v16 = vrot.slane %v151_v12, %v157_v6  ;;  %v127_v33 = vld [vmem:[#allocation4 + $0x38] sm:$0xff]  ;;  %v2411_v38 = vld [vmem:[#allocation10 + $0x38] ss:$12 sps:$4 sm:$0xff]   ;;  %v2417_v40 = vld [vmem:[#allocation10 + $0x7c] ss:$12 sps:$4 sm:$0xff]   ;;  %v145_v55 = vsub.s32 2, %v2364_v4 }
  0x89   :  { %v2403_v35 = vld [vmem:[#allocation10 + $0x48] ss:$12 sps:$4 sm:$0xff]   ;;  %v131_v37 = vpack.c.bf16 %v127_v33, %v126_v32  ;;  %v2413_v39 = vld [vmem:[#allocation10 + $0x60] ss:$12 sps:$4 sm:$0xff]   ;;  %v2419_v41 = vld [vmem:[#allocation10 + $0x50] ss:$12 sps:$4 sm:$0xff]  }
  0x8a   :  { %v166_v13 = vcombine.high %v158_v9, %v158_v9  ;;  %v182_v14 = vsel %vm180_vm0, %v158_v9, 0  ;;  %1869 = vmatprep.subr.msk.bf16.mxu1 %vm180_vm0, %v165_v16  ;;  %v188_v20 = vsel %vm180_vm0, %v165_v16, 0  ;;  %v2426_v42 = vld [vmem:[#allocation10 + $0x78] ss:$12 sps:$4 sm:$0xff]   ;;  %v2433_v43 = vld [vmem:[#allocation10 + $0x94] ss:$12 sps:$4 sm:$0xff]  }
  0x8b   :  { %1680 = vmatpush3.bf16.msra.mxu1 %v188_v20  ;;  %v2436_v44 = vld [vmem:[#allocation10 + $0x68] ss:$12 sps:$4 sm:$0xff]   ;;  %v2440_v45 = vld [vmem:[#allocation10 + $0x90] ss:$12 sps:$4 sm:$0xff]   ;;  %v2443_v46 = vld [vmem:[#allocation10 + $0xac] ss:$12 sps:$4 sm:$0xff]  }
  0x8c   :  { %1534 = vmatprep.subr.msk.bf16.mxu0 %vm180_vm0, %v166_v13  ;;  %1689 = vmatprep.subr.bf16.mxu1 %v2837_v24  ;;  %v2446_v47 = vld [vmem:[#allocation10 + $0x80] ss:$12 sps:$4 sm:$0xff]   ;;  %v2451_v48 = vld [vmem:[#allocation10 + $0xa8] ss:$12 sps:$4 sm:$0xff]   ;;  %v2456_v49 = vld [vmem:[#allocation10 + $0x98] ss:$12 sps:$4 sm:$0xff]  }
  0x8d   :  { %191 = vmatpush1.bf16.msra.mxu0 %v182_v14  ;;  %v2461_v50 = vld [vmem:[#allocation10 + $0xb0] ss:$12 sps:$4 sm:$0xff]   ;;  %s2231_s6 = smov [#allocation16]  }
  0x8e   :  { %527 = vmatprep.subr.bf16.mxu0 %v2368_v15  ;;  %1682 = vmatmul.mubr.msk.bf16.vlgmr.msra.gmra.mrb[0].mxu1 %vm167_vm1, %v129_v25  ;;  %v133_v53 = vld [vmem:[#allocation9] sm:$0x7]  ;;  %s1515_s14 = sshll.u32 %s2231_s6, 4  ;;  %s1516_s14 = int_to_ptr.vmem [resolvable:$true] %s1515_s14 }
  0x8f   :  { %1685 = vmatprep.mubr.msk.bf16.mxu1 %vm167_vm1, %v130_v27  ;;  %1690 = vmatpush3.bf16.msra.mxu1 %v2394_v31  ;;  %v138_v56 = vrot.slane %v133_v53, %v137_v52  ;;  %v142_v57 = vrot.slane %v133_v53, %v141_v54  ;;  %v146_v58 = vrot.slane %v133_v53, %v145_v55  ;;  %s2181_s0 = scalar_lea.vmem %s1516_s14, 128  ;;  %p2186_p1 = scmp.lt.s32.totalorder %s1516_s14, %s1516_s14 }
  0x90   :  { %1535 = vmatmul.mubr.msk.bf16.vlgmr.msra.gmra.mrb[0].mxu0 %vm167_vm1, %v128_v11  ;;  %1691 = vmatprep.subr.bf16.mxu1 %v2837_v24  ;;  %p2182_p0 = scmp.ne.s32.totalorder %s1516_s14, %s2181_s0  ;;  %p2187_p2 = scmp.lt.s32.totalorder %s2181_s0, %s2181_s0 }
  0x91   :  { %528 = vmatpush1.bf16.msra.mxu0 %v2372_v17  ;;  %232 = vmatprep.mubr.bf16.mxu0 %v2835_v3 }
  0x92   :  { %529 = vmatprep.subr.bf16.mxu0 %v2377_v21  ;;  %p2188_p3 = por %p2187_p2, %p2186_p1 }
  0x93   :  { %1692 = vmatpush3.bf16.msra.mxu1 %v2399_v34 }
  0x94   :  { %1693 = vmatprep.subr.bf16.mxu1 %v2837_v24  ;;  %p2189_p4 = pnand %p2188_p3, %p2182_p0 }
  0x95   :  { %530 = vmatpush1.bf16.msra.mxu0 %v2382_v26 }
  0x96   :  { %531 = vmatprep.subr.bf16.mxu0 %v2386_v28  ;;  %1686 = vmatmul.mubr.msk.bf16.gmra.mrb[4].mxu1 %vm167_vm1, %v131_v37 }
  0x97   :  { %1705 = vmatprep.mubr.msk.bf16.mxu1 %vm2229_vm2, %v2837_v24  ;;  %1694 = vmatpush3.bf16.msra.mxu1 %v2411_v38 }
  0x98   :  { %1536 = vmatmul.mubr.msk.bf16.gmra.mrb[4].mxu0 %vm167_vm1, %v129_v25  ;;  %1695 = vmatprep.subr.bf16.mxu1 %v2837_v24 }
  0x99   :  { %532 = vmatpush1.bf16.msra.mxu0 %v2389_v29  ;;  %242 = vmatprep.mubr.bf16.mxu0 %v2835_v3 }
  0x9a   :  { %533 = vmatprep.subr.bf16.mxu0 %v2392_v30 }
  0x9b   :  { %1696 = vmatpush3.bf16.msra.mxu1 %v2419_v41 }
  0x9c   :  { %1697 = vmatprep.subr.bf16.mxu1 %v2837_v24 }
  0x9d   :  { %534 = vmatpush1.bf16.msra.mxu0 %v2403_v35 }
  0x9e   :  { %535 = vmatprep.subr.bf16.mxu0 %v2407_v36 }
  0x9f   :  { %1698 = vmatpush3.bf16.msra.mxu1 %v2436_v44 }
  0xa0   :  { %1537 = vmatmul.mubr.msk.bf16.gmra.mrb[8].mxu0 %vm167_vm1, %v130_v27  ;;  %1699 = vmatprep.subr.bf16.mxu1 %v2837_v24 }
  0xa1   :  { %536 = vmatpush1.bf16.msra.mxu0 %v2413_v39  ;;  %252 = vmatprep.mubr.bf16.mxu0 %v2835_v3 }
  0xa2   :  { %537 = vmatprep.subr.bf16.mxu0 %v2417_v40 }
  0xa3   :  { %1700 = vmatpush3.bf16.msra.mxu1 %v2446_v47 }
  0xa4   :  { %1701 = vmatprep.subr.bf16.mxu1 %v2837_v24 }
  0xa5   :  { %538 = vmatpush1.bf16.msra.mxu0 %v2426_v42 }
  0xa6   :  { %539 = vmatprep.subr.bf16.mxu0 %v2433_v43 }
  0xa7   :  { %1702 = vmatpush3.bf16.msra.mxu1 %v2456_v49 }
  0xa8   :  { %1538 = vmatmul.mubr.msk.bf16.gmra.mrb[12].mxu0 %vm167_vm1, %v131_v37  ;;  %1703 = vmatprep.subr.bf16.mxu1 %v2837_v24 }
  0xa9   :  { %540 = vmatpush1.bf16.msra.mxu0 %v2440_v45  ;;  %559 = vmatprep.mubr.bf16.mxu0 %v2835_v3 }
  0xaa   :  { %541 = vmatprep.subr.bf16.mxu0 %v2443_v46 }
  0xab   :  { %1704 = vmatpush3.bf16.msra.mxu1 %v2461_v50 }
  0xac   :  { %1709 = vmatprep.subr.bf16.mxu1 %v2837_v24 }
  0xad   :  { %542 = vmatpush1.bf16.msra.mxu0 %v2451_v48 }
  0xae   :  { %636 = vmatprep.subr.bf16.mxu0 %v2368_v15  ;;  %1706 = vmatmul.mubr.bf16.vlgmr.msra.gmra.mrb[8].mxu1 %v2230_v51 }
  0xaf   :  { %1710 = vmatpush3.bf16.msra.mxu1 %v2394_v31  ;;  %1725 = vmatprep.mubr.msk.bf16.mxu1 %vm2229_vm2, %v2837_v24 }
  0xb0   :  { %560 = vmatmul.mubr.bf16.vlgmr.msra.gmra.mrb[16].mxu0 %v2230_v51  ;;  %1711 = vmatprep.subr.bf16.mxu1 %v2837_v24 }
  0xb1   :  { %637 = vmatpush1.bf16.msra.mxu0 %v2372_v17  ;;  %668 = vmatprep.mubr.bf16.mxu0 %v2835_v3 }
  0xb2   :  { %638 = vmatprep.subr.bf16.mxu0 %v2377_v21 }
  0xb3   :  { %1712 = vmatpush3.bf16.msra.mxu1 %v2399_v34 }
  0xb4   :  { %1713 = vmatprep.subr.bf16.mxu1 %v2837_v24 }
  0xb5   :  { %639 = vmatpush1.bf16.msra.mxu0 %v2382_v26 }
  0xb6   :  { %640 = vmatprep.subr.bf16.mxu0 %v2386_v28 }
  0xb7   :  { %1714 = vmatpush3.bf16.msra.mxu1 %v2411_v38 }
  0xb8   :  { %1715 = vmatprep.subr.bf16.mxu1 %v2837_v24 }
  0xb9   :  { %641 = vmatpush1.bf16.msra.mxu0 %v2389_v29 }
  0xba   :  { %642 = vmatprep.subr.bf16.mxu0 %v2392_v30 }
  0xbb   :  { %1716 = vmatpush3.bf16.msra.mxu1 %v2419_v41 }
  0xbc   :  { %1717 = vmatprep.subr.bf16.mxu1 %v2837_v24 }
  0xbd   :  { %643 = vmatpush1.bf16.msra.mxu0 %v2403_v35 }
  0xbe   :  { %644 = vmatprep.subr.bf16.mxu0 %v2407_v36 }
  0xbf   :  { %1718 = vmatpush3.bf16.msra.mxu1 %v2436_v44 }
  0xc0   :  { %1719 = vmatprep.subr.bf16.mxu1 %v2837_v24 }
  0xc1   :  { %645 = vmatpush1.bf16.msra.mxu0 %v2413_v39 }
  0xc2   :  { %646 = vmatprep.subr.bf16.mxu0 %v2417_v40 }
  0xc3   :  { %1720 = vmatpush3.bf16.msra.mxu1 %v2446_v47 }
  0xc4   :  { %1721 = vmatprep.subr.bf16.mxu1 %v2837_v24 }
  0xc5   :  { %647 = vmatpush1.bf16.msra.mxu0 %v2426_v42 }
  0xc6   :  { %648 = vmatprep.subr.bf16.mxu0 %v2433_v43 }
  0xc7   :  { %1722 = vmatpush3.bf16.msra.mxu1 %v2456_v49 }
  0xc8   :  { %1723 = vmatprep.subr.bf16.mxu1 %v2837_v24 }
  0xc9   :  { %649 = vmatpush1.bf16.msra.mxu0 %v2440_v45 }
  0xca   :  { %650 = vmatprep.subr.bf16.mxu0 %v2443_v46 }
  0xcb   :  { %1724 = vmatpush3.bf16.msra.mxu1 %v2461_v50 }
  0xcc   :  { %1729 = vmatprep.subr.bf16.mxu1 %v2837_v24 }
  0xcd   :  { %651 = vmatpush1.bf16.msra.mxu0 %v2451_v48 }
  0xce   :  { %745 = vmatprep.subr.bf16.mxu0 %v2368_v15 }
 0x161   :  { %v1683_v0 = vpop.f32.mrb[0].mxu1 }
 0x162   :  { %v2507_v5 = vadd.f32 %v1683_v0, %v146_v58  ;;  %v297_v6 = vpop.f32.mrb[1].mxu1 }
 0x163   :  { %v224_v59 = vpop.f32.mrb[0].mxu0  ;;  %v298_v8 = vadd.f32 %v297_v6, %v146_v58  ;;  %v1684_v9 = vpop.f32.mrb[2].mxu1 }
 0x164   :  { %v225_v60 = vadd.f32 %v224_v59, %v138_v56  ;;  %v226_v61 = vpop.f32.mrb[1].mxu0  ;;  %v2511_v4 = vadd.f32 %v1684_v9, %v146_v58  ;;  %v300_v10 = vpop.f32.mrb[3].mxu1 }
 0x165   :  { %v227_v62 = vadd.f32 %v226_v61, %v142_v57  ;;  %v228_v63 = vpop.f32.mrb[2].mxu0  ;;  %v2513_v11 = vadd.f32 %v300_v10, %v146_v58 }
 0x166   :  { %v2505_v1 = vadd.f32 %v228_v63, %v138_v56  ;;  %v230_v2 = vpop.f32.mrb[3].mxu0 }
 0x167   :  { %v2509_v7 = vadd.f32 %v230_v2, %v142_v57 }
 0x169   :  { %v1687_v22 = vpop.f32.mrb[4].mxu1 }
 0x16a   :  { %v2523_v25 = vadd.f32 %v1687_v22, %v146_v58  ;;  %v313_v27 = vpop.f32.mrb[5].mxu1 }
 0x16b   :  { %v234_v12 = vpop.f32.mrb[4].mxu0  ;;  %v2525_v32 = vadd.f32 %v313_v27, %v146_v58  ;;  %v1688_v33 = vpop.f32.mrb[6].mxu1 }
 0x16c   :  { %v2515_v13 = vadd.f32 %v234_v12, %v138_v56  ;;  %v236_v14 = vpop.f32.mrb[5].mxu0  ;;  %2839 = vst [vmem:[#allocation22_spill] sm:$0xff] %v2523_v25  ;;  %v2527_v37 = vadd.f32 %v1688_v33, %v146_v58  ;;  %v316_v51 = vpop.f32.mrb[7].mxu1 }
 0x16d   :  { %v2517_v16 = vadd.f32 %v236_v14, %v142_v57  ;;  %v238_v18 = vpop.f32.mrb[6].mxu0  ;;  %v2529_v52 = vadd.f32 %v316_v51, %v146_v58 }
 0x16e   :  { %v2519_v19 = vadd.f32 %v238_v18, %v138_v56  ;;  %v240_v20 = vpop.f32.mrb[7].mxu0  ;;  %2840 = vst [vmem:[#allocation23_spill] sm:$0xff] %v2527_v37 }
 0x16f   :  { %v2521_v23 = vadd.f32 %v240_v20, %v142_v57 }
 0x173   :  { %v244_v53 = vpop.f32.mrb[8].mxu0 }
 0x174   :  { %v2531_v54 = vadd.f32 %v244_v53, %v138_v56  ;;  %v246_v55 = vpop.f32.mrb[9].mxu0 }
 0x175   :  { %v2533_v59 = vadd.f32 %v246_v55, %v142_v57  ;;  %v248_v61 = vpop.f32.mrb[10].mxu0 }
 0x176   :  { %v2535_v63 = vadd.f32 %v248_v61, %v138_v56  ;;  %v250_v0 = vpop.f32.mrb[11].mxu0 }
 0x177   :  { %v2537_v2 = vadd.f32 %v250_v0, %v142_v57 }
 0x17b   :  { %v254_v6 = vpop.f32.mrb[12].mxu0 }
 0x17c   :  { %v2539_v9 = vadd.f32 %v254_v6, %v138_v56  ;;  %v256_v10 = vpop.f32.mrb[13].mxu0 }
 0x17d   :  { %v2541_v12 = vadd.f32 %v256_v10, %v142_v57  ;;  %v258_v58 = vpop.f32.mrb[14].mxu0 }
 0x17e   :  { %v2543_v14 = vadd.f32 %v258_v58, %v138_v56  ;;  %v260_v18 = vpop.f32.mrb[15].mxu0  ;;  %v2547_v56 = vld [vmem:[#allocation12] ss:$0 sm:$0xff] }
 0x17f   :  { %v2545_v20 = vadd.f32 %v260_v18, %v142_v57 }
 0x181   :  { %v602_v0 = vpop.f32.mrb[8].mxu1 }
 0x182   :  { %v1707_v6 = vpop.f32.mrb[9].mxu1  ;;  %v622_v57 = vadd.f32 %v2547_v56, %v602_v0 }
 0x183   :  { %v561_v22 = vpop.f32.mrb[16].mxu0  ;;  %v605_v3 = vpop.f32.mrb[10].mxu1 }
 0x184   :  { %v608_v27 = vadd.f32 %v561_v22, %v225_v60  ;;  %v563_v33 = vpop.f32.mrb[17].mxu0  ;;  %v1708_v24 = vpop.f32.mrb[11].mxu1 }
 0x185   :  { %v615_v51 = vadd.f32 %v563_v33, %v227_v62  ;;  %v565_v53 = vpop.f32.mrb[18].mxu0 }
 0x186   :  { %v1568_v55 = vmul.f32 -1.442695, %v608_v27  ;;  %v566_v61 = vpop.f32.mrb[19].mxu0 }
 0x187   :  { %v1569_v10 = vmul.f32 -1.442695, %v615_v51 }
 0x188   :  { %1930 = vpow2.f32 %v1568_v55 }
 0x189   :  { %1932 = vpow2.f32 %v1569_v10 }
 0x192   :  { %v1931_v37 = vpop.eup %1930 }
 0x193   :  { %v612_v25 = vadd.f32 1.0, %v1931_v37  ;;  %v1933_v60 = vpop.eup %1932  ;;  %v2842_v37 = vmov 0  }
 0x194   :  { %v619_v18 = vadd.f32 1.0, %v1933_v60 }
 0x195   :  { %1934 = vrcp.f32 %v612_v25 }
 0x19f   :  { %v1935_v58 = vpop.eup %1934 }
 0x1a0   :  { %v623_v62 = vmul.f32 %v1935_v58, %v622_v57 }
 0x1a2   :  { %v624_v22 = vadd.f32 %v623_v62, %v298_v8  ;;  %v2841_v8 = vmov 0.0  }
 0x1a4   :  { %1936 = vtanh.f32 %v624_v22 }
 0x1a5   :  { %1938 = vrcp.f32 %v619_v18 }
 0x1ae   :  { %v1937_v27 = vpop.eup %1936 }
 0x1af   :  { %v626_v33 = vsub.f32 0.0, %v1937_v27  ;;  %v1939_v3 = vpop.eup %1938 }
 0x1b1   :  { %v627_v24 = vmul.f32 %v1939_v3, %v626_v33 }
 0x1b3   :  { %v2550_v51 = vadd.f32 %v1937_v27, %v627_v24 }
 0x1b5   :  { %v635_v25 = vpack.c.bf16 %v2550_v51, %v2550_v51 }
 0x1b7   :  { %669 = vmatmul.mubr.bf16.vlgmr.msra.gmra.mrb[20].mxu0 %v635_v25  ;;  %1726 = vmatmul.mubr.bf16.vlgmr.msra.gmra.mrb[12].mxu1 %v635_v25 }
 0x1b8   :  { %746 = vmatpush1.bf16.msra.mxu0 %v2372_v17  ;;  %1730 = vmatpush3.bf16.msra.mxu1 %v2394_v31 }
 0x1b9   :  { %747 = vmatprep.subr.bf16.mxu0 %v2377_v21  ;;  %1731 = vmatprep.subr.bf16.mxu1 %v2841_v8 }
 0x1ba   :  { %777 = vmatprep.mubr.bf16.mxu0 %v2842_v37  ;;  %1745 = vmatprep.mubr.msk.bf16.mxu1 %vm2229_vm2, %v2841_v8 }
 0x1bc   :  { %748 = vmatpush1.bf16.msra.mxu0 %v2382_v26  ;;  %1732 = vmatpush3.bf16.msra.mxu1 %v2399_v34 }
 0x1bd   :  { %749 = vmatprep.subr.bf16.mxu0 %v2386_v28  ;;  %1733 = vmatprep.subr.bf16.mxu1 %v2841_v8 }
 0x1c0   :  { %750 = vmatpush1.bf16.msra.mxu0 %v2389_v29  ;;  %1734 = vmatpush3.bf16.msra.mxu1 %v2411_v38 }
 0x1c1   :  { %751 = vmatprep.subr.bf16.mxu0 %v2392_v30  ;;  %1735 = vmatprep.subr.bf16.mxu1 %v2841_v8 }
 0x1c4   :  { %752 = vmatpush1.bf16.msra.mxu0 %v2403_v35  ;;  %1736 = vmatpush3.bf16.msra.mxu1 %v2419_v41 }
 0x1c5   :  { %753 = vmatprep.subr.bf16.mxu0 %v2407_v36  ;;  %1737 = vmatprep.subr.bf16.mxu1 %v2841_v8 }
 0x1c8   :  { %754 = vmatpush1.bf16.msra.mxu0 %v2413_v39  ;;  %1738 = vmatpush3.bf16.msra.mxu1 %v2436_v44 }
 0x1c9   :  { %755 = vmatprep.subr.bf16.mxu0 %v2417_v40  ;;  %1739 = vmatprep.subr.bf16.mxu1 %v2841_v8 }
 0x1cc   :  { %756 = vmatpush1.bf16.msra.mxu0 %v2426_v42  ;;  %1740 = vmatpush3.bf16.msra.mxu1 %v2446_v47 }
 0x1cd   :  { %757 = vmatprep.subr.bf16.mxu0 %v2433_v43  ;;  %1741 = vmatprep.subr.bf16.mxu1 %v2841_v8 }
 0x1d0   :  { %758 = vmatpush1.bf16.msra.mxu0 %v2440_v45  ;;  %1742 = vmatpush3.bf16.msra.mxu1 %v2456_v49 }
 0x1d1   :  { %759 = vmatprep.subr.bf16.mxu0 %v2443_v46  ;;  %1743 = vmatprep.subr.bf16.mxu1 %v2841_v8 }
 0x1d4   :  { %760 = vmatpush1.bf16.msra.mxu0 %v2451_v48  ;;  %1744 = vmatpush3.bf16.msra.mxu1 %v2461_v50 }
 0x1d5   :  { %854 = vmatprep.subr.bf16.mxu0 %v2368_v15  ;;  %1749 = vmatprep.subr.bf16.mxu1 %v2841_v8 }
 0x28a   :  { %v670_v53 = vpop.f32.mrb[20].mxu0  ;;  %v711_v55 = vpop.f32.mrb[12].mxu1 }
 0x28b   :  { %v717_v61 = vadd.f32 %v670_v53, %v2505_v1  ;;  %v672_v0 = vpop.f32.mrb[21].mxu0  ;;  %v1727_v6 = vpop.f32.mrb[13].mxu1  ;;  %v731_v24 = vadd.f32 %v2547_v56, %v711_v55 }
 0x28c   :  { %v724_v10 = vadd.f32 %v672_v0, %v2509_v7  ;;  %v674_v57 = vpop.f32.mrb[22].mxu0  ;;  %v714_v60 = vpop.f32.mrb[14].mxu1 }
 0x28d   :  { %v1570_v58 = vmul.f32 -1.442695, %v717_v61  ;;  %v675_v62 = vpop.f32.mrb[23].mxu0  ;;  %v1728_v18 = vpop.f32.mrb[15].mxu1 }
 0x28e   :  { %v1571_v22 = vmul.f32 -1.442695, %v724_v10 }
 0x28f   :  { %1940 = vpow2.f32 %v1570_v58 }
 0x290   :  { %1942 = vpow2.f32 %v1571_v22 }
 0x299   :  { %v1941_v27 = vpop.eup %1940 }
 0x29a   :  { %v721_v33 = vadd.f32 1.0, %v1941_v27  ;;  %v1943_v3 = vpop.eup %1942 }
 0x29b   :  { %v728_v6 = vadd.f32 1.0, %v1943_v3 }
 0x29c   :  { %1944 = vrcp.f32 %v721_v33 }
 0x2a6   :  { %v1945_v25 = vpop.eup %1944 }
 0x2a7   :  { %v732_v1 = vmul.f32 %v1945_v25, %v731_v24 }
 0x2a9   :  { %v733_v53 = vadd.f32 %v732_v1, %v2513_v11 }
 0x2ab   :  { %1946 = vtanh.f32 %v733_v53 }
 0x2ac   :  { %1948 = vrcp.f32 %v728_v6 }
 0x2b5   :  { %v1947_v7 = vpop.eup %1946 }
 0x2b6   :  { %v735_v61 = vsub.f32 %v2550_v51, %v1947_v7  ;;  %v1949_v0 = vpop.eup %1948 }
 0x2b8   :  { %v736_v57 = vmul.f32 %v1949_v0, %v735_v61 }
 0x2ba   :  { %v2594_v10 = vadd.f32 %v1947_v7, %v736_v57 }
 0x2bc   :  { %v744_v60 = vpack.c.bf16 %v2594_v10, %v2594_v10 }
 0x2be   :  { %778 = vmatmul.mubr.bf16.vlgmr.msra.gmra.mrb[24].mxu0 %v744_v60  ;;  %1746 = vmatmul.mubr.bf16.vlgmr.msra.gmra.mrb[16].mxu1 %v744_v60 }
 0x2bf   :  { %855 = vmatpush1.bf16.msra.mxu0 %v2372_v17  ;;  %1750 = vmatpush3.bf16.msra.mxu1 %v2394_v31 }
 0x2c0   :  { %856 = vmatprep.subr.bf16.mxu0 %v2377_v21  ;;  %1751 = vmatprep.subr.bf16.mxu1 %v2841_v8 }
 0x2c1   :  { %886 = vmatprep.mubr.bf16.mxu0 %v2842_v37  ;;  %1765 = vmatprep.mubr.msk.bf16.mxu1 %vm2229_vm2, %v2841_v8 }
 0x2c3   :  { %857 = vmatpush1.bf16.msra.mxu0 %v2382_v26  ;;  %1752 = vmatpush3.bf16.msra.mxu1 %v2399_v34 }
 0x2c4   :  { %858 = vmatprep.subr.bf16.mxu0 %v2386_v28  ;;  %1753 = vmatprep.subr.bf16.mxu1 %v2841_v8 }
 0x2c7   :  { %859 = vmatpush1.bf16.msra.mxu0 %v2389_v29  ;;  %1754 = vmatpush3.bf16.msra.mxu1 %v2411_v38 }
 0x2c8   :  { %860 = vmatprep.subr.bf16.mxu0 %v2392_v30  ;;  %1755 = vmatprep.subr.bf16.mxu1 %v2841_v8 }
 0x2cb   :  { %861 = vmatpush1.bf16.msra.mxu0 %v2403_v35  ;;  %1756 = vmatpush3.bf16.msra.mxu1 %v2419_v41 }
 0x2cc   :  { %862 = vmatprep.subr.bf16.mxu0 %v2407_v36  ;;  %1757 = vmatprep.subr.bf16.mxu1 %v2841_v8 }
 0x2cf   :  { %863 = vmatpush1.bf16.msra.mxu0 %v2413_v39  ;;  %1758 = vmatpush3.bf16.msra.mxu1 %v2436_v44 }
 0x2d0   :  { %864 = vmatprep.subr.bf16.mxu0 %v2417_v40  ;;  %1759 = vmatprep.subr.bf16.mxu1 %v2841_v8 }
 0x2d3   :  { %865 = vmatpush1.bf16.msra.mxu0 %v2426_v42  ;;  %1760 = vmatpush3.bf16.msra.mxu1 %v2446_v47 }
 0x2d4   :  { %866 = vmatprep.subr.bf16.mxu0 %v2433_v43  ;;  %1761 = vmatprep.subr.bf16.mxu1 %v2841_v8 }
 0x2d7   :  { %867 = vmatpush1.bf16.msra.mxu0 %v2440_v45  ;;  %1762 = vmatpush3.bf16.msra.mxu1 %v2456_v49 }
 0x2d8   :  { %868 = vmatprep.subr.bf16.mxu0 %v2443_v46  ;;  %1763 = vmatprep.subr.bf16.mxu1 %v2841_v8 }
 0x2db   :  { %869 = vmatpush1.bf16.msra.mxu0 %v2451_v48  ;;  %1764 = vmatpush3.bf16.msra.mxu1 %v2461_v50 }
 0x2dc   :  { %963 = vmatprep.subr.bf16.mxu0 %v2368_v15  ;;  %1769 = vmatprep.subr.bf16.mxu1 %v2841_v8 }
 0x391   :  { %v779_v11 = vpop.f32.mrb[24].mxu0  ;;  %v820_v51 = vpop.f32.mrb[16].mxu1 }
 0x392   :  { %v826_v55 = vadd.f32 %v779_v11, %v2515_v13  ;;  %v781_v58 = vpop.f32.mrb[25].mxu0  ;;  %v1747_v62 = vpop.f32.mrb[17].mxu1  ;;  %v840_v7 = vadd.f32 %v2547_v56, %v820_v51 }
 0x393   :  { %v833_v18 = vadd.f32 %v781_v58, %v2517_v16  ;;  %v783_v22 = vpop.f32.mrb[26].mxu0  ;;  %v823_v27 = vpop.f32.mrb[18].mxu1 }
 0x394   :  { %v1572_v33 = vmul.f32 -1.442695, %v826_v55  ;;  %v784_v3 = vpop.f32.mrb[27].mxu0  ;;  %v1748_v24 = vpop.f32.mrb[19].mxu1 }
 0x395   :  { %v1573_v25 = vmul.f32 -1.442695, %v833_v18 }
 0x396   :  { %1950 = vpow2.f32 %v1572_v33 }
 0x397   :  { %1952 = vpow2.f32 %v1573_v25 }
 0x3a0   :  { %v1951_v1 = vpop.eup %1950 }
 0x3a1   :  { %v830_v53 = vadd.f32 1.0, %v1951_v1  ;;  %v1953_v6 = vpop.eup %1952 }
 0x3a2   :  { %v837_v57 = vadd.f32 1.0, %v1953_v6 }
 0x3a3   :  { %1954 = vrcp.f32 %v830_v53 }
 0x3ad   :  { %v1955_v61 = vpop.eup %1954 }
 0x3ae   :  { %v841_v13 = vmul.f32 %v1955_v61, %v840_v7 }
 0x3b0   :  { %v842_v0 = vadd.f32 %v841_v13, %v2507_v5 }
 0x3b2   :  { %1956 = vtanh.f32 %v842_v0 }
 0x3b3   :  { %1958 = vrcp.f32 %v837_v57 }
 0x3bc   :  { %v1957_v16 = vpop.eup %1956 }
 0x3bd   :  { %v844_v60 = vsub.f32 %v2594_v10, %v1957_v16  ;;  %v1959_v11 = vpop.eup %1958 }
 0x3bf   :  { %v845_v55 = vmul.f32 %v1959_v11, %v844_v60 }
 0x3c1   :  { %v2638_v58 = vadd.f32 %v1957_v16, %v845_v55 }
 0x3c3   :  { %v853_v62 = vpack.c.bf16 %v2638_v58, %v2638_v58 }
 0x3c5   :  { %887 = vmatmul.mubr.bf16.vlgmr.msra.gmra.mrb[28].mxu0 %v853_v62  ;;  %1766 = vmatmul.mubr.bf16.vlgmr.msra.gmra.mrb[20].mxu1 %v853_v62 }
 0x3c6   :  { %964 = vmatpush1.bf16.msra.mxu0 %v2372_v17  ;;  %1770 = vmatpush3.bf16.msra.mxu1 %v2394_v31 }
 0x3c7   :  { %965 = vmatprep.subr.bf16.mxu0 %v2377_v21  ;;  %1771 = vmatprep.subr.bf16.mxu1 %v2841_v8 }
 0x3c8   :  { %995 = vmatprep.mubr.bf16.mxu0 %v2842_v37  ;;  %1785 = vmatprep.mubr.msk.bf16.mxu1 %vm2229_vm2, %v2841_v8 }
 0x3ca   :  { %966 = vmatpush1.bf16.msra.mxu0 %v2382_v26  ;;  %1772 = vmatpush3.bf16.msra.mxu1 %v2399_v34 }
 0x3cb   :  { %967 = vmatprep.subr.bf16.mxu0 %v2386_v28  ;;  %1773 = vmatprep.subr.bf16.mxu1 %v2841_v8 }
 0x3ce   :  { %968 = vmatpush1.bf16.msra.mxu0 %v2389_v29  ;;  %1774 = vmatpush3.bf16.msra.mxu1 %v2411_v38 }
 0x3cf   :  { %969 = vmatprep.subr.bf16.mxu0 %v2392_v30  ;;  %1775 = vmatprep.subr.bf16.mxu1 %v2841_v8 }
 0x3d2   :  { %970 = vmatpush1.bf16.msra.mxu0 %v2403_v35  ;;  %1776 = vmatpush3.bf16.msra.mxu1 %v2419_v41 }
 0x3d3   :  { %971 = vmatprep.subr.bf16.mxu0 %v2407_v36  ;;  %1777 = vmatprep.subr.bf16.mxu1 %v2841_v8 }
 0x3d6   :  { %972 = vmatpush1.bf16.msra.mxu0 %v2413_v39  ;;  %1778 = vmatpush3.bf16.msra.mxu1 %v2436_v44 }
 0x3d7   :  { %973 = vmatprep.subr.bf16.mxu0 %v2417_v40  ;;  %1779 = vmatprep.subr.bf16.mxu1 %v2841_v8 }
 0x3da   :  { %974 = vmatpush1.bf16.msra.mxu0 %v2426_v42  ;;  %1780 = vmatpush3.bf16.msra.mxu1 %v2446_v47 }
 0x3db   :  { %975 = vmatprep.subr.bf16.mxu0 %v2433_v43  ;;  %1781 = vmatprep.subr.bf16.mxu1 %v2841_v8 }
 0x3de   :  { %976 = vmatpush1.bf16.msra.mxu0 %v2440_v45  ;;  %1782 = vmatpush3.bf16.msra.mxu1 %v2456_v49 }
 0x3df   :  { %977 = vmatprep.subr.bf16.mxu0 %v2443_v46  ;;  %1783 = vmatprep.subr.bf16.mxu1 %v2841_v8 }
 0x3e2   :  { %978 = vmatpush1.bf16.msra.mxu0 %v2451_v48  ;;  %1784 = vmatpush3.bf16.msra.mxu1 %v2461_v50 }
 0x3e3   :  { %1072 = vmatprep.subr.bf16.mxu0 %v2368_v15  ;;  %1789 = vmatprep.subr.bf16.mxu1 %v2841_v8 }
 0x498   :  { %v888_v5 = vpop.f32.mrb[28].mxu0  ;;  %v929_v10 = vpop.f32.mrb[20].mxu1 }
 0x499   :  { %v935_v51 = vadd.f32 %v888_v5, %v2519_v19  ;;  %v890_v18 = vpop.f32.mrb[29].mxu0  ;;  %v1767_v22 = vpop.f32.mrb[21].mxu1  ;;  %v949_v13 = vadd.f32 %v2547_v56, %v929_v10 }
 0x49a   :  { %v942_v27 = vadd.f32 %v890_v18, %v2521_v23  ;;  %v892_v33 = vpop.f32.mrb[30].mxu0  ;;  %v932_v3 = vpop.f32.mrb[22].mxu1 }
 0x49b   :  { %v1574_v24 = vmul.f32 -1.442695, %v935_v51  ;;  %v893_v25 = vpop.f32.mrb[31].mxu0  ;;  %v1768_v1 = vpop.f32.mrb[23].mxu1 }
 0x49c   :  { %v1575_v53 = vmul.f32 -1.442695, %v942_v27 }
 0x49d   :  { %1960 = vpow2.f32 %v1574_v24 }
 0x49e   :  { %1962 = vpow2.f32 %v1575_v53 }
 0x4a7   :  { %v1961_v6 = vpop.eup %1960 }
 0x4a8   :  { %v939_v7 = vadd.f32 1.0, %v1961_v6  ;;  %v1963_v61 = vpop.eup %1962 }
 0x4a9   :  { %v946_v16 = vadd.f32 1.0, %v1963_v61 }
 0x4aa   :  { %1964 = vrcp.f32 %v939_v7 }
 0x4b4   :  { %v1965_v0 = vpop.eup %1964 }
 0x4b5   :  { %v950_v19 = vmul.f32 %v1965_v0, %v949_v13 }
 0x4b7   :  { %v951_v57 = vadd.f32 %v950_v19, %v2511_v4 }
 0x4b9   :  { %1966 = vtanh.f32 %v951_v57 }
 0x4ba   :  { %1968 = vrcp.f32 %v946_v16 }
 0x4c3   :  { %v1967_v23 = vpop.eup %1966 }
 0x4c4   :  { %v953_v60 = vsub.f32 %v2638_v58, %v1967_v23  ;;  %v1969_v11 = vpop.eup %1968 }
 0x4c6   :  { %v954_v55 = vmul.f32 %v1969_v11, %v953_v60 }
 0x4c8   :  { %v2682_v62 = vadd.f32 %v1967_v23, %v954_v55  ;;  %v2730_v23 = vld [vmem:[#allocation10] ss:$12 sps:$4 sm:$0xff]  }
 0x4ca   :  { %v962_v5 = vpack.c.bf16 %v2682_v62, %v2682_v62 }
 0x4cc   :  { %996 = vmatmul.mubr.bf16.vlgmr.msra.gmra.mrb[32].mxu0 %v962_v5  ;;  %1786 = vmatmul.mubr.bf16.vlgmr.msra.gmra.mrb[24].mxu1 %v962_v5 }
 0x4cd   :  { %1073 = vmatpush1.bf16.msra.mxu0 %v2372_v17  ;;  %1790 = vmatpush3.bf16.msra.mxu1 %v2394_v31 }
 0x4ce   :  { %1074 = vmatprep.subr.bf16.mxu0 %v2377_v21  ;;  %1791 = vmatprep.subr.bf16.mxu1 %v2841_v8 }
 0x4cf   :  { %1104 = vmatprep.mubr.bf16.mxu0 %v2842_v37  ;;  %1805 = vmatprep.mubr.msk.bf16.mxu1 %vm2229_vm2, %v2841_v8 }
 0x4d1   :  { %1075 = vmatpush1.bf16.msra.mxu0 %v2382_v26  ;;  %1792 = vmatpush3.bf16.msra.mxu1 %v2399_v34 }
 0x4d2   :  { %1076 = vmatprep.subr.bf16.mxu0 %v2386_v28  ;;  %1793 = vmatprep.subr.bf16.mxu1 %v2841_v8 }
 0x4d5   :  { %1077 = vmatpush1.bf16.msra.mxu0 %v2389_v29  ;;  %1794 = vmatpush3.bf16.msra.mxu1 %v2411_v38 }
 0x4d6   :  { %1078 = vmatprep.subr.bf16.mxu0 %v2392_v30  ;;  %1795 = vmatprep.subr.bf16.mxu1 %v2841_v8 }
 0x4d9   :  { %1079 = vmatpush1.bf16.msra.mxu0 %v2403_v35  ;;  %1796 = vmatpush3.bf16.msra.mxu1 %v2419_v41 }
 0x4da   :  { %1080 = vmatprep.subr.bf16.mxu0 %v2407_v36  ;;  %1797 = vmatprep.subr.bf16.mxu1 %v2841_v8 }
 0x4dd   :  { %1081 = vmatpush1.bf16.msra.mxu0 %v2413_v39  ;;  %1798 = vmatpush3.bf16.msra.mxu1 %v2436_v44 }
 0x4de   :  { %1082 = vmatprep.subr.bf16.mxu0 %v2417_v40  ;;  %1799 = vmatprep.subr.bf16.mxu1 %v2841_v8 }
 0x4e1   :  { %1083 = vmatpush1.bf16.msra.mxu0 %v2426_v42  ;;  %1800 = vmatpush3.bf16.msra.mxu1 %v2446_v47 }
 0x4e2   :  { %1084 = vmatprep.subr.bf16.mxu0 %v2433_v43  ;;  %1801 = vmatprep.subr.bf16.mxu1 %v2841_v8 }
 0x4e5   :  { %1085 = vmatpush1.bf16.msra.mxu0 %v2440_v45  ;;  %1802 = vmatpush3.bf16.msra.mxu1 %v2456_v49 }
 0x4e6   :  { %1086 = vmatprep.subr.bf16.mxu0 %v2443_v46  ;;  %1803 = vmatprep.subr.bf16.mxu1 %v2841_v8 }
 0x4e9   :  { %1087 = vmatpush1.bf16.msra.mxu0 %v2451_v48  ;;  %1804 = vmatpush3.bf16.msra.mxu1 %v2461_v50 }
 0x4ea   :  { %1181 = vmatprep.subr.bf16.mxu0 %v2368_v15  ;;  %1809 = vmatprep.subr.bf16.mxu1 %v2841_v8 }
 0x59f   :  { %v997_v17 = vpop.f32.mrb[32].mxu0  ;;  %v1038_v21 = vpop.f32.mrb[24].mxu1 }
 0x5a0   :  { %v1044_v4 = vadd.f32 %v997_v17, %v2531_v54  ;;  %v999_v58 = vpop.f32.mrb[33].mxu0  ;;  %v1787_v10 = vpop.f32.mrb[25].mxu1  ;;  %v1058_v53 = vadd.f32 %v2547_v56, %v1038_v21 }
 0x5a1   :  { %v1051_v51 = vadd.f32 %v999_v58, %v2533_v59  ;;  %v1001_v18 = vpop.f32.mrb[34].mxu0  ;;  %v1041_v22 = vpop.f32.mrb[26].mxu1 }
 0x5a2   :  { %v1576_v27 = vmul.f32 -1.442695, %v1044_v4  ;;  %v1002_v33 = vpop.f32.mrb[35].mxu0  ;;  %v1788_v3 = vpop.f32.mrb[27].mxu1  ;;  %v2013_v18 = vld [vmem:[#allocation10 + $0x8] ss:$12 sps:$4 sm:$0xff]  }
 0x5a3   :  { %v1577_v24 = vmul.f32 -1.442695, %v1051_v51  ;;  %v2015_v22 = vld [vmem:[#allocation10 + $0x20] ss:$12 sps:$4 sm:$0xff]   ;;  %v2017_v33 = vld [vmem:[#allocation10 + $0x30] ss:$12 sps:$4 sm:$0xff]  }
 0x5a4   :  { %1970 = vpow2.f32 %v1576_v27  ;;  %v2016_v27 = vld [vmem:[#allocation10 + $0x34] ss:$12 sps:$4 sm:$0xff]   ;;  %v2018_v3 = vld [vmem:[#allocation10 + $0x38] ss:$12 sps:$4 sm:$0xff]  }
 0x5a5   :  { %1972 = vpow2.f32 %v1577_v24  ;;  %v2019_v24 = vld [vmem:[#allocation10 + $0x4c] ss:$12 sps:$4 sm:$0xff]  }
 0x5ae   :  { %v1971_v25 = vpop.eup %1970 }
 0x5af   :  { %v1048_v1 = vadd.f32 1.0, %v1971_v25  ;;  %v1973_v15 = vpop.eup %1972  ;;  %v2021_v25 = vld [vmem:[#allocation10 + $0x50] ss:$12 sps:$4 sm:$0xff]  }
 0x5b0   :  { %v1055_v61 = vadd.f32 1.0, %v1973_v15  ;;  %v2023_v15 = vld [vmem:[#allocation10 + $0x60] ss:$12 sps:$4 sm:$0xff]  }
 0x5b1   :  { %1974 = vrcp.f32 %v1048_v1  ;;  %v2022_v1 = vld [vmem:[#allocation10 + $0x64] ss:$12 sps:$4 sm:$0xff]  }
 0x5bb   :  { %v1975_v6 = vpop.eup %1974 }
 0x5bc   :  { %v1059_v54 = vmul.f32 %v1975_v6, %v1058_v53  ;;  %v2024_v53 = vld [vmem:[#allocation10 + $0x7c] ss:$12 sps:$4 sm:$0xff]   ;;  %v2025_v6 = vld [vmem:[#allocation10 + $0x78] ss:$12 sps:$4 sm:$0xff]  }
 0x5be   :  { %v1060_v7 = vadd.f32 %v1059_v54, %v2525_v32  ;;  %v2734_v32 = vld [vmem:[#allocation10 + $0x1c] ss:$12 sps:$4 sm:$0xff]   ;;  %v2026_v54 = vld [vmem:[#allocation10 + $0x94] ss:$12 sps:$4 sm:$0xff]  }
 0x5c0   :  { %1976 = vtanh.f32 %v1060_v7 }
 0x5c1   :  { %1978 = vrcp.f32 %v1055_v61 }
 0x5ca   :  { %v1977_v59 = vpop.eup %1976 }
 0x5cb   :  { %v1062_v13 = vsub.f32 %v2682_v62, %v1977_v59  ;;  %v1979_v0 = vpop.eup %1978 }
 0x5cd   :  { %v1063_v19 = vmul.f32 %v1979_v0, %v1062_v13 }
 0x5cf   :  { %v2726_v57 = vadd.f32 %v1977_v59, %v1063_v19 }
 0x5d1   :  { %v1071_v16 = vpack.c.bf16 %v2726_v57, %v2726_v57 }
 0x5d3   :  { %1105 = vmatmul.mubr.bf16.vlgmr.msra.gmra.mrb[36].mxu0 %v1071_v16  ;;  %1806 = vmatmul.mubr.bf16.vlgmr.msra.gmra.mrb[28].mxu1 %v1071_v16 }
 0x5d4   :  { %1182 = vmatpush1.bf16.msra.mxu0 %v2730_v23  ;;  %1810 = vmatpush3.bf16.msra.mxu1 %v2394_v31 }
 0x5d5   :  { %1183 = vmatprep.subr.bf16.mxu0 %v2734_v32  ;;  %1811 = vmatprep.subr.bf16.mxu1 %v2841_v8 }
 0x5d6   :  { %1213 = vmatprep.mubr.bf16.mxu0 %v2842_v37  ;;  %1825 = vmatprep.mubr.msk.bf16.mxu1 %vm2229_vm2, %v2841_v8 }
 0x5d8   :  { %1184 = vmatpush1.bf16.msra.mxu0 %v2382_v26  ;;  %1812 = vmatpush3.bf16.msra.mxu1 %v2399_v34  ;;  %v2012_v26 = vld [vmem:[#allocation10 + $0x4] ss:$12 sps:$4 sm:$0xff]  }
 0x5d9   :  { %1185 = vmatprep.subr.bf16.mxu0 %v2386_v28  ;;  %1813 = vmatprep.subr.bf16.mxu1 %v2841_v8 }
 0x5dc   :  { %1186 = vmatpush1.bf16.msra.mxu0 %v2389_v29  ;;  %1814 = vmatpush3.bf16.msra.mxu1 %v2411_v38 }
 0x5dd   :  { %1187 = vmatprep.subr.bf16.mxu0 %v2392_v30  ;;  %1815 = vmatprep.subr.bf16.mxu1 %v2841_v8 }
 0x5e0   :  { %1188 = vmatpush1.bf16.msra.mxu0 %v2403_v35  ;;  %1816 = vmatpush3.bf16.msra.mxu1 %v2419_v41 }
 0x5e1   :  { %1189 = vmatprep.subr.bf16.mxu0 %v2407_v36  ;;  %1817 = vmatprep.subr.bf16.mxu1 %v2841_v8 }
 0x5e4   :  { %1190 = vmatpush1.bf16.msra.mxu0 %v2413_v39  ;;  %1818 = vmatpush3.bf16.msra.mxu1 %v2436_v44 }
 0x5e5   :  { %1191 = vmatprep.subr.bf16.mxu0 %v2417_v40  ;;  %1819 = vmatprep.subr.bf16.mxu1 %v2841_v8 }
 0x5e8   :  { %1192 = vmatpush1.bf16.msra.mxu0 %v2426_v42  ;;  %1820 = vmatpush3.bf16.msra.mxu1 %v2446_v47 }
 0x5e9   :  { %1193 = vmatprep.subr.bf16.mxu0 %v2433_v43  ;;  %1821 = vmatprep.subr.bf16.mxu1 %v2841_v8 }
 0x5ec   :  { %1194 = vmatpush1.bf16.msra.mxu0 %v2440_v45  ;;  %1822 = vmatpush3.bf16.msra.mxu1 %v2456_v49 }
 0x5ed   :  { %1195 = vmatprep.subr.bf16.mxu0 %v2443_v46  ;;  %1823 = vmatprep.subr.bf16.mxu1 %v2841_v8 }
 0x5f0   :  { %1196 = vmatpush1.bf16.msra.mxu0 %v2451_v48  ;;  %1824 = vmatpush3.bf16.msra.mxu1 %v2461_v50 }
 0x5f1   :  { %1290 = vmatprep.subr.bf16.mxu0 %v2012_v26  ;;  %1829 = vmatprep.subr.bf16.mxu1 %v2841_v8  ;;  %v2843_v26 = vld [vmem:[#allocation22_spill] sm:$0xff] }
 0x6a6   :  { %v1106_v28 = vpop.f32.mrb[36].mxu0  ;;  %v1147_v29 = vpop.f32.mrb[28].mxu1 }
 0x6a7   :  { %v1153_v30 = vadd.f32 %v1106_v28, %v2535_v63  ;;  %v1108_v31 = vpop.f32.mrb[37].mxu0  ;;  %v1807_v34 = vpop.f32.mrb[29].mxu1  ;;  %v1167_v55 = vadd.f32 %v2547_v56, %v1147_v29 }
 0x6a8   :  { %v1160_v35 = vadd.f32 %v1108_v31, %v2537_v2  ;;  %v1110_v36 = vpop.f32.mrb[38].mxu0  ;;  %v1150_v38 = vpop.f32.mrb[30].mxu1 }
 0x6a9   :  { %v1578_v39 = vmul.f32 -1.442695, %v1153_v30  ;;  %v1111_v40 = vpop.f32.mrb[39].mxu0  ;;  %v1808_v41 = vpop.f32.mrb[31].mxu1  ;;  %v1922_v38 = vld [vmem:[#allocation13] sm:$0xff]  }
 0x6aa   :  { %v1579_v42 = vmul.f32 -1.442695, %v1160_v35  ;;  %v1924_v40 = vld [vmem:[#allocation13 + $0x10] sm:$0xff]   ;;  %v1925_v41 = vld [vmem:[#allocation13 + $0x18] sm:$0xff]  }
 0x6ab   :  { %1980 = vpow2.f32 %v1578_v39  ;;  %v1923_v39 = vld [vmem:[#allocation13 + $0x8] sm:$0xff]  }
 0x6ac   :  { %1982 = vpow2.f32 %v1579_v42  ;;  %v1926_v42 = vld [vmem:[#allocation13 + $0x20] sm:$0xff]  }
 0x6b5   :  { %v1981_v43 = vpop.eup %1980 }
 0x6b6   :  { %v1157_v60 = vadd.f32 1.0, %v1981_v43  ;;  %v1983_v11 = vpop.eup %1982  ;;  %v1927_v43 = vld [vmem:[#allocation13 + $0x28] sm:$0xff]  }
 0x6b7   :  { %v1164_v17 = vadd.f32 1.0, %v1983_v11  ;;  %v1929_v11 = vld [vmem:[#allocation13 + $0x38] sm:$0xff]  }
 0x6b8   :  { %1984 = vrcp.f32 %v1157_v60  ;;  %v1928_v60 = vld [vmem:[#allocation13 + $0x30] sm:$0xff]  }
 0x6c2   :  { %v1985_v62 = vpop.eup %1984 }
 0x6c3   :  { %v1168_v63 = vmul.f32 %v1985_v62, %v1167_v55 }
 0x6c5   :  { %v1169_v5 = vadd.f32 %v1168_v63, %v2529_v52  ;;  %v2014_v52 = vld [vmem:[#allocation10 + $0x18] ss:$12 sps:$4 sm:$0xff]  }
 0x6c7   :  { %1986 = vtanh.f32 %v1169_v5 }
 0x6c8   :  { %1988 = vrcp.f32 %v1164_v17 }
 0x6d1   :  { %v1987_v2 = vpop.eup %1986 }
 0x6d2   :  { %v1171_v21 = vsub.f32 %v2726_v57, %v1987_v2  ;;  %v1989_v4 = vpop.eup %1988 }
 0x6d4   :  { %v1172_v58 = vmul.f32 %v1989_v4, %v1171_v21 }
 0x6d6   :  { %v2773_v10 = vadd.f32 %v1987_v2, %v1172_v58 }
 0x6d8   :  { %v1180_v51 = vpack.c.bf16 %v2773_v10, %v2773_v10 }
 0x6da   :  { %1214 = vmatmul.mubr.bf16.vlgmr.msra.gmra.mrb[40].mxu0 %v1180_v51  ;;  %1826 = vmatmul.mubr.bf16.vlgmr.msra.gmra.mrb[32].mxu1 %v1180_v51 }
 0x6db   :  { %1291 = vmatpush1.bf16.msra.mxu0 %v2730_v23  ;;  %1830 = vmatpush3.bf16.msra.mxu1 %v2013_v18 }
 0x6dc   :  { %1292 = vmatprep.subr.bf16.mxu0 %v2734_v32  ;;  %1831 = vmatprep.subr.bf16.mxu1 %v2841_v8 }
 0x6dd   :  { %1322 = vmatprep.mubr.bf16.mxu0 %v2842_v37  ;;  %1845 = vmatprep.mubr.msk.bf16.mxu1 %vm2229_vm2, %v2841_v8  ;;  %v2020_v37 = vld [vmem:[#allocation10 + $0x48] ss:$12 sps:$4 sm:$0xff]  }
 0x6df   :  { %1293 = vmatpush1.bf16.msra.mxu0 %v2014_v52  ;;  %1832 = vmatpush3.bf16.msra.mxu1 %v2015_v22 }
 0x6e0   :  { %1294 = vmatprep.subr.bf16.mxu0 %v2016_v27  ;;  %1833 = vmatprep.subr.bf16.mxu1 %v2841_v8 }
 0x6e3   :  { %1295 = vmatpush1.bf16.msra.mxu0 %v2017_v33  ;;  %1834 = vmatpush3.bf16.msra.mxu1 %v2018_v3  ;;  %v2844_v3 = vld [vmem:[#allocation23_spill] sm:$0xff] }
 0x6e4   :  { %1296 = vmatprep.subr.bf16.mxu0 %v2019_v24  ;;  %1835 = vmatprep.subr.bf16.mxu1 %v2841_v8 }
 0x6e7   :  { %1297 = vmatpush1.bf16.msra.mxu0 %v2020_v37  ;;  %1836 = vmatpush3.bf16.msra.mxu1 %v2021_v25 }
 0x6e8   :  { %1298 = vmatprep.subr.bf16.mxu0 %v2022_v1  ;;  %1837 = vmatprep.subr.bf16.mxu1 %v2841_v8 }
 0x6eb   :  { %1299 = vmatpush1.bf16.msra.mxu0 %v2023_v15  ;;  %1838 = vmatpush3.bf16.msra.mxu1 %v2436_v44 }
 0x6ec   :  { %1300 = vmatprep.subr.bf16.mxu0 %v2024_v53  ;;  %1839 = vmatprep.subr.bf16.mxu1 %v2841_v8 }
 0x6ef   :  { %1301 = vmatpush1.bf16.msra.mxu0 %v2025_v6  ;;  %1840 = vmatpush3.bf16.msra.mxu1 %v2446_v47 }
 0x6f0   :  { %1302 = vmatprep.subr.bf16.mxu0 %v2026_v54  ;;  %1841 = vmatprep.subr.bf16.mxu1 %v2841_v8  ;;  %v1584_v54 = vld [vmem:[#allocation15] ss:$0 sm:$0xff] }
 0x6f3   :  { %1303 = vmatpush1.bf16.msra.mxu0 %v2440_v45  ;;  %1842 = vmatpush3.bf16.msra.mxu1 %v2456_v49 }
 0x6f4   :  { %1304 = vmatprep.subr.bf16.mxu0 %v2443_v46  ;;  %1843 = vmatprep.subr.bf16.mxu1 %v2841_v8 }
 0x6f7   :  { %1305 = vmatpush1.bf16.msra.mxu0 %v2451_v48  ;;  %1844 = vmatpush3.bf16.msra.mxu1 %v2461_v50 }
 0x6f8   :  { %1849 = vmatprep.subr.bf16.mxu0 %v2841_v8 }
 0x7ad   :  { %v1215_v44 = vpop.f32.mrb[40].mxu0  ;;  %v1256_v47 = vpop.f32.mrb[32].mxu1 }
 0x7ae   :  { %v1262_v7 = vadd.f32 %v1215_v44, %v2539_v9  ;;  %v1217_v61 = vpop.f32.mrb[41].mxu0  ;;  %v1827_v59 = vpop.f32.mrb[33].mxu1  ;;  %v1276_v23 = vadd.f32 %v2547_v56, %v1256_v47 }
 0x7af   :  { %v1269_v45 = vadd.f32 %v1217_v61, %v2541_v12  ;;  %v1219_v13 = vpop.f32.mrb[42].mxu0  ;;  %v1259_v49 = vpop.f32.mrb[34].mxu1 }
 0x7b0   :  { %v1580_v0 = vmul.f32 -1.442695, %v1262_v7  ;;  %v1220_v46 = vpop.f32.mrb[43].mxu0  ;;  %v1828_v19 = vpop.f32.mrb[35].mxu1 }
 0x7b1   :  { %v1581_v57 = vmul.f32 -1.442695, %v1269_v45 }
 0x7b2   :  { %1990 = vpow2.f32 %v1580_v0 }
 0x7b3   :  { %1992 = vpow2.f32 %v1581_v57 }
 0x7bc   :  { %v1991_v48 = vpop.eup %1990 }
 0x7bd   :  { %v1266_v16 = vadd.f32 1.0, %v1991_v48  ;;  %v1993_v50 = vpop.eup %1992 }
 0x7be   :  { %v1273_v29 = vadd.f32 1.0, %v1993_v50 }
 0x7bf   :  { %1994 = vrcp.f32 %v1266_v16 }
 0x7c9   :  { %v1995_v32 = vpop.eup %1994 }
 0x7ca   :  { %v1277_v9 = vmul.f32 %v1995_v32, %v1276_v23 }
 0x7cc   :  { %v1278_v28 = vadd.f32 %v1277_v9, %v2843_v26 }
 0x7ce   :  { %1996 = vtanh.f32 %v1278_v28 }
 0x7cf   :  { %1998 = vrcp.f32 %v1273_v29 }
 0x7d8   :  { %v1997_v12 = vpop.eup %1996 }
 0x7d9   :  { %v1280_v30 = vsub.f32 %v2773_v10, %v1997_v12  ;;  %v1999_v31 = vpop.eup %1998 }
 0x7db   :  { %v1281_v34 = vmul.f32 %v1999_v31, %v1280_v30 }
 0x7dd   :  { %v1282_v35 = vadd.f32 %v1997_v12, %v1281_v34 }
 0x7df   :  { %v1289_v36 = vpack.c.bf16 %v1282_v35, %v1282_v35 }
 0x7e1   :  { %1323 = vmatmul.mubr.bf16.vlgmr.msra.gmra.mrb[44].mxu0 %v1289_v36  ;;  %1846 = vmatmul.mubr.bf16.vlgmr.msra.gmra.mrb[36].mxu1 %v1289_v36 }
 0x7e2   :  { %1865 = vmatprep.mubr.msk.bf16.mxu0 %vm2229_vm2, %v2841_v8  ;;  %1850 = vmatpush3.bf16.msra.mxu0 %v1922_v38 }
 0x7e3   :  { %1851 = vmatprep.subr.bf16.mxu0 %v2841_v8 }
 0x7e6   :  { %1852 = vmatpush3.bf16.msra.mxu0 %v1923_v39 }
 0x7e7   :  { %1853 = vmatprep.subr.bf16.mxu0 %v2841_v8 }
 0x7ea   :  { %1854 = vmatpush3.bf16.msra.mxu0 %v1924_v40 }
 0x7eb   :  { %1855 = vmatprep.subr.bf16.mxu0 %v2841_v8 }
 0x7ee   :  { %1856 = vmatpush3.bf16.msra.mxu0 %v1925_v41 }
 0x7ef   :  { %1857 = vmatprep.subr.bf16.mxu0 %v2841_v8 }
 0x7f2   :  { %1858 = vmatpush3.bf16.msra.mxu0 %v1926_v42 }
 0x7f3   :  { %1859 = vmatprep.subr.bf16.mxu0 %v2841_v8 }
 0x7f6   :  { %1860 = vmatpush3.bf16.msra.mxu0 %v1927_v43 }
 0x7f7   :  { %1861 = vmatprep.subr.bf16.mxu0 %v2841_v8 }
 0x7fa   :  { %1862 = vmatpush3.bf16.msra.mxu0 %v1928_v60 }
 0x7fb   :  { %1863 = vmatprep.subr.bf16.mxu0 %v2841_v8 }
 0x7fe   :  { %1864 = vmatpush3.bf16.msra.mxu0 %v1929_v11 }
 0x8b4   :  { %v1324_v55 = vpop.f32.mrb[44].mxu0  ;;  %v1365_v62 = vpop.f32.mrb[36].mxu1 }
 0x8b5   :  { %v1371_v63 = vadd.f32 %v1324_v55, %v2543_v14  ;;  %v1326_v5 = vpop.f32.mrb[45].mxu0  ;;  %v1847_v17 = vpop.f32.mrb[37].mxu1  ;;  %v1385_v27 = vadd.f32 %v2547_v56, %v1365_v62 }
 0x8b6   :  { %v1378_v2 = vadd.f32 %v1326_v5, %v2545_v20  ;;  %v1328_v21 = vpop.f32.mrb[46].mxu0  ;;  %v1368_v4 = vpop.f32.mrb[38].mxu1 }
 0x8b7   :  { %v1582_v58 = vmul.f32 -1.442695, %v1371_v63  ;;  %v1329_v10 = vpop.f32.mrb[47].mxu0  ;;  %v1848_v51 = vpop.f32.mrb[39].mxu1 }
 0x8b8   :  { %v1583_v18 = vmul.f32 -1.442695, %v1378_v2 }
 0x8b9   :  { %2000 = vpow2.f32 %v1582_v58 }
 0x8ba   :  { %2002 = vpow2.f32 %v1583_v18 }
 0x8c3   :  { %v2001_v52 = vpop.eup %2000 }
 0x8c4   :  { %v1375_v22 = vadd.f32 1.0, %v2001_v52  ;;  %v2003_v8 = vpop.eup %2002 }
 0x8c5   :  { %v1382_v37 = vadd.f32 1.0, %v2003_v8 }
 0x8c6   :  { %2004 = vrcp.f32 %v1375_v22 }
 0x8d0   :  { %v2005_v33 = vpop.eup %2004 }
 0x8d1   :  { %v1386_v14 = vmul.f32 %v2005_v33, %v1385_v27 }
 0x8d3   :  { %v1387_v24 = vadd.f32 %v1386_v14, %v2844_v3 }
 0x8d5   :  { %2006 = vtanh.f32 %v1387_v24 }
 0x8d6   :  { %2008 = vrcp.f32 %v1382_v37 }
 0x8df   :  { %v2007_v20 = vpop.eup %2006 }
 0x8e0   :  { %v1389_v25 = vsub.f32 %v1282_v35, %v2007_v20  ;;  %v2009_v1 = vpop.eup %2008 }
 0x8e2   :  { %v1390_v15 = vmul.f32 %v2009_v1, %v1389_v25 }
 0x8e4   :  { %v1391_v53 = vadd.f32 %v2007_v20, %v1390_v15 }
 0x8e6   :  { %v1396_v6 = vpack.c.bf16 %v1391_v53, %v1391_v53 }
 0x8e8   :  { %1866 = vmatmul.mubr.bf16.vlgmr.msra.gmra.mrb[48].mxu0 %v1396_v6 }
 0x9bb   :  { %v1502_v44 = vpop.f32.mrb[48].mxu0 }
 0x9bc   :  { %v1503_v47 = vadd.f32 %v1584_v54, %v1502_v44  ;;  %v1867_v56 = vpop.f32.mrb[49].mxu0 }
 0x9bd   :  { %v1505_v7 = vpop.f32.mrb[50].mxu0 }
 0x9be   :  { %1508 = vst [vmem:[#allocation16] sm:$0xff] %v1503_v47  ;;  %v1868_v61 = vpop.f32.mrb[51].mxu0 }
 0x9bf   :  { %2192 = shalt.err (!%p2189_p4)
}
 0x9c0   :  { %s2193_s17 = scalar_lea.hbm %s2834_s7, 128 }
 0x9c1   :  { %p2194_p5 = scmp.ne.s32.totalorder %s2834_s7, %s2193_s17  ;;  %p2197_p6 = scmp.lt.u32.totalorder %s2193_s17, %s2834_s7 }
 0x9c3   :  { %p2199_p7 = pnand %p2197_p6, %p2194_p5 }
 0x9c5   :  { %2202 = shalt.err (!%p2199_p7)
}
 0x9c6   :  { %1518 = dma.vmem_to_hbm [thread:$0]  %s1516_s14, 128, %s2834_s7, [#allocation6]  }
 0x9c7   :  { %2211 = dma.done.wait [#allocation6], 128  }
 0x9c8   :  { %2212 = vsyncadd [#allocation6], 4294967168 }
 0x9c9   :  { %1522 = vsyncpa [#allocation5], 1 }
 0x9ca   :  { %1523 = vsyncpa [#allocation8], 1 }
 0x9cb   :  { %1524 = vsyncpa [#allocation11], 1 }
 0x9cc   :  { %1525 = vsyncpa [#allocation14], 1 }
 0x9cd   :  { %1526 = vsyncpa [#allocation6], 1 }

// kernel: tpu_custom_call.1
= control target key start
LH: loop header
LB: loop body
LE: loop exit
PB: predicated region body
PF: predicated region fallthrough
CT: control target
= control target key end

     0   :  { %12 = vsyncpa [#allocation5], 0  ;;  %s2827_s0 = inlined_call_operand.hbm [shape: f32[8,8,4], index: 0, kind: input, shape index: {}]   ;;  %s2828_s1 = inlined_call_operand.hbm [shape: bf16[4,384], index: 1, kind: input, shape index: {}]   ;;  %s2829_s2 = inlined_call_operand.hbm [shape: f32[1,384], index: 2, kind: input, shape index: {}]   ;;  %s2830_s3 = inlined_call_operand.hbm [shape: bf16[128,384], index: 3, kind: input, shape index: {}]   ;;  %s2831_s4 = inlined_call_operand.hbm [shape: f32[1,128], index: 4, kind: input, shape index: {}]   ;;  %s2832_s5 = inlined_call_operand.hbm [shape: bf16[128,128], index: 5, kind: input, shape index: {}]   ;;  %s2833_s6 = inlined_call_operand.hbm [shape: f32[1,128], index: 6, kind: input, shape index: {}]   ;;  %s2834_s7 = inlined_call_operand.hbm [shape: f32[8,128], index: 7, kind: output, shape index: {}]  }
   0x1   :  { %13 = vsyncpa [#allocation8], 0 }
   0x2   :  { %14 = vsyncpa [#allocation11], 0 }
   0x3   :  { %15 = vsyncpa [#allocation14], 0 }
   0x4   :  { %16 = vsyncpa [#allocation6], 0  ;;  %s2213_s24 = smov [#allocation7]   ;;  %s2214_s26 = smov [#allocation10]  }
   0x5   :  { %s35_s25 = sshll.u32 %s2213_s24, 4  ;;  %s54_s27 = sshll.u32 %s2214_s26, 4  ;;  %s36_s25 = int_to_ptr.vmem [resolvable:$true] %s35_s25  ;;  %s2272_s27 = int_to_ptr.vmem [resolvable:$true] %s54_s27 }
   0x6   :  { %s2027_s30 = scalar_lea.hbm %s2828_s1, 96 }
   0x7   :  { %p2028_p0 = scmp.ne.s32.totalorder %s2828_s1, %s2027_s30  ;;  %p2031_p1 = scmp.lt.u32.totalorder %s2027_s30, %s2828_s1 }
   0x9   :  { %p2033_p2 = pnand %p2031_p1, %p2028_p0 }
   0xb   :  { %2036 = shalt.err (!%p2033_p2)
}
   0xc   :  { %s2037_s12 = scalar_lea.vmem %s36_s25, 96  ;;  %p2042_p4 = scmp.lt.s32.totalorder %s36_s25, %s36_s25 }
   0xd   :  { %p2038_p3 = scmp.ne.s32.totalorder %s36_s25, %s2037_s12  ;;  %p2043_p5 = scmp.lt.s32.totalorder %s2037_s12, %s2037_s12 }
   0xf   :  { %p2044_p6 = por %p2043_p5, %p2042_p4 }
  0x11   :  { %p2045_p7 = pnand %p2044_p6, %p2038_p3 }
  0x13   :  { %2048 = shalt.err (!%p2045_p7)
}
  0x14   :  { %38 = dma.hbm_to_vmem [thread:$0]  %s2828_s1, 96, %s36_s25, [#allocation8]  }
  0x15   :  { %s2049_s17 = scalar_lea.hbm %s2830_s3, 3072 }
  0x16   :  { %p2050_p8 = scmp.ne.s32.totalorder %s2830_s3, %s2049_s17  ;;  %p2053_p9 = scmp.lt.u32.totalorder %s2049_s17, %s2830_s3 }
  0x18   :  { %p2055_p10 = pnand %p2053_p9, %p2050_p8 }
  0x1a   :  { %2058 = shalt.err (!%p2055_p10)
}
  0x1b   :  { %s2059_s22 = scalar_lea.vmem %s2272_s27, 3072  ;;  %p2064_p12 = scmp.lt.s32.totalorder %s2272_s27, %s2272_s27 }
  0x1c   :  { %p2060_p11 = scmp.ne.s32.totalorder %s2272_s27, %s2059_s22  ;;  %p2065_p13 = scmp.lt.s32.totalorder %s2059_s22, %s2059_s22 }
  0x1e   :  { %p2066_p0 = por %p2065_p13, %p2064_p12 }
  0x20   :  { %p2067_p1 = pnand %p2066_p0, %p2060_p11 }
  0x22   :  { %2070 = shalt.err (!%p2067_p1)
}
  0x23   :  { %s2215_s1 = smov 192   ;;  %s2216_s23 = smov 12  }
  0x24   :  { %60 = dma.hbm_to_vmem [thread:$0]  %s2830_s3, 3072, %s2272_s27, [#allocation11], %s2215_s1, %s2215_s1, %s2216_s23  }
  0x25   :  { %s2217_s26 = smov [#allocation13]   ;;  %s2071_s8 = scalar_lea.hbm %s2832_s5, 1024 }
  0x26   :  { %s76_s28 = sshll.u32 %s2217_s26, 4  ;;  %p2072_p2 = scmp.ne.s32.totalorder %s2832_s5, %s2071_s8  ;;  %s77_s28 = int_to_ptr.vmem [resolvable:$true] %s76_s28 }
  0x27   :  { %p2075_p3 = scmp.lt.u32.totalorder %s2071_s8, %s2832_s5 }
  0x29   :  { %p2077_p4 = pnand %p2075_p3, %p2072_p2 }
  0x2b   :  { %2080 = shalt.err (!%p2077_p4)
}
  0x2c   :  { %s2081_s13 = scalar_lea.vmem %s77_s28, 1024  ;;  %p2086_p6 = scmp.lt.s32.totalorder %s77_s28, %s77_s28 }
  0x2d   :  { %p2082_p5 = scmp.ne.s32.totalorder %s77_s28, %s2081_s13  ;;  %p2087_p7 = scmp.lt.s32.totalorder %s2081_s13, %s2081_s13 }
  0x2f   :  { %p2088_p8 = por %p2087_p7, %p2086_p6 }
  0x31   :  { %p2089_p9 = pnand %p2088_p8, %p2082_p5 }
  0x33   :  { %2092 = shalt.err (!%p2089_p9)
}
  0x34   :  { %s2218_s3 = smov 64   ;;  %s2219_s27 = smov 4  }
  0x35   :  { %82 = dma.hbm_to_vmem [thread:$0]  %s2832_s5, 1024, %s77_s28, [#allocation14], %s2218_s3, %s2218_s3, %s2219_s27  }
  0x36   :  { %s2220_s16 = smov [#allocation4]   ;;  %s2093_s20 = scalar_lea.hbm %s2827_s0, 1024 }
  0x37   :  { %s22_s17 = sshll.u32 %s2220_s16, 4  ;;  %p2094_p10 = scmp.ne.s32.totalorder %s2827_s0, %s2093_s20  ;;  %s23_s17 = int_to_ptr.vmem [resolvable:$true] %s22_s17 }
  0x38   :  { %p2097_p11 = scmp.lt.u32.totalorder %s2093_s20, %s2827_s0 }
  0x3a   :  { %p2099_p12 = pnand %p2097_p11, %p2094_p10 }
  0x3c   :  { %2102 = shalt.err (!%p2099_p12)
}
  0x3d   :  { %s2103_s24 = scalar_lea.vmem %s23_s17, 1024  ;;  %p2108_p0 = scmp.lt.s32.totalorder %s23_s17, %s23_s17 }
  0x3e   :  { %p2104_p13 = scmp.ne.s32.totalorder %s23_s17, %s2103_s24  ;;  %p2109_p1 = scmp.lt.s32.totalorder %s2103_s24, %s2103_s24 }
  0x40   :  { %p2110_p2 = por %p2109_p1, %p2108_p0 }
  0x42   :  { %p2111_p3 = pnand %p2110_p2, %p2104_p13 }
  0x44   :  { %2114 = shalt.err (!%p2111_p3)
}
  0x45   :  { %s2221_s5 = smov 128   ;;  %s2222_s25 = smov 8  }
  0x46   :  { %28 = dma.hbm_to_vmem [thread:$0]  %s2827_s0, 1024, %s23_s17, [#allocation5], %s2221_s5, %s2221_s5, %s2222_s25  }
  0x47   :  { %s2223_s29 = smov [#allocation9]   ;;  %s2224_s8 = smov [#allocation12]  }
  0x48   :  { %s45_s30 = sshll.u32 %s2223_s29, 4  ;;  %s67_s9 = sshll.u32 %s2224_s8, 4  ;;  %s46_s30 = int_to_ptr.vmem [resolvable:$true] %s45_s30  ;;  %s68_s9 = int_to_ptr.vmem [resolvable:$true] %s67_s9 }
  0x49   :  { %s2115_s12 = scalar_lea.hbm %s2829_s2, 48 }
  0x4a   :  { %p2116_p4 = scmp.ne.s32.totalorder %s2829_s2, %s2115_s12  ;;  %p2119_p5 = scmp.lt.u32.totalorder %s2115_s12, %s2829_s2 }
  0x4c   :  { %p2121_p6 = pnand %p2119_p5, %p2116_p4 }
  0x4e   :  { %2124 = shalt.err (!%p2121_p6)
}
  0x4f   :  { %s2125_s0 = scalar_lea.vmem %s46_s30, 48  ;;  %s2129_s15 = scalar_lea.vmem %s46_s30, 64 }
  0x50   :  { %p2126_p7 = scmp.ne.s32.totalorder %s46_s30, %s2125_s0  ;;  %p2130_p8 = scmp.lt.s32.totalorder %s46_s30, %s46_s30 }
  0x51   :  { %p2131_p9 = scmp.lt.s32.totalorder %s2129_s15, %s2125_s0 }
  0x53   :  { %p2132_p10 = por %p2131_p9, %p2130_p8 }
  0x55   :  { %p2133_p11 = pnand %p2132_p10, %p2126_p7 }
  0x57   :  { %2136 = shalt.err (!%p2133_p11)
}
  0x58   :  { %48 = dma.hbm_to_vmem [thread:$0]  %s2829_s2, 48, %s46_s30, [#allocation8]  }
  0x59   :  { %s2137_s20 = scalar_lea.hbm %s2831_s4, 16 }
  0x5a   :  { %p2138_p12 = scmp.ne.s32.totalorder %s2831_s4, %s2137_s20  ;;  %p2141_p13 = scmp.lt.u32.totalorder %s2137_s20, %s2831_s4 }
  0x5c   :  { %p2143_p0 = pnand %p2141_p13, %p2138_p12 }
  0x5e   :  { %2146 = shalt.err (!%p2143_p0)
}
  0x5f   :  { %s2147_s24 = scalar_lea.vmem %s68_s9, 16  ;;  %s2151_s5 = scalar_lea.vmem %s68_s9, 32 }
  0x60   :  { %p2148_p1 = scmp.ne.s32.totalorder %s68_s9, %s2147_s24  ;;  %p2152_p2 = scmp.lt.s32.totalorder %s68_s9, %s68_s9 }
  0x61   :  { %p2153_p3 = scmp.lt.s32.totalorder %s2151_s5, %s2147_s24 }
  0x63   :  { %p2154_p4 = por %p2153_p3, %p2152_p2 }
  0x65   :  { %p2155_p5 = pnand %p2154_p4, %p2148_p1 }
  0x67   :  { %2158 = shalt.err (!%p2155_p5)
}
  0x68   :  { %70 = dma.hbm_to_vmem [thread:$0]  %s2831_s4, 16, %s68_s9, [#allocation11]  }
  0x69   :  { %s2225_s26 = smov [#allocation15]   ;;  %s2159_s8 = scalar_lea.hbm %s2833_s6, 16 }
  0x6a   :  { %s89_s28 = sshll.u32 %s2225_s26, 4  ;;  %p2160_p6 = scmp.ne.s32.totalorder %s2833_s6, %s2159_s8  ;;  %s90_s28 = int_to_ptr.vmem [resolvable:$true] %s89_s28 }
  0x6b   :  { %p2163_p7 = scmp.lt.u32.totalorder %s2159_s8, %s2833_s6 }
  0x6d   :  { %p2165_p8 = pnand %p2163_p7, %p2160_p6 }
  0x6f   :  { %2168 = shalt.err (!%p2165_p8)
}
  0x70   :  { %s2169_s3 = scalar_lea.vmem %s90_s28, 16  ;;  %s2173_s4 = scalar_lea.vmem %s90_s28, 32 }
  0x71   :  { %p2170_p9 = scmp.ne.s32.totalorder %s90_s28, %s2169_s3  ;;  %p2174_p10 = scmp.lt.s32.totalorder %s90_s28, %s90_s28 }
  0x72   :  { %p2175_p11 = scmp.lt.s32.totalorder %s2173_s4, %s2169_s3 }
  0x74   :  { %p2176_p12 = por %p2175_p11, %p2174_p10 }
  0x76   :  { %p2177_p13 = pnand %p2176_p12, %p2170_p9 }
  0x78   :  { %2180 = shalt.err (!%p2177_p13)
}
  0x79   :  { %92 = dma.hbm_to_vmem [thread:$0]  %s2833_s6, 16, %s90_s28, [#allocation14]  }
  0x7a   :  { %2203 = dma.done.wait [#allocation5], 1024  }
  0x7b   :  { %2204 = vsyncadd [#allocation5], 4294966272 }
  0x7c   :  { %2205 = dma.done.wait [#allocation8], 144  }
  0x7d   :  { %2206 = vsyncadd [#allocation8], 4294967152 }
  0x7e   :  { %2207 = dma.done.wait [#allocation11], 3088  }
  0x7f   :  { %2208 = vsyncadd [#allocation11], 4294964208 }
  0x80   :  { %2209 = dma.done.wait [#allocation14], 1040  }
  0x81   :  { %2210 = vsyncadd [#allocation14], 4294966256  ;;  %v135_v0 = vlaneseq  ;;  %v2226_v1 = vmov 1983009808   ;;  %v2835_v3 = vmov 0   ;;  %vm180_vm0 = vcmask 1041408  }
  0x82   :  { %v153_v2 = vunpack.c.l.s4 %v2226_v1  ;;  %222 = vmatprep.mubr.bf16.mxu0 %v2835_v3  ;;  %v132_v7 = vld [vmem:[#allocation7] sm:$0x3f]  ;;  %v121_v10 = vld [vmem:[#allocation4 + $0x8] sm:$0xff]  ;;  %vm167_vm1 = vcmask 31744   ;;  %v122_v18 = vld [vmem:[#allocation4 + $0x10] sm:$0xff]  ;;  %v2837_v24 = vmov 0.0  }
  0x83   :  { %v2364_v4 = vshrl.u32 %v135_v0, 7  ;;  %v120_v8 = vld [vmem:[#allocation4] sm:$0xff]  ;;  %v151_v12 = vcombine.high %v132_v7, %v132_v7  ;;  %v2368_v15 = vld [vmem:[#allocation10 + $0x4] ss:$12 sps:$4 sm:$0xff]   ;;  %v2372_v17 = vld [vmem:[#allocation10] ss:$12 sps:$4 sm:$0xff]  }
  0x84   :  { %v154_v5 = vunpack.c.0.s8 %v153_v2  ;;  %v128_v11 = vpack.c.bf16 %v121_v10, %v120_v8  ;;  %v123_v19 = vld [vmem:[#allocation4 + $0x18] sm:$0xff]  ;;  %v2377_v21 = vld [vmem:[#allocation10 + $0x1c] ss:$12 sps:$4 sm:$0xff]   ;;  %v2382_v26 = vld [vmem:[#allocation10 + $0x18] ss:$12 sps:$4 sm:$0xff]   ;;  %vm2229_vm2 = vmmov 0  }
  0x85   :  { %v124_v22 = vld [vmem:[#allocation4 + $0x20] sm:$0xff]  ;;  %v125_v23 = vld [vmem:[#allocation4 + $0x28] sm:$0xff]  ;;  %v129_v25 = vpack.c.bf16 %v123_v19, %v122_v18  ;;  %v126_v32 = vld [vmem:[#allocation4 + $0x30] sm:$0xff]  ;;  %v2230_v51 = vmov 0.0|0.0   ;;  %v137_v52 = vsub.s32 0, %v2364_v4  ;;  %v141_v54 = vsub.s32 1, %v2364_v4 }
  0x86   :  { %v157_v6 = vsub.s32 %v154_v5, %v2364_v4  ;;  %1681 = vmatprep.mubr.msk.bf16.mxu1 %vm167_vm1, %v128_v11  ;;  %v130_v27 = vpack.c.bf16 %v125_v23, %v124_v22  ;;  %v2386_v28 = vld [vmem:[#allocation10 + $0x34] ss:$12 sps:$4 sm:$0xff]   ;;  %v2389_v29 = vld [vmem:[#allocation10 + $0x30] ss:$12 sps:$4 sm:$0xff]   ;;  %v2392_v30 = vld [vmem:[#allocation10 + $0x4c] ss:$12 sps:$4 sm:$0xff]  }
  0x87   :  { %v2394_v31 = vld [vmem:[#allocation10 + $0x8] ss:$12 sps:$4 sm:$0xff]   ;;  %v2399_v34 = vld [vmem:[#allocation10 + $0x20] ss:$12 sps:$4 sm:$0xff]   ;;  %v2407_v36 = vld [vmem:[#allocation10 + $0x64] ss:$12 sps:$4 sm:$0xff]  }
  0x88   :  { %v158_v9 = vrot.slane %v132_v7, %v157_v6  ;;  %v165_v16 = vrot.slane %v151_v12, %v157_v6  ;;  %v127_v33 = vld [vmem:[#allocation4 + $0x38] sm:$0xff]  ;;  %v2411_v38 = vld [vmem:[#allocation10 + $0x38] ss:$12 sps:$4 sm:$0xff]   ;;  %v2417_v40 = vld [vmem:[#allocation10 + $0x7c] ss:$12 sps:$4 sm:$0xff]   ;;  %v145_v55 = vsub.s32 2, %v2364_v4 }
  0x89   :  { %v2403_v35 = vld [vmem:[#allocation10 + $0x48] ss:$12 sps:$4 sm:$0xff]   ;;  %v131_v37 = vpack.c.bf16 %v127_v33, %v126_v32  ;;  %v2413_v39 = vld [vmem:[#allocation10 + $0x60] ss:$12 sps:$4 sm:$0xff]   ;;  %v2419_v41 = vld [vmem:[#allocation10 + $0x50] ss:$12 sps:$4 sm:$0xff]  }
  0x8a   :  { %v166_v13 = vcombine.high %v158_v9, %v158_v9  ;;  %v182_v14 = vsel %vm180_vm0, %v158_v9, 0  ;;  %1869 = vmatprep.subr.msk.bf16.mxu1 %vm180_vm0, %v165_v16  ;;  %v188_v20 = vsel %vm180_vm0, %v165_v16, 0  ;;  %v2426_v42 = vld [vmem:[#allocation10 + $0x78] ss:$12 sps:$4 sm:$0xff]   ;;  %v2433_v43 = vld [vmem:[#allocation10 + $0x94] ss:$12 sps:$4 sm:$0xff]  }
  0x8b   :  { %1680 = vmatpush3.bf16.msra.mxu1 %v188_v20  ;;  %v2436_v44 = vld [vmem:[#allocation10 + $0x68] ss:$12 sps:$4 sm:$0xff]   ;;  %v2440_v45 = vld [vmem:[#allocation10 + $0x90] ss:$12 sps:$4 sm:$0xff]   ;;  %v2443_v46 = vld [vmem:[#allocation10 + $0xac] ss:$12 sps:$4 sm:$0xff]  }
  0x8c   :  { %1534 = vmatprep.subr.msk.bf16.mxu0 %vm180_vm0, %v166_v13  ;;  %1689 = vmatprep.subr.bf16.mxu1 %v2837_v24  ;;  %v2446_v47 = vld [vmem:[#allocation10 + $0x80] ss:$12 sps:$4 sm:$0xff]   ;;  %v2451_v48 = vld [vmem:[#allocation10 + $0xa8] ss:$12 sps:$4 sm:$0xff]   ;;  %v2456_v49 = vld [vmem:[#allocation10 + $0x98] ss:$12 sps:$4 sm:$0xff]  }
  0x8d   :  { %191 = vmatpush1.bf16.msra.mxu0 %v182_v14  ;;  %v2461_v50 = vld [vmem:[#allocation10 + $0xb0] ss:$12 sps:$4 sm:$0xff]   ;;  %s2231_s6 = smov [#allocation16]  }
  0x8e   :  { %527 = vmatprep.subr.bf16.mxu0 %v2368_v15  ;;  %1682 = vmatmul.mubr.msk.bf16.vlgmr.msra.gmra.mrb[0].mxu1 %vm167_vm1, %v129_v25  ;;  %v133_v53 = vld [vmem:[#allocation9] sm:$0x7]  ;;  %s1515_s14 = sshll.u32 %s2231_s6, 4  ;;  %s1516_s14 = int_to_ptr.vmem [resolvable:$true] %s1515_s14 }
  0x8f   :  { %1685 = vmatprep.mubr.msk.bf16.mxu1 %vm167_vm1, %v130_v27  ;;  %1690 = vmatpush3.bf16.msra.mxu1 %v2394_v31  ;;  %v138_v56 = vrot.slane %v133_v53, %v137_v52  ;;  %v142_v57 = vrot.slane %v133_v53, %v141_v54  ;;  %v146_v58 = vrot.slane %v133_v53, %v145_v55  ;;  %s2181_s0 = scalar_lea.vmem %s1516_s14, 128  ;;  %p2186_p1 = scmp.lt.s32.totalorder %s1516_s14, %s1516_s14 }
  0x90   :  { %1535 = vmatmul.mubr.msk.bf16.vlgmr.msra.gmra.mrb[0].mxu0 %vm167_vm1, %v128_v11  ;;  %1691 = vmatprep.subr.bf16.mxu1 %v2837_v24  ;;  %p2182_p0 = scmp.ne.s32.totalorder %s1516_s14, %s2181_s0  ;;  %p2187_p2 = scmp.lt.s32.totalorder %s2181_s0, %s2181_s0 }
  0x91   :  { %528 = vmatpush1.bf16.msra.mxu0 %v2372_v17  ;;  %232 = vmatprep.mubr.bf16.mxu0 %v2835_v3 }
  0x92   :  { %529 = vmatprep.subr.bf16.mxu0 %v2377_v21  ;;  %p2188_p3 = por %p2187_p2, %p2186_p1 }
  0x93   :  { %1692 = vmatpush3.bf16.msra.mxu1 %v2399_v34 }
  0x94   :  { %1693 = vmatprep.subr.bf16.mxu1 %v2837_v24  ;;  %p2189_p4 = pnand %p2188_p3, %p2182_p0 }
  0x95   :  { %530 = vmatpush1.bf16.msra.mxu0 %v2382_v26 }
  0x96   :  { %531 = vmatprep.subr.bf16.mxu0 %v2386_v28  ;;  %1686 = vmatmul.mubr.msk.bf16.gmra.mrb[4].mxu1 %vm167_vm1, %v131_v37 }
  0x97   :  { %1705 = vmatprep.mubr.msk.bf16.mxu1 %vm2229_vm2, %v2837_v24  ;;  %1694 = vmatpush3.bf16.msra.mxu1 %v2411_v38 }
  0x98   :  { %1536 = vmatmul.mubr.msk.bf16.gmra.mrb[4].mxu0 %vm167_vm1, %v129_v25  ;;  %1695 = vmatprep.subr.bf16.mxu1 %v2837_v24 }
  0x99   :  { %532 = vmatpush1.bf16.msra.mxu0 %v2389_v29  ;;  %242 = vmatprep.mubr.bf16.mxu0 %v2835_v3 }
  0x9a   :  { %533 = vmatprep.subr.bf16.mxu0 %v2392_v30 }
  0x9b   :  { %1696 = vmatpush3.bf16.msra.mxu1 %v2419_v41 }
  0x9c   :  { %1697 = vmatprep.subr.bf16.mxu1 %v2837_v24 }
  0x9d   :  { %534 = vmatpush1.bf16.msra.mxu0 %v2403_v35 }
  0x9e   :  { %535 = vmatprep.subr.bf16.mxu0 %v2407_v36 }
  0x9f   :  { %1698 = vmatpush3.bf16.msra.mxu1 %v2436_v44 }
  0xa0   :  { %1537 = vmatmul.mubr.msk.bf16.gmra.mrb[8].mxu0 %vm167_vm1, %v130_v27  ;;  %1699 = vmatprep.subr.bf16.mxu1 %v2837_v24 }
  0xa1   :  { %536 = vmatpush1.bf16.msra.mxu0 %v2413_v39  ;;  %252 = vmatprep.mubr.bf16.mxu0 %v2835_v3 }
  0xa2   :  { %537 = vmatprep.subr.bf16.mxu0 %v2417_v40 }
  0xa3   :  { %1700 = vmatpush3.bf16.msra.mxu1 %v2446_v47 }
  0xa4   :  { %1701 = vmatprep.subr.bf16.mxu1 %v2837_v24 }
  0xa5   :  { %538 = vmatpush1.bf16.msra.mxu0 %v2426_v42 }
  0xa6   :  { %539 = vmatprep.subr.bf16.mxu0 %v2433_v43 }
  0xa7   :  { %1702 = vmatpush3.bf16.msra.mxu1 %v2456_v49 }
  0xa8   :  { %1538 = vmatmul.mubr.msk.bf16.gmra.mrb[12].mxu0 %vm167_vm1, %v131_v37  ;;  %1703 = vmatprep.subr.bf16.mxu1 %v2837_v24 }
  0xa9   :  { %540 = vmatpush1.bf16.msra.mxu0 %v2440_v45  ;;  %559 = vmatprep.mubr.bf16.mxu0 %v2835_v3 }
  0xaa   :  { %541 = vmatprep.subr.bf16.mxu0 %v2443_v46 }
  0xab   :  { %1704 = vmatpush3.bf16.msra.mxu1 %v2461_v50 }
  0xac   :  { %1709 = vmatprep.subr.bf16.mxu1 %v2837_v24 }
  0xad   :  { %542 = vmatpush1.bf16.msra.mxu0 %v2451_v48 }
  0xae   :  { %636 = vmatprep.subr.bf16.mxu0 %v2368_v15  ;;  %1706 = vmatmul.mubr.bf16.vlgmr.msra.gmra.mrb[8].mxu1 %v2230_v51 }
  0xaf   :  { %1710 = vmatpush3.bf16.msra.mxu1 %v2394_v31  ;;  %1725 = vmatprep.mubr.msk.bf16.mxu1 %vm2229_vm2, %v2837_v24 }
  0xb0   :  { %560 = vmatmul.mubr.bf16.vlgmr.msra.gmra.mrb[16].mxu0 %v2230_v51  ;;  %1711 = vmatprep.subr.bf16.mxu1 %v2837_v24 }
  0xb1   :  { %637 = vmatpush1.bf16.msra.mxu0 %v2372_v17  ;;  %668 = vmatprep.mubr.bf16.mxu0 %v2835_v3 }
  0xb2   :  { %638 = vmatprep.subr.bf16.mxu0 %v2377_v21 }
  0xb3   :  { %1712 = vmatpush3.bf16.msra.mxu1 %v2399_v34 }
  0xb4   :  { %1713 = vmatprep.subr.bf16.mxu1 %v2837_v24 }
  0xb5   :  { %639 = vmatpush1.bf16.msra.mxu0 %v2382_v26 }
  0xb6   :  { %640 = vmatprep.subr.bf16.mxu0 %v2386_v28 }
  0xb7   :  { %1714 = vmatpush3.bf16.msra.mxu1 %v2411_v38 }
  0xb8   :  { %1715 = vmatprep.subr.bf16.mxu1 %v2837_v24 }
  0xb9   :  { %641 = vmatpush1.bf16.msra.mxu0 %v2389_v29 }
  0xba   :  { %642 = vmatprep.subr.bf16.mxu0 %v2392_v30 }
  0xbb   :  { %1716 = vmatpush3.bf16.msra.mxu1 %v2419_v41 }
  0xbc   :  { %1717 = vmatprep.subr.bf16.mxu1 %v2837_v24 }
  0xbd   :  { %643 = vmatpush1.bf16.msra.mxu0 %v2403_v35 }
  0xbe   :  { %644 = vmatprep.subr.bf16.mxu0 %v2407_v36 }
  0xbf   :  { %1718 = vmatpush3.bf16.msra.mxu1 %v2436_v44 }
  0xc0   :  { %1719 = vmatprep.subr.bf16.mxu1 %v2837_v24 }
  0xc1   :  { %645 = vmatpush1.bf16.msra.mxu0 %v2413_v39 }
  0xc2   :  { %646 = vmatprep.subr.bf16.mxu0 %v2417_v40 }
  0xc3   :  { %1720 = vmatpush3.bf16.msra.mxu1 %v2446_v47 }
  0xc4   :  { %1721 = vmatprep.subr.bf16.mxu1 %v2837_v24 }
  0xc5   :  { %647 = vmatpush1.bf16.msra.mxu0 %v2426_v42 }
  0xc6   :  { %648 = vmatprep.subr.bf16.mxu0 %v2433_v43 }
  0xc7   :  { %1722 = vmatpush3.bf16.msra.mxu1 %v2456_v49 }
  0xc8   :  { %1723 = vmatprep.subr.bf16.mxu1 %v2837_v24 }
  0xc9   :  { %649 = vmatpush1.bf16.msra.mxu0 %v2440_v45 }
  0xca   :  { %650 = vmatprep.subr.bf16.mxu0 %v2443_v46 }
  0xcb   :  { %1724 = vmatpush3.bf16.msra.mxu1 %v2461_v50 }
  0xcc   :  { %1729 = vmatprep.subr.bf16.mxu1 %v2837_v24 }
  0xcd   :  { %651 = vmatpush1.bf16.msra.mxu0 %v2451_v48 }
  0xce   :  { %745 = vmatprep.subr.bf16.mxu0 %v2368_v15 }
 0x161   :  { %v1683_v0 = vpop.f32.mrb[0].mxu1 }
 0x162   :  { %v2507_v5 = vadd.f32 %v1683_v0, %v146_v58  ;;  %v297_v6 = vpop.f32.mrb[1].mxu1 }
 0x163   :  { %v224_v59 = vpop.f32.mrb[0].mxu0  ;;  %v298_v8 = vadd.f32 %v297_v6, %v146_v58  ;;  %v1684_v9 = vpop.f32.mrb[2].mxu1 }
 0x164   :  { %v225_v60 = vadd.f32 %v224_v59, %v138_v56  ;;  %v226_v61 = vpop.f32.mrb[1].mxu0  ;;  %v2511_v4 = vadd.f32 %v1684_v9, %v146_v58  ;;  %v300_v10 = vpop.f32.mrb[3].mxu1 }
 0x165   :  { %v227_v62 = vadd.f32 %v226_v61, %v142_v57  ;;  %v228_v63 = vpop.f32.mrb[2].mxu0  ;;  %v2513_v11 = vadd.f32 %v300_v10, %v146_v58 }
 0x166   :  { %v2505_v1 = vadd.f32 %v228_v63, %v138_v56  ;;  %v230_v2 = vpop.f32.mrb[3].mxu0 }
 0x167   :  { %v2509_v7 = vadd.f32 %v230_v2, %v142_v57 }
 0x169   :  { %v1687_v22 = vpop.f32.mrb[4].mxu1 }
 0x16a   :  { %v2523_v25 = vadd.f32 %v1687_v22, %v146_v58  ;;  %v313_v27 = vpop.f32.mrb[5].mxu1 }
 0x16b   :  { %v234_v12 = vpop.f32.mrb[4].mxu0  ;;  %v2525_v32 = vadd.f32 %v313_v27, %v146_v58  ;;  %v1688_v33 = vpop.f32.mrb[6].mxu1 }
 0x16c   :  { %v2515_v13 = vadd.f32 %v234_v12, %v138_v56  ;;  %v236_v14 = vpop.f32.mrb[5].mxu0  ;;  %2839 = vst [vmem:[#allocation22_spill] sm:$0xff] %v2523_v25  ;;  %v2527_v37 = vadd.f32 %v1688_v33, %v146_v58  ;;  %v316_v51 = vpop.f32.mrb[7].mxu1 }
 0x16d   :  { %v2517_v16 = vadd.f32 %v236_v14, %v142_v57  ;;  %v238_v18 = vpop.f32.mrb[6].mxu0  ;;  %v2529_v52 = vadd.f32 %v316_v51, %v146_v58 }
 0x16e   :  { %v2519_v19 = vadd.f32 %v238_v18, %v138_v56  ;;  %v240_v20 = vpop.f32.mrb[7].mxu0  ;;  %2840 = vst [vmem:[#allocation23_spill] sm:$0xff] %v2527_v37 }
 0x16f   :  { %v2521_v23 = vadd.f32 %v240_v20, %v142_v57 }
 0x173   :  { %v244_v53 = vpop.f32.mrb[8].mxu0 }
 0x174   :  { %v2531_v54 = vadd.f32 %v244_v53, %v138_v56  ;;  %v246_v55 = vpop.f32.mrb[9].mxu0 }
 0x175   :  { %v2533_v59 = vadd.f32 %v246_v55, %v142_v57  ;;  %v248_v61 = vpop.f32.mrb[10].mxu0 }
 0x176   :  { %v2535_v63 = vadd.f32 %v248_v61, %v138_v56  ;;  %v250_v0 = vpop.f32.mrb[11].mxu0 }
 0x177   :  { %v2537_v2 = vadd.f32 %v250_v0, %v142_v57 }
 0x17b   :  { %v254_v6 = vpop.f32.mrb[12].mxu0 }
 0x17c   :  { %v2539_v9 = vadd.f32 %v254_v6, %v138_v56  ;;  %v256_v10 = vpop.f32.mrb[13].mxu0 }
 0x17d   :  { %v2541_v12 = vadd.f32 %v256_v10, %v142_v57  ;;  %v258_v58 = vpop.f32.mrb[14].mxu0 }
 0x17e   :  { %v2543_v14 = vadd.f32 %v258_v58, %v138_v56  ;;  %v260_v18 = vpop.f32.mrb[15].mxu0  ;;  %v2547_v56 = vld [vmem:[#allocation12] ss:$0 sm:$0xff] }
 0x17f   :  { %v2545_v20 = vadd.f32 %v260_v18, %v142_v57 }
 0x181   :  { %v602_v0 = vpop.f32.mrb[8].mxu1 }
 0x182   :  { %v1707_v6 = vpop.f32.mrb[9].mxu1  ;;  %v622_v57 = vadd.f32 %v2547_v56, %v602_v0 }
 0x183   :  { %v561_v22 = vpop.f32.mrb[16].mxu0  ;;  %v605_v3 = vpop.f32.mrb[10].mxu1 }
 0x184   :  { %v608_v27 = vadd.f32 %v561_v22, %v225_v60  ;;  %v563_v33 = vpop.f32.mrb[17].mxu0  ;;  %v1708_v24 = vpop.f32.mrb[11].mxu1 }
 0x185   :  { %v615_v51 = vadd.f32 %v563_v33, %v227_v62  ;;  %v565_v53 = vpop.f32.mrb[18].mxu0 }
 0x186   :  { %v1568_v55 = vmul.f32 -1.442695, %v608_v27  ;;  %v566_v61 = vpop.f32.mrb[19].mxu0 }
 0x187   :  { %v1569_v10 = vmul.f32 -1.442695, %v615_v51 }
 0x188   :  { %1930 = vpow2.f32 %v1568_v55 }
 0x189   :  { %1932 = vpow2.f32 %v1569_v10 }
 0x192   :  { %v1931_v37 = vpop.eup %1930 }
 0x193   :  { %v612_v25 = vadd.f32 1.0, %v1931_v37  ;;  %v1933_v60 = vpop.eup %1932  ;;  %v2842_v37 = vmov 0  }
 0x194   :  { %v619_v18 = vadd.f32 1.0, %v1933_v60 }
 0x195   :  { %1934 = vrcp.f32 %v612_v25 }
 0x19f   :  { %v1935_v58 = vpop.eup %1934 }
 0x1a0   :  { %v623_v62 = vmul.f32 %v1935_v58, %v622_v57 }
 0x1a2   :  { %v624_v22 = vadd.f32 %v623_v62, %v298_v8  ;;  %v2841_v8 = vmov 0.0  }
 0x1a4   :  { %1936 = vtanh.f32 %v624_v22 }
 0x1a5   :  { %1938 = vrcp.f32 %v619_v18 }
 0x1ae   :  { %v1937_v27 = vpop.eup %1936 }
 0x1af   :  { %v626_v33 = vsub.f32 0.0, %v1937_v27  ;;  %v1939_v3 = vpop.eup %1938 }
 0x1b1   :  { %v627_v24 = vmul.f32 %v1939_v3, %v626_v33 }
 0x1b3   :  { %v2550_v51 = vadd.f32 %v1937_v27, %v627_v24 }
 0x1b5   :  { %v635_v25 = vpack.c.bf16 %v2550_v51, %v2550_v51 }
 0x1b7   :  { %669 = vmatmul.mubr.bf16.vlgmr.msra.gmra.mrb[20].mxu0 %v635_v25  ;;  %1726 = vmatmul.mubr.bf16.vlgmr.msra.gmra.mrb[12].mxu1 %v635_v25 }
 0x1b8   :  { %746 = vmatpush1.bf16.msra.mxu0 %v2372_v17  ;;  %1730 = vmatpush3.bf16.msra.mxu1 %v2394_v31 }
 0x1b9   :  { %747 = vmatprep.subr.bf16.mxu0 %v2377_v21  ;;  %1731 = vmatprep.subr.bf16.mxu1 %v2841_v8 }
 0x1ba   :  { %777 = vmatprep.mubr.bf16.mxu0 %v2842_v37  ;;  %1745 = vmatprep.mubr.msk.bf16.mxu1 %vm2229_vm2, %v2841_v8 }
 0x1bc   :  { %748 = vmatpush1.bf16.msra.mxu0 %v2382_v26  ;;  %1732 = vmatpush3.bf16.msra.mxu1 %v2399_v34 }
 0x1bd   :  { %749 = vmatprep.subr.bf16.mxu0 %v2386_v28  ;;  %1733 = vmatprep.subr.bf16.mxu1 %v2841_v8 }
 0x1c0   :  { %750 = vmatpush1.bf16.msra.mxu0 %v2389_v29  ;;  %1734 = vmatpush3.bf16.msra.mxu1 %v2411_v38 }
 0x1c1   :  { %751 = vmatprep.subr.bf16.mxu0 %v2392_v30  ;;  %1735 = vmatprep.subr.bf16.mxu1 %v2841_v8 }
 0x1c4   :  { %752 = vmatpush1.bf16.msra.mxu0 %v2403_v35  ;;  %1736 = vmatpush3.bf16.msra.mxu1 %v2419_v41 }
 0x1c5   :  { %753 = vmatprep.subr.bf16.mxu0 %v2407_v36  ;;  %1737 = vmatprep.subr.bf16.mxu1 %v2841_v8 }
 0x1c8   :  { %754 = vmatpush1.bf16.msra.mxu0 %v2413_v39  ;;  %1738 = vmatpush3.bf16.msra.mxu1 %v2436_v44 }
 0x1c9   :  { %755 = vmatprep.subr.bf16.mxu0 %v2417_v40  ;;  %1739 = vmatprep.subr.bf16.mxu1 %v2841_v8 }
 0x1cc   :  { %756 = vmatpush1.bf16.msra.mxu0 %v2426_v42  ;;  %1740 = vmatpush3.bf16.msra.mxu1 %v2446_v47 }
 0x1cd   :  { %757 = vmatprep.subr.bf16.mxu0 %v2433_v43  ;;  %1741 = vmatprep.subr.bf16.mxu1 %v2841_v8 }
 0x1d0   :  { %758 = vmatpush1.bf16.msra.mxu0 %v2440_v45  ;;  %1742 = vmatpush3.bf16.msra.mxu1 %v2456_v49 }
 0x1d1   :  { %759 = vmatprep.subr.bf16.mxu0 %v2443_v46  ;;  %1743 = vmatprep.subr.bf16.mxu1 %v2841_v8 }
 0x1d4   :  { %760 = vmatpush1.bf16.msra.mxu0 %v2451_v48  ;;  %1744 = vmatpush3.bf16.msra.mxu1 %v2461_v50 }
 0x1d5   :  { %854 = vmatprep.subr.bf16.mxu0 %v2368_v15  ;;  %1749 = vmatprep.subr.bf16.mxu1 %v2841_v8 }
 0x28a   :  { %v670_v53 = vpop.f32.mrb[20].mxu0  ;;  %v711_v55 = vpop.f32.mrb[12].mxu1 }
 0x28b   :  { %v717_v61 = vadd.f32 %v670_v53, %v2505_v1  ;;  %v672_v0 = vpop.f32.mrb[21].mxu0  ;;  %v1727_v6 = vpop.f32.mrb[13].mxu1  ;;  %v731_v24 = vadd.f32 %v2547_v56, %v711_v55 }
 0x28c   :  { %v724_v10 = vadd.f32 %v672_v0, %v2509_v7  ;;  %v674_v57 = vpop.f32.mrb[22].mxu0  ;;  %v714_v60 = vpop.f32.mrb[14].mxu1 }
 0x28d   :  { %v1570_v58 = vmul.f32 -1.442695, %v717_v61  ;;  %v675_v62 = vpop.f32.mrb[23].mxu0  ;;  %v1728_v18 = vpop.f32.mrb[15].mxu1 }
 0x28e   :  { %v1571_v22 = vmul.f32 -1.442695, %v724_v10 }
 0x28f   :  { %1940 = vpow2.f32 %v1570_v58 }
 0x290   :  { %1942 = vpow2.f32 %v1571_v22 }
 0x299   :  { %v1941_v27 = vpop.eup %1940 }
 0x29a   :  { %v721_v33 = vadd.f32 1.0, %v1941_v27  ;;  %v1943_v3 = vpop.eup %1942 }
 0x29b   :  { %v728_v6 = vadd.f32 1.0, %v1943_v3 }
 0x29c   :  { %1944 = vrcp.f32 %v721_v33 }
 0x2a6   :  { %v1945_v25 = vpop.eup %1944 }
 0x2a7   :  { %v732_v1 = vmul.f32 %v1945_v25, %v731_v24 }
 0x2a9   :  { %v733_v53 = vadd.f32 %v732_v1, %v2513_v11 }
 0x2ab   :  { %1946 = vtanh.f32 %v733_v53 }
 0x2ac   :  { %1948 = vrcp.f32 %v728_v6 }
 0x2b5   :  { %v1947_v7 = vpop.eup %1946 }
 0x2b6   :  { %v735_v61 = vsub.f32 %v2550_v51, %v1947_v7  ;;  %v1949_v0 = vpop.eup %1948 }
 0x2b8   :  { %v736_v57 = vmul.f32 %v1949_v0, %v735_v61 }
 0x2ba   :  { %v2594_v10 = vadd.f32 %v1947_v7, %v736_v57 }
 0x2bc   :  { %v744_v60 = vpack.c.bf16 %v2594_v10, %v2594_v10 }
 0x2be   :  { %778 = vmatmul.mubr.bf16.vlgmr.msra.gmra.mrb[24].mxu0 %v744_v60  ;;  %1746 = vmatmul.mubr.bf16.vlgmr.msra.gmra.mrb[16].mxu1 %v744_v60 }
 0x2bf   :  { %855 = vmatpush1.bf16.msra.mxu0 %v2372_v17  ;;  %1750 = vmatpush3.bf16.msra.mxu1 %v2394_v31 }
 0x2c0   :  { %856 = vmatprep.subr.bf16.mxu0 %v2377_v21  ;;  %1751 = vmatprep.subr.bf16.mxu1 %v2841_v8 }
 0x2c1   :  { %886 = vmatprep.mubr.bf16.mxu0 %v2842_v37  ;;  %1765 = vmatprep.mubr.msk.bf16.mxu1 %vm2229_vm2, %v2841_v8 }
 0x2c3   :  { %857 = vmatpush1.bf16.msra.mxu0 %v2382_v26  ;;  %1752 = vmatpush3.bf16.msra.mxu1 %v2399_v34 }
 0x2c4   :  { %858 = vmatprep.subr.bf16.mxu0 %v2386_v28  ;;  %1753 = vmatprep.subr.bf16.mxu1 %v2841_v8 }
 0x2c7   :  { %859 = vmatpush1.bf16.msra.mxu0 %v2389_v29  ;;  %1754 = vmatpush3.bf16.msra.mxu1 %v2411_v38 }
 0x2c8   :  { %860 = vmatprep.subr.bf16.mxu0 %v2392_v30  ;;  %1755 = vmatprep.subr.bf16.mxu1 %v2841_v8 }
 0x2cb   :  { %861 = vmatpush1.bf16.msra.mxu0 %v2403_v35  ;;  %1756 = vmatpush3.bf16.msra.mxu1 %v2419_v41 }
 0x2cc   :  { %862 = vmatprep.subr.bf16.mxu0 %v2407_v36  ;;  %1757 = vmatprep.subr.bf16.mxu1 %v2841_v8 }
 0x2cf   :  { %863 = vmatpush1.bf16.msra.mxu0 %v2413_v39  ;;  %1758 = vmatpush3.bf16.msra.mxu1 %v2436_v44 }
 0x2d0   :  { %864 = vmatprep.subr.bf16.mxu0 %v2417_v40  ;;  %1759 = vmatprep.subr.bf16.mxu1 %v2841_v8 }
 0x2d3   :  { %865 = vmatpush1.bf16.msra.mxu0 %v2426_v42  ;;  %1760 = vmatpush3.bf16.msra.mxu1 %v2446_v47 }
 0x2d4   :  { %866 = vmatprep.subr.bf16.mxu0 %v2433_v43  ;;  %1761 = vmatprep.subr.bf16.mxu1 %v2841_v8 }
 0x2d7   :  { %867 = vmatpush1.bf16.msra.mxu0 %v2440_v45  ;;  %1762 = vmatpush3.bf16.msra.mxu1 %v2456_v49 }
 0x2d8   :  { %868 = vmatprep.subr.bf16.mxu0 %v2443_v46  ;;  %1763 = vmatprep.subr.bf16.mxu1 %v2841_v8 }
 0x2db   :  { %869 = vmatpush1.bf16.msra.mxu0 %v2451_v48  ;;  %1764 = vmatpush3.bf16.msra.mxu1 %v2461_v50 }
 0x2dc   :  { %963 = vmatprep.subr.bf16.mxu0 %v2368_v15  ;;  %1769 = vmatprep.subr.bf16.mxu1 %v2841_v8 }
 0x391   :  { %v779_v11 = vpop.f32.mrb[24].mxu0  ;;  %v820_v51 = vpop.f32.mrb[16].mxu1 }
 0x392   :  { %v826_v55 = vadd.f32 %v779_v11, %v2515_v13  ;;  %v781_v58 = vpop.f32.mrb[25].mxu0  ;;  %v1747_v62 = vpop.f32.mrb[17].mxu1  ;;  %v840_v7 = vadd.f32 %v2547_v56, %v820_v51 }
 0x393   :  { %v833_v18 = vadd.f32 %v781_v58, %v2517_v16  ;;  %v783_v22 = vpop.f32.mrb[26].mxu0  ;;  %v823_v27 = vpop.f32.mrb[18].mxu1 }
 0x394   :  { %v1572_v33 = vmul.f32 -1.442695, %v826_v55  ;;  %v784_v3 = vpop.f32.mrb[27].mxu0  ;;  %v1748_v24 = vpop.f32.mrb[19].mxu1 }
 0x395   :  { %v1573_v25 = vmul.f32 -1.442695, %v833_v18 }
 0x396   :  { %1950 = vpow2.f32 %v1572_v33 }
 0x397   :  { %1952 = vpow2.f32 %v1573_v25 }
 0x3a0   :  { %v1951_v1 = vpop.eup %1950 }
 0x3a1   :  { %v830_v53 = vadd.f32 1.0, %v1951_v1  ;;  %v1953_v6 = vpop.eup %1952 }
 0x3a2   :  { %v837_v57 = vadd.f32 1.0, %v1953_v6 }
 0x3a3   :  { %1954 = vrcp.f32 %v830_v53 }
 0x3ad   :  { %v1955_v61 = vpop.eup %1954 }
 0x3ae   :  { %v841_v13 = vmul.f32 %v1955_v61, %v840_v7 }
 0x3b0   :  { %v842_v0 = vadd.f32 %v841_v13, %v2507_v5 }
 0x3b2   :  { %1956 = vtanh.f32 %v842_v0 }
 0x3b3   :  { %1958 = vrcp.f32 %v837_v57 }
 0x3bc   :  { %v1957_v16 = vpop.eup %1956 }
 0x3bd   :  { %v844_v60 = vsub.f32 %v2594_v10, %v1957_v16  ;;  %v1959_v11 = vpop.eup %1958 }
 0x3bf   :  { %v845_v55 = vmul.f32 %v1959_v11, %v844_v60 }
 0x3c1   :  { %v2638_v58 = vadd.f32 %v1957_v16, %v845_v55 }
 0x3c3   :  { %v853_v62 = vpack.c.bf16 %v2638_v58, %v2638_v58 }
 0x3c5   :  { %887 = vmatmul.mubr.bf16.vlgmr.msra.gmra.mrb[28].mxu0 %v853_v62  ;;  %1766 = vmatmul.mubr.bf16.vlgmr.msra.gmra.mrb[20].mxu1 %v853_v62 }
 0x3c6   :  { %964 = vmatpush1.bf16.msra.mxu0 %v2372_v17  ;;  %1770 = vmatpush3.bf16.msra.mxu1 %v2394_v31 }
 0x3c7   :  { %965 = vmatprep.subr.bf16.mxu0 %v2377_v21  ;;  %1771 = vmatprep.subr.bf16.mxu1 %v2841_v8 }
 0x3c8   :  { %995 = vmatprep.mubr.bf16.mxu0 %v2842_v37  ;;  %1785 = vmatprep.mubr.msk.bf16.mxu1 %vm2229_vm2, %v2841_v8 }
 0x3ca   :  { %966 = vmatpush1.bf16.msra.mxu0 %v2382_v26  ;;  %1772 = vmatpush3.bf16.msra.mxu1 %v2399_v34 }
 0x3cb   :  { %967 = vmatprep.subr.bf16.mxu0 %v2386_v28  ;;  %1773 = vmatprep.subr.bf16.mxu1 %v2841_v8 }
 0x3ce   :  { %968 = vmatpush1.bf16.msra.mxu0 %v2389_v29  ;;  %1774 = vmatpush3.bf16.msra.mxu1 %v2411_v38 }
 0x3cf   :  { %969 = vmatprep.subr.bf16.mxu0 %v2392_v30  ;;  %1775 = vmatprep.subr.bf16.mxu1 %v2841_v8 }
 0x3d2   :  { %970 = vmatpush1.bf16.msra.mxu0 %v2403_v35  ;;  %1776 = vmatpush3.bf16.msra.mxu1 %v2419_v41 }
 0x3d3   :  { %971 = vmatprep.subr.bf16.mxu0 %v2407_v36  ;;  %1777 = vmatprep.subr.bf16.mxu1 %v2841_v8 }
 0x3d6   :  { %972 = vmatpush1.bf16.msra.mxu0 %v2413_v39  ;;  %1778 = vmatpush3.bf16.msra.mxu1 %v2436_v44 }
 0x3d7   :  { %973 = vmatprep.subr.bf16.mxu0 %v2417_v40  ;;  %1779 = vmatprep.subr.bf16.mxu1 %v2841_v8 }
 0x3da   :  { %974 = vmatpush1.bf16.msra.mxu0 %v2426_v42  ;;  %1780 = vmatpush3.bf16.msra.mxu1 %v2446_v47 }
 0x3db   :  { %975 = vmatprep.subr.bf16.mxu0 %v2433_v43  ;;  %1781 = vmatprep.subr.bf16.mxu1 %v2841_v8 }
 0x3de   :  { %976 = vmatpush1.bf16.msra.mxu0 %v2440_v45  ;;  %1782 = vmatpush3.bf16.msra.mxu1 %v2456_v49 }
 0x3df   :  { %977 = vmatprep.subr.bf16.mxu0 %v2443_v46  ;;  %1783 = vmatprep.subr.bf16.mxu1 %v2841_v8 }
 0x3e2   :  { %978 = vmatpush1.bf16.msra.mxu0 %v2451_v48  ;;  %1784 = vmatpush3.bf16.msra.mxu1 %v2461_v50 }
 0x3e3   :  { %1072 = vmatprep.subr.bf16.mxu0 %v2368_v15  ;;  %1789 = vmatprep.subr.bf16.mxu1 %v2841_v8 }
 0x498   :  { %v888_v5 = vpop.f32.mrb[28].mxu0  ;;  %v929_v10 = vpop.f32.mrb[20].mxu1 }
 0x499   :  { %v935_v51 = vadd.f32 %v888_v5, %v2519_v19  ;;  %v890_v18 = vpop.f32.mrb[29].mxu0  ;;  %v1767_v22 = vpop.f32.mrb[21].mxu1  ;;  %v949_v13 = vadd.f32 %v2547_v56, %v929_v10 }
 0x49a   :  { %v942_v27 = vadd.f32 %v890_v18, %v2521_v23  ;;  %v892_v33 = vpop.f32.mrb[30].mxu0  ;;  %v932_v3 = vpop.f32.mrb[22].mxu1 }
 0x49b   :  { %v1574_v24 = vmul.f32 -1.442695, %v935_v51  ;;  %v893_v25 = vpop.f32.mrb[31].mxu0  ;;  %v1768_v1 = vpop.f32.mrb[23].mxu1 }
 0x49c   :  { %v1575_v53 = vmul.f32 -1.442695, %v942_v27 }
 0x49d   :  { %1960 = vpow2.f32 %v1574_v24 }
 0x49e   :  { %1962 = vpow2.f32 %v1575_v53 }
 0x4a7   :  { %v1961_v6 = vpop.eup %1960 }
 0x4a8   :  { %v939_v7 = vadd.f32 1.0, %v1961_v6  ;;  %v1963_v61 = vpop.eup %1962 }
 0x4a9   :  { %v946_v16 = vadd.f32 1.0, %v1963_v61 }
 0x4aa   :  { %1964 = vrcp.f32 %v939_v7 }
 0x4b4   :  { %v1965_v0 = vpop.eup %1964 }
 0x4b5   :  { %v950_v19 = vmul.f32 %v1965_v0, %v949_v13 }
 0x4b7   :  { %v951_v57 = vadd.f32 %v950_v19, %v2511_v4 }
 0x4b9   :  { %1966 = vtanh.f32 %v951_v57 }
 0x4ba   :  { %1968 = vrcp.f32 %v946_v16 }
 0x4c3   :  { %v1967_v23 = vpop.eup %1966 }
 0x4c4   :  { %v953_v60 = vsub.f32 %v2638_v58, %v1967_v23  ;;  %v1969_v11 = vpop.eup %1968 }
 0x4c6   :  { %v954_v55 = vmul.f32 %v1969_v11, %v953_v60 }
 0x4c8   :  { %v2682_v62 = vadd.f32 %v1967_v23, %v954_v55  ;;  %v2730_v23 = vld [vmem:[#allocation10] ss:$12 sps:$4 sm:$0xff]  }
 0x4ca   :  { %v962_v5 = vpack.c.bf16 %v2682_v62, %v2682_v62 }
 0x4cc   :  { %996 = vmatmul.mubr.bf16.vlgmr.msra.gmra.mrb[32].mxu0 %v962_v5  ;;  %1786 = vmatmul.mubr.bf16.vlgmr.msra.gmra.mrb[24].mxu1 %v962_v5 }
 0x4cd   :  { %1073 = vmatpush1.bf16.msra.mxu0 %v2372_v17  ;;  %1790 = vmatpush3.bf16.msra.mxu1 %v2394_v31 }
 0x4ce   :  { %1074 = vmatprep.subr.bf16.mxu0 %v2377_v21  ;;  %1791 = vmatprep.subr.bf16.mxu1 %v2841_v8 }
 0x4cf   :  { %1104 = vmatprep.mubr.bf16.mxu0 %v2842_v37  ;;  %1805 = vmatprep.mubr.msk.bf16.mxu1 %vm2229_vm2, %v2841_v8 }
 0x4d1   :  { %1075 = vmatpush1.bf16.msra.mxu0 %v2382_v26  ;;  %1792 = vmatpush3.bf16.msra.mxu1 %v2399_v34 }
 0x4d2   :  { %1076 = vmatprep.subr.bf16.mxu0 %v2386_v28  ;;  %1793 = vmatprep.subr.bf16.mxu1 %v2841_v8 }
 0x4d5   :  { %1077 = vmatpush1.bf16.msra.mxu0 %v2389_v29  ;;  %1794 = vmatpush3.bf16.msra.mxu1 %v2411_v38 }
 0x4d6   :  { %1078 = vmatprep.subr.bf16.mxu0 %v2392_v30  ;;  %1795 = vmatprep.subr.bf16.mxu1 %v2841_v8 }
 0x4d9   :  { %1079 = vmatpush1.bf16.msra.mxu0 %v2403_v35  ;;  %1796 = vmatpush3.bf16.msra.mxu1 %v2419_v41 }
 0x4da   :  { %1080 = vmatprep.subr.bf16.mxu0 %v2407_v36  ;;  %1797 = vmatprep.subr.bf16.mxu1 %v2841_v8 }
 0x4dd   :  { %1081 = vmatpush1.bf16.msra.mxu0 %v2413_v39  ;;  %1798 = vmatpush3.bf16.msra.mxu1 %v2436_v44 }
 0x4de   :  { %1082 = vmatprep.subr.bf16.mxu0 %v2417_v40  ;;  %1799 = vmatprep.subr.bf16.mxu1 %v2841_v8 }
 0x4e1   :  { %1083 = vmatpush1.bf16.msra.mxu0 %v2426_v42  ;;  %1800 = vmatpush3.bf16.msra.mxu1 %v2446_v47 }
 0x4e2   :  { %1084 = vmatprep.subr.bf16.mxu0 %v2433_v43  ;;  %1801 = vmatprep.subr.bf16.mxu1 %v2841_v8 }
 0x4e5   :  { %1085 = vmatpush1.bf16.msra.mxu0 %v2440_v45  ;;  %1802 = vmatpush3.bf16.msra.mxu1 %v2456_v49 }
 0x4e6   :  { %1086 = vmatprep.subr.bf16.mxu0 %v2443_v46  ;;  %1803 = vmatprep.subr.bf16.mxu1 %v2841_v8 }
 0x4e9   :  { %1087 = vmatpush1.bf16.msra.mxu0 %v2451_v48  ;;  %1804 = vmatpush3.bf16.msra.mxu1 %v2461_v50 }
 0x4ea   :  { %1181 = vmatprep.subr.bf16.mxu0 %v2368_v15  ;;  %1809 = vmatprep.subr.bf16.mxu1 %v2841_v8 }
 0x59f   :  { %v997_v17 = vpop.f32.mrb[32].mxu0  ;;  %v1038_v21 = vpop.f32.mrb[24].mxu1 }
 0x5a0   :  { %v1044_v4 = vadd.f32 %v997_v17, %v2531_v54  ;;  %v999_v58 = vpop.f32.mrb[33].mxu0  ;;  %v1787_v10 = vpop.f32.mrb[25].mxu1  ;;  %v1058_v53 = vadd.f32 %v2547_v56, %v1038_v21 }
 0x5a1   :  { %v1051_v51 = vadd.f32 %v999_v58, %v2533_v59  ;;  %v1001_v18 = vpop.f32.mrb[34].mxu0  ;;  %v1041_v22 = vpop.f32.mrb[26].mxu1 }
 0x5a2   :  { %v1576_v27 = vmul.f32 -1.442695, %v1044_v4  ;;  %v1002_v33 = vpop.f32.mrb[35].mxu0  ;;  %v1788_v3 = vpop.f32.mrb[27].mxu1  ;;  %v2013_v18 = vld [vmem:[#allocation10 + $0x8] ss:$12 sps:$4 sm:$0xff]  }
 0x5a3   :  { %v1577_v24 = vmul.f32 -1.442695, %v1051_v51  ;;  %v2015_v22 = vld [vmem:[#allocation10 + $0x20] ss:$12 sps:$4 sm:$0xff]   ;;  %v2017_v33 = vld [vmem:[#allocation10 + $0x30] ss:$12 sps:$4 sm:$0xff]  }
 0x5a4   :  { %1970 = vpow2.f32 %v1576_v27  ;;  %v2016_v27 = vld [vmem:[#allocation10 + $0x34] ss:$12 sps:$4 sm:$0xff]   ;;  %v2018_v3 = vld [vmem:[#allocation10 + $0x38] ss:$12 sps:$4 sm:$0xff]  }
 0x5a5   :  { %1972 = vpow2.f32 %v1577_v24  ;;  %v2019_v24 = vld [vmem:[#allocation10 + $0x4c] ss:$12 sps:$4 sm:$0xff]  }
 0x5ae   :  { %v1971_v25 = vpop.eup %1970 }
 0x5af   :  { %v1048_v1 = vadd.f32 1.0, %v1971_v25  ;;  %v1973_v15 = vpop.eup %1972  ;;  %v2021_v25 = vld [vmem:[#allocation10 + $0x50] ss:$12 sps:$4 sm:$0xff]  }
 0x5b0   :  { %v1055_v61 = vadd.f32 1.0, %v1973_v15  ;;  %v2023_v15 = vld [vmem:[#allocation10 + $0x60] ss:$12 sps:$4 sm:$0xff]  }
 0x5b1   :  { %1974 = vrcp.f32 %v1048_v1  ;;  %v2022_v1 = vld [vmem:[#allocation10 + $0x64] ss:$12 sps:$4 sm:$0xff]  }
 0x5bb   :  { %v1975_v6 = vpop.eup %1974 }
 0x5bc   :  { %v1059_v54 = vmul.f32 %v1975_v6, %v1058_v53  ;;  %v2024_v53 = vld [vmem:[#allocation10 + $0x7c] ss:$12 sps:$4 sm:$0xff]   ;;  %v2025_v6 = vld [vmem:[#allocation10 + $0x78] ss:$12 sps:$4 sm:$0xff]  }
 0x5be   :  { %v1060_v7 = vadd.f32 %v1059_v54, %v2525_v32  ;;  %v2734_v32 = vld [vmem:[#allocation10 + $0x1c] ss:$12 sps:$4 sm:$0xff]   ;;  %v2026_v54 = vld [vmem:[#allocation10 + $0x94] ss:$12 sps:$4 sm:$0xff]  }
 0x5c0   :  { %1976 = vtanh.f32 %v1060_v7 }
 0x5c1   :  { %1978 = vrcp.f32 %v1055_v61 }
 0x5ca   :  { %v1977_v59 = vpop.eup %1976 }
 0x5cb   :  { %v1062_v13 = vsub.f32 %v2682_v62, %v1977_v59  ;;  %v1979_v0 = vpop.eup %1978 }
 0x5cd   :  { %v1063_v19 = vmul.f32 %v1979_v0, %v1062_v13 }
 0x5cf   :  { %v2726_v57 = vadd.f32 %v1977_v59, %v1063_v19 }
 0x5d1   :  { %v1071_v16 = vpack.c.bf16 %v2726_v57, %v2726_v57 }
 0x5d3   :  { %1105 = vmatmul.mubr.bf16.vlgmr.msra.gmra.mrb[36].mxu0 %v1071_v16  ;;  %1806 = vmatmul.mubr.bf16.vlgmr.msra.gmra.mrb[28].mxu1 %v1071_v16 }
 0x5d4   :  { %1182 = vmatpush1.bf16.msra.mxu0 %v2730_v23  ;;  %1810 = vmatpush3.bf16.msra.mxu1 %v2394_v31 }
 0x5d5   :  { %1183 = vmatprep.subr.bf16.mxu0 %v2734_v32  ;;  %1811 = vmatprep.subr.bf16.mxu1 %v2841_v8 }
 0x5d6   :  { %1213 = vmatprep.mubr.bf16.mxu0 %v2842_v37  ;;  %1825 = vmatprep.mubr.msk.bf16.mxu1 %vm2229_vm2, %v2841_v8 }
 0x5d8   :  { %1184 = vmatpush1.bf16.msra.mxu0 %v2382_v26  ;;  %1812 = vmatpush3.bf16.msra.mxu1 %v2399_v34  ;;  %v2012_v26 = vld [vmem:[#allocation10 + $0x4] ss:$12 sps:$4 sm:$0xff]  }
 0x5d9   :  { %1185 = vmatprep.subr.bf16.mxu0 %v2386_v28  ;;  %1813 = vmatprep.subr.bf16.mxu1 %v2841_v8 }
 0x5dc   :  { %1186 = vmatpush1.bf16.msra.mxu0 %v2389_v29  ;;  %1814 = vmatpush3.bf16.msra.mxu1 %v2411_v38 }
 0x5dd   :  { %1187 = vmatprep.subr.bf16.mxu0 %v2392_v30  ;;  %1815 = vmatprep.subr.bf16.mxu1 %v2841_v8 }
 0x5e0   :  { %1188 = vmatpush1.bf16.msra.mxu0 %v2403_v35  ;;  %1816 = vmatpush3.bf16.msra.mxu1 %v2419_v41 }
 0x5e1   :  { %1189 = vmatprep.subr.bf16.mxu0 %v2407_v36  ;;  %1817 = vmatprep.subr.bf16.mxu1 %v2841_v8 }
 0x5e4   :  { %1190 = vmatpush1.bf16.msra.mxu0 %v2413_v39  ;;  %1818 = vmatpush3.bf16.msra.mxu1 %v2436_v44 }
 0x5e5   :  { %1191 = vmatprep.subr.bf16.mxu0 %v2417_v40  ;;  %1819 = vmatprep.subr.bf16.mxu1 %v2841_v8 }
 0x5e8   :  { %1192 = vmatpush1.bf16.msra.mxu0 %v2426_v42  ;;  %1820 = vmatpush3.bf16.msra.mxu1 %v2446_v47 }
 0x5e9   :  { %1193 = vmatprep.subr.bf16.mxu0 %v2433_v43  ;;  %1821 = vmatprep.subr.bf16.mxu1 %v2841_v8 }
 0x5ec   :  { %1194 = vmatpush1.bf16.msra.mxu0 %v2440_v45  ;;  %1822 = vmatpush3.bf16.msra.mxu1 %v2456_v49 }
 0x5ed   :  { %1195 = vmatprep.subr.bf16.mxu0 %v2443_v46  ;;  %1823 = vmatprep.subr.bf16.mxu1 %v2841_v8 }
 0x5f0   :  { %1196 = vmatpush1.bf16.msra.mxu0 %v2451_v48  ;;  %1824 = vmatpush3.bf16.msra.mxu1 %v2461_v50 }
 0x5f1   :  { %1290 = vmatprep.subr.bf16.mxu0 %v2012_v26  ;;  %1829 = vmatprep.subr.bf16.mxu1 %v2841_v8  ;;  %v2843_v26 = vld [vmem:[#allocation22_spill] sm:$0xff] }
 0x6a6   :  { %v1106_v28 = vpop.f32.mrb[36].mxu0  ;;  %v1147_v29 = vpop.f32.mrb[28].mxu1 }
 0x6a7   :  { %v1153_v30 = vadd.f32 %v1106_v28, %v2535_v63  ;;  %v1108_v31 = vpop.f32.mrb[37].mxu0  ;;  %v1807_v34 = vpop.f32.mrb[29].mxu1  ;;  %v1167_v55 = vadd.f32 %v2547_v56, %v1147_v29 }
 0x6a8   :  { %v1160_v35 = vadd.f32 %v1108_v31, %v2537_v2  ;;  %v1110_v36 = vpop.f32.mrb[38].mxu0  ;;  %v1150_v38 = vpop.f32.mrb[30].mxu1 }
 0x6a9   :  { %v1578_v39 = vmul.f32 -1.442695, %v1153_v30  ;;  %v1111_v40 = vpop.f32.mrb[39].mxu0  ;;  %v1808_v41 = vpop.f32.mrb[31].mxu1  ;;  %v1922_v38 = vld [vmem:[#allocation13] sm:$0xff]  }
 0x6aa   :  { %v1579_v42 = vmul.f32 -1.442695, %v1160_v35  ;;  %v1924_v40 = vld [vmem:[#allocation13 + $0x10] sm:$0xff]   ;;  %v1925_v41 = vld [vmem:[#allocation13 + $0x18] sm:$0xff]  }
 0x6ab   :  { %1980 = vpow2.f32 %v1578_v39  ;;  %v1923_v39 = vld [vmem:[#allocation13 + $0x8] sm:$0xff]  }
 0x6ac   :  { %1982 = vpow2.f32 %v1579_v42  ;;  %v1926_v42 = vld [vmem:[#allocation13 + $0x20] sm:$0xff]  }
 0x6b5   :  { %v1981_v43 = vpop.eup %1980 }
 0x6b6   :  { %v1157_v60 = vadd.f32 1.0, %v1981_v43  ;;  %v1983_v11 = vpop.eup %1982  ;;  %v1927_v43 = vld [vmem:[#allocation13 + $0x28] sm:$0xff]  }
 0x6b7   :  { %v1164_v17 = vadd.f32 1.0, %v1983_v11  ;;  %v1929_v11 = vld [vmem:[#allocation13 + $0x38] sm:$0xff]  }
 0x6b8   :  { %1984 = vrcp.f32 %v1157_v60  ;;  %v1928_v60 = vld [vmem:[#allocation13 + $0x30] sm:$0xff]  }
 0x6c2   :  { %v1985_v62 = vpop.eup %1984 }
 0x6c3   :  { %v1168_v63 = vmul.f32 %v1985_v62, %v1167_v55 }
 0x6c5   :  { %v1169_v5 = vadd.f32 %v1168_v63, %v2529_v52  ;;  %v2014_v52 = vld [vmem:[#allocation10 + $0x18] ss:$12 sps:$4 sm:$0xff]  }
 0x6c7   :  { %1986 = vtanh.f32 %v1169_v5 }
 0x6c8   :  { %1988 = vrcp.f32 %v1164_v17 }
 0x6d1   :  { %v1987_v2 = vpop.eup %1986 }
 0x6d2   :  { %v1171_v21 = vsub.f32 %v2726_v57, %v1987_v2  ;;  %v1989_v4 = vpop.eup %1988 }
 0x6d4   :  { %v1172_v58 = vmul.f32 %v1989_v4, %v1171_v21 }
 0x6d6   :  { %v2773_v10 = vadd.f32 %v1987_v2, %v1172_v58 }
 0x6d8   :  { %v1180_v51 = vpack.c.bf16 %v2773_v10, %v2773_v10 }
 0x6da   :  { %1214 = vmatmul.mubr.bf16.vlgmr.msra.gmra.mrb[40].mxu0 %v1180_v51  ;;  %1826 = vmatmul.mubr.bf16.vlgmr.msra.gmra.mrb[32].mxu1 %v1180_v51 }
 0x6db   :  { %1291 = vmatpush1.bf16.msra.mxu0 %v2730_v23  ;;  %1830 = vmatpush3.bf16.msra.mxu1 %v2013_v18 }
 0x6dc   :  { %1292 = vmatprep.subr.bf16.mxu0 %v2734_v32  ;;  %1831 = vmatprep.subr.bf16.mxu1 %v2841_v8 }
 0x6dd   :  { %1322 = vmatprep.mubr.bf16.mxu0 %v2842_v37  ;;  %1845 = vmatprep.mubr.msk.bf16.mxu1 %vm2229_vm2, %v2841_v8  ;;  %v2020_v37 = vld [vmem:[#allocation10 + $0x48] ss:$12 sps:$4 sm:$0xff]  }
 0x6df   :  { %1293 = vmatpush1.bf16.msra.mxu0 %v2014_v52  ;;  %1832 = vmatpush3.bf16.msra.mxu1 %v2015_v22 }
 0x6e0   :  { %1294 = vmatprep.subr.bf16.mxu0 %v2016_v27  ;;  %1833 = vmatprep.subr.bf16.mxu1 %v2841_v8 }
 0x6e3   :  { %1295 = vmatpush1.bf16.msra.mxu0 %v2017_v33  ;;  %1834 = vmatpush3.bf16.msra.mxu1 %v2018_v3  ;;  %v2844_v3 = vld [vmem:[#allocation23_spill] sm:$0xff] }
 0x6e4   :  { %1296 = vmatprep.subr.bf16.mxu0 %v2019_v24  ;;  %1835 = vmatprep.subr.bf16.mxu1 %v2841_v8 }
 0x6e7   :  { %1297 = vmatpush1.bf16.msra.mxu0 %v2020_v37  ;;  %1836 = vmatpush3.bf16.msra.mxu1 %v2021_v25 }
 0x6e8   :  { %1298 = vmatprep.subr.bf16.mxu0 %v2022_v1  ;;  %1837 = vmatprep.subr.bf16.mxu1 %v2841_v8 }
 0x6eb   :  { %1299 = vmatpush1.bf16.msra.mxu0 %v2023_v15  ;;  %1838 = vmatpush3.bf16.msra.mxu1 %v2436_v44 }
 0x6ec   :  { %1300 = vmatprep.subr.bf16.mxu0 %v2024_v53  ;;  %1839 = vmatprep.subr.bf16.mxu1 %v2841_v8 }
 0x6ef   :  { %1301 = vmatpush1.bf16.msra.mxu0 %v2025_v6  ;;  %1840 = vmatpush3.bf16.msra.mxu1 %v2446_v47 }
 0x6f0   :  { %1302 = vmatprep.subr.bf16.mxu0 %v2026_v54  ;;  %1841 = vmatprep.subr.bf16.mxu1 %v2841_v8  ;;  %v1584_v54 = vld [vmem:[#allocation15] ss:$0 sm:$0xff] }
 0x6f3   :  { %1303 = vmatpush1.bf16.msra.mxu0 %v2440_v45  ;;  %1842 = vmatpush3.bf16.msra.mxu1 %v2456_v49 }
 0x6f4   :  { %1304 = vmatprep.subr.bf16.mxu0 %v2443_v46  ;;  %1843 = vmatprep.subr.bf16.mxu1 %v2841_v8 }
 0x6f7   :  { %1305 = vmatpush1.bf16.msra.mxu0 %v2451_v48  ;;  %1844 = vmatpush3.bf16.msra.mxu1 %v2461_v50 }
 0x6f8   :  { %1849 = vmatprep.subr.bf16.mxu0 %v2841_v8 }
 0x7ad   :  { %v1215_v44 = vpop.f32.mrb[40].mxu0  ;;  %v1256_v47 = vpop.f32.mrb[32].mxu1 }
 0x7ae   :  { %v1262_v7 = vadd.f32 %v1215_v44, %v2539_v9  ;;  %v1217_v61 = vpop.f32.mrb[41].mxu0  ;;  %v1827_v59 = vpop.f32.mrb[33].mxu1  ;;  %v1276_v23 = vadd.f32 %v2547_v56, %v1256_v47 }
 0x7af   :  { %v1269_v45 = vadd.f32 %v1217_v61, %v2541_v12  ;;  %v1219_v13 = vpop.f32.mrb[42].mxu0  ;;  %v1259_v49 = vpop.f32.mrb[34].mxu1 }
 0x7b0   :  { %v1580_v0 = vmul.f32 -1.442695, %v1262_v7  ;;  %v1220_v46 = vpop.f32.mrb[43].mxu0  ;;  %v1828_v19 = vpop.f32.mrb[35].mxu1 }
 0x7b1   :  { %v1581_v57 = vmul.f32 -1.442695, %v1269_v45 }
 0x7b2   :  { %1990 = vpow2.f32 %v1580_v0 }
 0x7b3   :  { %1992 = vpow2.f32 %v1581_v57 }
 0x7bc   :  { %v1991_v48 = vpop.eup %1990 }
 0x7bd   :  { %v1266_v16 = vadd.f32 1.0, %v1991_v48  ;;  %v1993_v50 = vpop.eup %1992 }
 0x7be   :  { %v1273_v29 = vadd.f32 1.0, %v1993_v50 }
 0x7bf   :  { %1994 = vrcp.f32 %v1266_v16 }
 0x7c9   :  { %v1995_v32 = vpop.eup %1994 }
 0x7ca   :  { %v1277_v9 = vmul.f32 %v1995_v32, %v1276_v23 }
 0x7cc   :  { %v1278_v28 = vadd.f32 %v1277_v9, %v2843_v26 }
 0x7ce   :  { %1996 = vtanh.f32 %v1278_v28 }
 0x7cf   :  { %1998 = vrcp.f32 %v1273_v29 }
 0x7d8   :  { %v1997_v12 = vpop.eup %1996 }
 0x7d9   :  { %v1280_v30 = vsub.f32 %v2773_v10, %v1997_v12  ;;  %v1999_v31 = vpop.eup %1998 }
 0x7db   :  { %v1281_v34 = vmul.f32 %v1999_v31, %v1280_v30 }
 0x7dd   :  { %v1282_v35 = vadd.f32 %v1997_v12, %v1281_v34 }
 0x7df   :  { %v1289_v36 = vpack.c.bf16 %v1282_v35, %v1282_v35 }
 0x7e1   :  { %1323 = vmatmul.mubr.bf16.vlgmr.msra.gmra.mrb[44].mxu0 %v1289_v36  ;;  %1846 = vmatmul.mubr.bf16.vlgmr.msra.gmra.mrb[36].mxu1 %v1289_v36 }
 0x7e2   :  { %1865 = vmatprep.mubr.msk.bf16.mxu0 %vm2229_vm2, %v2841_v8  ;;  %1850 = vmatpush3.bf16.msra.mxu0 %v1922_v38 }
 0x7e3   :  { %1851 = vmatprep.subr.bf16.mxu0 %v2841_v8 }
 0x7e6   :  { %1852 = vmatpush3.bf16.msra.mxu0 %v1923_v39 }
 0x7e7   :  { %1853 = vmatprep.subr.bf16.mxu0 %v2841_v8 }
 0x7ea   :  { %1854 = vmatpush3.bf16.msra.mxu0 %v1924_v40 }
 0x7eb   :  { %1855 = vmatprep.subr.bf16.mxu0 %v2841_v8 }
 0x7ee   :  { %1856 = vmatpush3.bf16.msra.mxu0 %v1925_v41 }
 0x7ef   :  { %1857 = vmatprep.subr.bf16.mxu0 %v2841_v8 }
 0x7f2   :  { %1858 = vmatpush3.bf16.msra.mxu0 %v1926_v42 }
 0x7f3   :  { %1859 = vmatprep.subr.bf16.mxu0 %v2841_v8 }
 0x7f6   :  { %1860 = vmatpush3.bf16.msra.mxu0 %v1927_v43 }
 0x7f7   :  { %1861 = vmatprep.subr.bf16.mxu0 %v2841_v8 }
 0x7fa   :  { %1862 = vmatpush3.bf16.msra.mxu0 %v1928_v60 }
 0x7fb   :  { %1863 = vmatprep.subr.bf16.mxu0 %v2841_v8 }
 0x7fe   :  { %1864 = vmatpush3.bf16.msra.mxu0 %v1929_v11 }
 0x8b4   :  { %v1324_v55 = vpop.f32.mrb[44].mxu0  ;;  %v1365_v62 = vpop.f32.mrb[36].mxu1 }
 0x8b5   :  { %v1371_v63 = vadd.f32 %v1324_v55, %v2543_v14  ;;  %v1326_v5 = vpop.f32.mrb[45].mxu0  ;;  %v1847_v17 = vpop.f32.mrb[37].mxu1  ;;  %v1385_v27 = vadd.f32 %v2547_v56, %v1365_v62 }
 0x8b6   :  { %v1378_v2 = vadd.f32 %v1326_v5, %v2545_v20  ;;  %v1328_v21 = vpop.f32.mrb[46].mxu0  ;;  %v1368_v4 = vpop.f32.mrb[38].mxu1 }
 0x8b7   :  { %v1582_v58 = vmul.f32 -1.442695, %v1371_v63  ;;  %v1329_v10 = vpop.f32.mrb[47].mxu0  ;;  %v1848_v51 = vpop.f32.mrb[39].mxu1 }
 0x8b8   :  { %v1583_v18 = vmul.f32 -1.442695, %v1378_v2 }
 0x8b9   :  { %2000 = vpow2.f32 %v1582_v58 }
 0x8ba   :  { %2002 = vpow2.f32 %v1583_v18 }
 0x8c3   :  { %v2001_v52 = vpop.eup %2000 }
 0x8c4   :  { %v1375_v22 = vadd.f32 1.0, %v2001_v52  ;;  %v2003_v8 = vpop.eup %2002 }
 0x8c5   :  { %v1382_v37 = vadd.f32 1.0, %v2003_v8 }
 0x8c6   :  { %2004 = vrcp.f32 %v1375_v22 }
 0x8d0   :  { %v2005_v33 = vpop.eup %2004 }
 0x8d1   :  { %v1386_v14 = vmul.f32 %v2005_v33, %v1385_v27 }
 0x8d3   :  { %v1387_v24 = vadd.f32 %v1386_v14, %v2844_v3 }
 0x8d5   :  { %2006 = vtanh.f32 %v1387_v24 }
 0x8d6   :  { %2008 = vrcp.f32 %v1382_v37 }
 0x8df   :  { %v2007_v20 = vpop.eup %2006 }
 0x8e0   :  { %v1389_v25 = vsub.f32 %v1282_v35, %v2007_v20  ;;  %v2009_v1 = vpop.eup %2008 }
 0x8e2   :  { %v1390_v15 = vmul.f32 %v2009_v1, %v1389_v25 }
 0x8e4   :  { %v1391_v53 = vadd.f32 %v2007_v20, %v1390_v15 }
 0x8e6   :  { %v1396_v6 = vpack.c.bf16 %v1391_v53, %v1391_v53 }
 0x8e8   :  { %1866 = vmatmul.mubr.bf16.vlgmr.msra.gmra.mrb[48].mxu0 %v1396_v6 }
 0x9bb   :  { %v1502_v44 = vpop.f32.mrb[48].mxu0 }
 0x9bc   :  { %v1503_v47 = vadd.f32 %v1584_v54, %v1502_v44  ;;  %v1867_v56 = vpop.f32.mrb[49].mxu0 }
 0x9bd   :  { %v1505_v7 = vpop.f32.mrb[50].mxu0 }
 0x9be   :  { %1508 = vst [vmem:[#allocation16] sm:$0xff] %v1503_v47  ;;  %v1868_v61 = vpop.f32.mrb[51].mxu0 }
 0x9bf   :  { %2192 = shalt.err (!%p2189_p4)
}
 0x9c0   :  { %s2193_s17 = scalar_lea.hbm %s2834_s7, 128 }
 0x9c1   :  { %p2194_p5 = scmp.ne.s32.totalorder %s2834_s7, %s2193_s17  ;;  %p2197_p6 = scmp.lt.u32.totalorder %s2193_s17, %s2834_s7 }
 0x9c3   :  { %p2199_p7 = pnand %p2197_p6, %p2194_p5 }
 0x9c5   :  { %2202 = shalt.err (!%p2199_p7)
}
 0x9c6   :  { %1518 = dma.vmem_to_hbm [thread:$0]  %s1516_s14, 128, %s2834_s7, [#allocation6]  }
 0x9c7   :  { %2211 = dma.done.wait [#allocation6], 128  }
 0x9c8   :  { %2212 = vsyncadd [#allocation6], 4294967168 }
 0x9c9   :  { %1522 = vsyncpa [#allocation5], 1 }
 0x9ca   :  { %1523 = vsyncpa [#allocation8], 1 }
 0x9cb   :  { %1524 = vsyncpa [#allocation11], 1 }
 0x9cc   :  { %1525 = vsyncpa [#allocation14], 1 }
 0x9cd   :  { %1526 = vsyncpa [#allocation6], 1 }

</bundles_post_ra>
